<compile_context>
chip_gen: v7x
topology: tpu7x:2x2x1
jax: 0.10.0
libtpu: 0.0.40
codegen_flags: <defaults>
</compile_context>

<pallas_src>
import math
import functools

import jax
import jax.numpy as jnp
from jax.experimental import pallas as pl
from jax.experimental.pallas import tpu as pltpu


_VMEM_LIMIT = 48 * 1024 * 1024     # headroom even on v7x's 64 MiB VMEM
_LN_EPS = 1e-5
_COMPUTE_DTYPE = jnp.bfloat16      # MXU operand dtype; accumulation / LN / softmax in fp32


def _row_tile(m):
    # Full array when small; 512-row tiles otherwise (amortizes per-step overhead while
    # staying inside the v7x VMEM budget).
    return m if m <= 1024 else 512


def _q_tile(lq):
    # Query-row tile for attention: adds a second "parallel" grid axis so both v7x
    # TensorCores are busy at small batch.  Only exact divisors (no masked softmax tails).
    if lq <= 256:
        return lq
    for t in (256, 128, 64):
        if lq % t == 0:
            return t
    return lq


# ------------------------------ small helpers --------------------------------


def _ln(z, g_ref, b_ref, eps):
    mu = jnp.mean(z, axis=-1, keepdims=True)
    var = jnp.mean((z - mu) ** 2, axis=-1, keepdims=True)
    return (z - mu) * jax.lax.rsqrt(var + eps) * g_ref[...] + b_ref[...]


def _softmax_rows(s):
    s = s - jnp.max(s, axis=-1, keepdims=True)
    e = jnp.exp(s)
    return e * pl.reciprocal(jnp.sum(e, axis=-1, keepdims=True), approx=True)


# ------------------------- fused projection kernels --------------------------


def _proj2_kernel(x1_ref, x2_ref, w1_ref, w2_ref, b_ref, o_ref):
    acc = jnp.dot(x1_ref[...], w1_ref[...], preferred_element_type=jnp.float32)
    acc = acc + jnp.dot(x2_ref[...], w2_ref[...], preferred_element_type=jnp.float32)
    o_ref[...] = (acc + b_ref[...]).astype(o_ref.dtype)


def fused_proj2(x1, x2, w1t, w2t, b):
    """x1 @ w1t + x2 @ w2t + b, row-tiled; weights pre-transposed/packed to (K, N)."""
    m, k1 = x1.shape
    k2 = x2.shape[1]
    n = w1t.shape[1]
    tm = _row_tile(m)
    return pl.pallas_call(
        _proj2_kernel,
        out_shape=jax.ShapeDtypeStruct((m, n), x1.dtype),
        grid=(pl.cdiv(m, tm),),
        in_specs=[
            pl.BlockSpec((tm, k1), lambda i: (i, 0)),
            pl.BlockSpec((tm, k2), lambda i: (i, 0)),
            pl.BlockSpec((k1, n), lambda i: (0, 0)),
            pl.BlockSpec((k2, n), lambda i: (0, 0)),
            pl.BlockSpec((1, n), lambda i: (0, 0)),
        ],
        out_specs=pl.BlockSpec((tm, n), lambda i: (i, 0)),
        compiler_params=pltpu.CompilerParams(
            dimension_semantics=("parallel",), vmem_limit_bytes=_VMEM_LIMIT),
    )(x1, x2, w1t, w2t, b)


def _ca_qproj_kernel(x_ref, p_ref, s_ref, wq_ref, wp_ref, ws_ref, bq_ref, bs_ref,
                     qc_ref, qs_ref):
    qc = (jnp.dot(x_ref[...], wq_ref[...], preferred_element_type=jnp.float32)
          + jnp.dot(p_ref[...], wp_ref[...], preferred_element_type=jnp.float32)
          + bq_ref[...])
    qs = (jnp.dot(s_ref[...], ws_ref[...], preferred_element_type=jnp.float32)
          + bs_ref[...])
    # two lane-dense stores -- no (tm, 2D) concat materialized
    qc_ref[...] = qc.astype(qc_ref.dtype)
    qs_ref[...] = qs.astype(qs_ref.dtype)


def ca_qproj(x, p, s, wq_t, wp_t, ws_t, bq, bsn):
    """Cross-attn query projections: returns (q_content(+q_pos), q_sine_proj)."""
    m, d = x.shape
    tm = _row_tile(m)
    row_spec = pl.BlockSpec((tm, d), lambda i: (i, 0))
    w_spec = pl.BlockSpec((d, d), lambda i: (0, 0))
    b_spec = pl.BlockSpec((1, d), lambda i: (0, 0))
    return pl.pallas_call(
        _ca_qproj_kernel,
        out_shape=(jax.ShapeDtypeStruct((m, d), x.dtype),
                   jax.ShapeDtypeStruct((m, d), x.dtype)),
        grid=(pl.cdiv(m, tm),),
        in_specs=[row_spec, row_spec, row_spec, w_spec, w_spec, w_spec, b_spec, b_spec],
        out_specs=(row_spec, row_spec),
        compiler_params=pltpu.CompilerParams(
            dimension_semantics=("parallel",), vmem_limit_bytes=_VMEM_LIMIT),
    )(x, p, s, wq_t, wp_t, ws_t, bq, bsn)


# --------------- fused attention (+ out_proj + residual + LN) ----------------


def _attn_epilogue(acc, res_ref, bo_ref, g_ref, b_ref, o_ref, eps):
    z = acc + bo_ref[...] + res_ref[0].astype(jnp.float32)
    o_ref[0] = _ln(z, g_ref, b_ref, eps).astype(o_ref.dtype)


def _sa_attn_kernel(q_ref, k_ref, v_ref, res_ref, wo_ref, bo_ref, g_ref, b_ref, o_ref,
                    *, nhead, eps):
    q = q_ref[0]                                  # (tq, D) bf16, softmax scale pre-folded
    kT = jnp.transpose(k_ref[0], (1, 0))          # (D, Lk) -- ONE shared transpose
    v = v_ref[0]                                  # (Lk, D)
    d = q.shape[-1]
    hd = d // nhead
    acc = jnp.zeros((q.shape[0], d), jnp.float32)
    for h in range(nhead):
        lo, hi = h * hd, (h + 1) * hd
        s = jnp.dot(q[:, lo:hi], kT[lo:hi, :], preferred_element_type=jnp.float32)
        p = _softmax_rows(s)
        oh = jnp.dot(p.astype(v.dtype), v[:, lo:hi], preferred_element_type=jnp.float32)
        # head-merge + out_proj folded into a per-head row-slice matmul (no lane concat)
        acc = acc + jnp.dot(oh.astype(wo_ref.dtype), wo_ref[lo:hi, :],
                            preferred_element_type=jnp.float32)
    _attn_epilogue(acc, res_ref, bo_ref, g_ref, b_ref, o_ref, eps)


def _ca_attn_kernel(qc_ref, qs_ref, k_ref, kp_ref, v_ref, res_ref, wo_ref, bo_ref,
                    g_ref, b_ref, o_ref, *, nhead, eps):
    qc = qc_ref[0]                                # (tq, D)
    qs = qs_ref[0]                                # (tq, D)
    kT = jnp.transpose(k_ref[0], (1, 0))          # (D, Lk)
    kpT = jnp.transpose(kp_ref[0], (1, 0))        # (D, Lk)
    v = v_ref[0]                                  # (Lk, D)
    d = qc.shape[-1]
    hd = d // nhead
    acc = jnp.zeros((qc.shape[0], d), jnp.float32)
    for h in range(nhead):
        lo, hi = h * hd, (h + 1) * hd
        # per-head concat'd query is [q_h | q_sine_h]; score = q_h.k_h + q_sine_h.k_pos_h
        s = (jnp.dot(qc[:, lo:hi], kT[lo:hi, :], preferred_element_type=jnp.float32)
             + jnp.dot(qs[:, lo:hi], kpT[lo:hi, :], preferred_element_type=jnp.float32))
        p = _softmax_rows(s)
        oh = jnp.dot(p.astype(v.dtype), v[:, lo:hi], preferred_element_type=jnp.float32)
        acc = acc + jnp.dot(oh.astype(wo_ref.dtype), wo_ref[lo:hi, :],
                            preferred_element_type=jnp.float32)
    _attn_epilogue(acc, res_ref, bo_ref, g_ref, b_ref, o_ref, eps)


def attn_self(qkv, res, wo_t, bo, g, b, nhead, eps=_LN_EPS):
    bsz, seq, three_d = qkv.shape
    d = three_d // 3
    tq = _q_tile(seq)
    kern = functools.partial(_sa_attn_kernel, nhead=nhead, eps=eps)
    q_spec = pl.BlockSpec((1, tq, d), lambda i, j: (i, j, 0))
    const2 = lambda i, j: (0, 0)
    return pl.pallas_call(
        kern,
        out_shape=jax.ShapeDtypeStruct((bsz, seq, d), res.dtype),
        grid=(bsz, seq // tq),
        in_specs=[
            q_spec,                                              # q columns, query-row tile
            pl.BlockSpec((1, seq, d), lambda i, j: (i, 0, 1)),   # k columns, full rows
            pl.BlockSpec((1, seq, d), lambda i, j: (i, 0, 2)),   # v columns, full rows
            q_spec,                                              # residual
            pl.BlockSpec((d, d), const2),
            pl.BlockSpec((1, d), const2),
            pl.BlockSpec((1, d), const2),
            pl.BlockSpec((1, d), const2),
        ],
        out_specs=q_spec,
        compiler_params=pltpu.CompilerParams(
            dimension_semantics=("parallel", "parallel"), vmem_limit_bytes=_VMEM_LIMIT),
    )(qkv, qkv, qkv, res, wo_t, bo, g, b)


def attn_cross(qc, qs, kvp, res, wo_t, bo, g, b, nhead, eps=_LN_EPS):
    bsz, lq, d = qc.shape
    lk = kvp.shape[1]
    tq = _q_tile(lq)
    kern = functools.partial(_ca_attn_kernel, nhead=nhead, eps=eps)
    q_spec = pl.BlockSpec((1, tq, d), lambda i, j: (i, j, 0))
    const2 = lambda i, j: (0, 0)
    return pl.pallas_call(
        kern,
        out_shape=jax.ShapeDtypeStruct((bsz, lq, d), res.dtype),
        grid=(bsz, lq // tq),
        in_specs=[
            q_spec,                                              # q content
            q_spec,                                              # q sine
            pl.BlockSpec((1, lk, d), lambda i, j: (i, 0, 0)),    # k
            pl.BlockSpec((1, lk, d), lambda i, j: (i, 0, 1)),    # k_pos
            pl.BlockSpec((1, lk, d), lambda i, j: (i, 0, 2)),    # v
            q_spec,                                              # residual
            pl.BlockSpec((d, d), const2),
            pl.BlockSpec((1, d), const2),
            pl.BlockSpec((1, d), const2),
            pl.BlockSpec((1, d), const2),
        ],
        out_specs=q_spec,
        compiler_params=pltpu.CompilerParams(
            dimension_semantics=("parallel", "parallel"), vmem_limit_bytes=_VMEM_LIMIT),
    )(qc, qs, kvp, kvp, kvp, res, wo_t, bo, g, b)


# ----------------------- FFN + residual + LayerNorm --------------------------


def _ffn_ln_kernel(x_ref, w1_ref, b1_ref, w2_ref, b2_ref, g_ref, b_ref, o_ref,
                   *, eps, ff_chunk):
    x = x_ref[...]                                   # (tm, D) bf16
    ff = w1_ref.shape[1]
    d_out = w2_ref.shape[1]
    acc = jnp.zeros((x.shape[0], d_out), jnp.float32)
    # chunk the hidden dim: bounds the fp32 relu intermediate held across the two matmuls
    for c in range(0, ff, ff_chunk):
        h = (jnp.dot(x, w1_ref[:, c:c + ff_chunk], preferred_element_type=jnp.float32)
             + b1_ref[:, c:c + ff_chunk])
        h = jnp.maximum(h, 0.0)
        acc = acc + jnp.dot(h.astype(w2_ref.dtype), w2_ref[c:c + ff_chunk, :],
                            preferred_element_type=jnp.float32)
    z = acc + b2_ref[...] + x.astype(jnp.float32)
    o_ref[...] = _ln(z, g_ref, b_ref, eps).astype(o_ref.dtype)


def ffn_ln(x, w1t, b1, w2t, b2, g, b, eps=_LN_EPS):
    m, d = x.shape
    ff = w1t.shape[1]
    ff_chunk = 512 if (ff > 512 and ff % 512 == 0) else ff
    tm = _row_tile(m)
    const1 = lambda i: (0, 0)
    return pl.pallas_call(
        functools.partial(_ffn_ln_kernel, eps=eps, ff_chunk=ff_chunk),
        out_shape=jax.ShapeDtypeStruct((m, d), x.dtype),
        grid=(pl.cdiv(m, tm),),
        in_specs=[
            pl.BlockSpec((tm, d), lambda i: (i, 0)),
            pl.BlockSpec((d, ff), const1),
            pl.BlockSpec((1, ff), const1),
            pl.BlockSpec((ff, d), const1),
            pl.BlockSpec((1, d), const1),
            pl.BlockSpec((1, d), const1),
            pl.BlockSpec((1, d), const1),
        ],
        out_specs=pl.BlockSpec((tm, d), lambda i: (i, 0)),
        compiler_params=pltpu.CompilerParams(
            dimension_semantics=("parallel",), vmem_limit_bytes=_VMEM_LIMIT),
    )(x, w1t, b1, w2t, b2, g, b)


# ------------------------------ forward pass ---------------------------------


def decoder_layer_forward_bm(pp, tgt_b, mem_b, pos_b, qpos_b, qse_b, *, nhead):
    """Batch-major (B, S, D) layer body; all heavy work in fused Pallas kernels."""
    bs, nq, d = tgt_b.shape
    hw = mem_b.shape[1]
    m1, m2 = bs * nq, bs * hw

    # ---- self-attention: packed qkv proj -> attn + out_proj + residual + LN1 ----
    qkv = fused_proj2(tgt_b.reshape(m1, d), qpos_b.reshape(m1, d),
                      pp["sa_wx"], pp["sa_wp"], pp["sa_b"])               # (m1, 3D)
    tgt_b = attn_self(qkv.reshape(bs, nq, 3 * d), tgt_b,
                      pp["sa_wo_t"], pp["sa_bo"], pp["ln1_g"], pp["ln1_b"], nhead)

    # ---- cross-attention ----
    qc, qs = ca_qproj(tgt_b.reshape(m1, d), qpos_b.reshape(m1, d), qse_b.reshape(m1, d),
                      pp["ca_wq"], pp["ca_wqp"], pp["ca_ws"], pp["ca_bq"], pp["ca_bs"])
    kvp = fused_proj2(mem_b.reshape(m2, d), pos_b.reshape(m2, d),
                      pp["ca_wkx"], pp["ca_wkp"], pp["ca_bk"])            # (m2, 3D)
    tgt_b = attn_cross(qc.reshape(bs, nq, d), qs.reshape(bs, nq, d),
                       kvp.reshape(bs, hw, 3 * d), tgt_b,
                       pp["ca_wo_t"], pp["ca_bo"], pp["ln2_g"], pp["ln2_b"], nhead)

    # ---- FFN + residual + LN3 ----
    out = ffn_ln(tgt_b.reshape(m1, d), pp["w1t"], pp["b1"], pp["w2t"], pp["b2"],
                 pp["ln3_g"], pp["ln3_b"])
    return out.reshape(bs, nq, d)


def decoder_layer_forward(pp, tgt, memory, pos, query_pos, query_sine_embed, *, nhead):
    # (S,B,D)->(B,S,D) layout transposes + bf16 cast done ONCE at the boundary.
    # In the full multi-layer decoder, memory/pos/query_pos/query_sine_embed are
    # layer-invariant, so these transposes hoist above the layer loop.
    to_bm = lambda x: jnp.transpose(x, (1, 0, 2)).astype(_COMPUTE_DTYPE)
    out_b = decoder_layer_forward_bm(
        pp, to_bm(tgt), to_bm(memory), to_bm(pos), to_bm(query_pos),
        to_bm(query_sine_embed), nhead=nhead)
    return jnp.transpose(out_b, (1, 0, 2)).astype(jnp.float32)


# ------------------------- parameter pre-packing -----------------------------


def prepare_params(p, nhead, is_first=True, keep_query_pos=False,
                   compute_dtype=_COMPUTE_DTYPE):
    """Pre-transpose / pre-pack / pre-scale all weights ONCE (hoisted out of forward).

    * softmax scale is folded into the query-projection weights & biases
    * matmul-operand weights are cast to bf16; biases & LN params stay fp32
    """
    gate = bool(is_first or keep_query_pos)
    d = p["sa_qcontent"][0].shape[1]
    hd = d // nhead
    sa_scale = float(hd) ** -0.5
    ca_scale = float(2 * hd) ** -0.5          # cross-attn concat'd head dim is 2*hd
    z = jnp.zeros((d, d), jnp.float32)
    t = jnp.transpose
    row = lambda v: v.reshape(1, -1).astype(jnp.float32)
    w = lambda v: v.astype(compute_dtype)

    (wqc, bqc), (wqp, bqp) = p["sa_qcontent"], p["sa_qpos"]
    (wkc, bkc), (wkp, bkp) = p["sa_kcontent"], p["sa_kpos"]
    wv, bv = p["sa_v"]
    pp = {
        # self-attention packed projections, output columns = [q | k | v]
        "sa_wx": w(jnp.concatenate([t(wqc) * sa_scale, t(wkc), t(wv)], axis=1)),
        "sa_wp": w(jnp.concatenate([t(wqp) * sa_scale, t(wkp), z], axis=1)),
        "sa_b": row(jnp.concatenate([(bqc + bqp) * sa_scale, bkc + bkp, bv])),
        "sa_wo_t": w(t(p["sa_out"][0])), "sa_bo": row(p["sa_out"][1]),
        "ln1_g": row(p["norm1"][0]), "ln1_b": row(p["norm1"][1]),
    }

    (cqc, cbqc), (cqp, cbqp) = p["ca_qcontent"], p["ca_qpos"]
    cqs, cbqs = p["ca_qpos_sine"]
    (ckc, cbkc), (ckp, cbkp) = p["ca_kcontent"], p["ca_kpos"]
    cv, cbv = p["ca_v"]
    pp.update({
        # cross-attn query projections (softmax scale folded)
        "ca_wq": w(t(cqc) * ca_scale),
        "ca_wqp": w((t(cqp) if gate else z) * ca_scale),
        "ca_bq": row((cbqc + (cbqp if gate else jnp.zeros_like(cbqp))) * ca_scale),
        "ca_ws": w(t(cqs) * ca_scale), "ca_bs": row(cbqs * ca_scale),
        # cross-attn key/value packed projections, output columns = [k | k_pos | v]
        "ca_wkx": w(jnp.concatenate([t(ckc), z, t(cv)], axis=1)),
        "ca_wkp": w(jnp.concatenate([t(ckp) if gate else z, t(ckp), z], axis=1)),
        "ca_bk": row(jnp.concatenate(
            [cbkc + (cbkp if gate else jnp.zeros_like(cbkp)), cbkp, cbv])),
        "ca_wo_t": w(t(p["ca_out"][0])), "ca_bo": row(p["ca_out"][1]),
        "ln2_g": row(p["norm2"][0]), "ln2_b": row(p["norm2"][1]),
        # FFN
        "w1t": w(t(p["linear1"][0])), "b1": row(p["linear1"][1]),
        "w2t": w(t(p["linear2"][0])), "b2": row(p["linear2"][1]),
        "ln3_g": row(p["norm3"][0]), "ln3_b": row(p["norm3"][1]),
    })
    return pp


# ----------------------------- pure-JAX reference ----------------------------


def _ref_linear(x, w, b):
    return jnp.einsum("sbd,nd->sbn", x, w) + b


def _ref_mha(q, k, v, nhead, out_w, out_b):
    L, B, E = q.shape
    S, _, Dv = v.shape
    hd, vhd = E // nhead, Dv // nhead
    scale = float(hd) ** -0.5
    qh = q.reshape(L, B, nhead, hd).transpose(1, 2, 0, 3) * scale
    kh = k.reshape(S, B, nhead, hd).transpose(1, 2, 0, 3)
    vh = v.reshape(S, B, nhead, vhd).transpose(1, 2, 0, 3)
    a = jax.nn.softmax(jnp.einsum("bhqd,bhkd->bhqk", qh, kh), axis=-1)
    o = jnp.einsum("bhqk,bhkd->bhqd", a, vh).transpose(2, 0, 1, 3).reshape(L, B, Dv)
    return _ref_linear(o, out_w, out_b)


def _ref_ln(x, g, b, eps=_LN_EPS):
    mu = jnp.mean(x, axis=-1, keepdims=True)
    var = jnp.mean((x - mu) ** 2, axis=-1, keepdims=True)
    return (x - mu) * jax.lax.rsqrt(var + eps) * g + b


def reference_forward(p, tgt, memory, pos, query_pos, query_sine_embed,
                      nhead, is_first=True, keep_query_pos=False):
    nq, bs, d = tgt.shape
    hw = memory.shape[0]
    hd = d // nhead
    gate = is_first or keep_query_pos
    q = _ref_linear(tgt, *p["sa_qcontent"]) + _ref_linear(query_pos, *p["sa_qpos"])
    k = _ref_linear(tgt, *p["sa_kcontent"]) + _ref_linear(query_pos, *p["sa_kpos"])
    v = _ref_linear(tgt, *p["sa_v"])
    tgt = _ref_ln(tgt + _ref_mha(q, k, v, nhead, *p["sa_out"]), *p["norm1"])
    q_content = _ref_linear(tgt, *p["ca_qcontent"])
    k_content = _ref_linear(memory, *p["ca_kcontent"])
    v = _ref_linear(memory, *p["ca_v"])
    k_pos = _ref_linear(pos, *p["ca_kpos"])
    if gate:
        q = q_content + _ref_linear(query_pos, *p["ca_qpos"])
        k = k_content + k_pos
    else:
        q, k = q_content, k_content
    q = q.reshape(nq, bs, nhead, hd)
    qse = _ref_linear(query_sine_embed, *p["ca_qpos_sine"]).reshape(nq, bs, nhead, hd)
    q = jnp.concatenate([q, qse], axis=3).reshape(nq, bs, 2 * d)
    k = jnp.concatenate([k.reshape(hw, bs, nhead, hd),
                         k_pos.reshape(hw, bs, nhead, hd)], axis=3).reshape(hw, bs, 2 * d)
    tgt = _ref_ln(tgt + _ref_mha(q, k, v, nhead, *p["ca_out"]), *p["norm2"])
    h = jnp.maximum(_ref_linear(tgt, *p["linear1"]), 0.0)
    tgt2 = _ref_linear(h, *p["linear2"])
    return _ref_ln(tgt + tgt2, *p["norm3"])


# --------------------------------- params ------------------------------------


def init_linear(key, d_in, d_out):
    kw, kb = jax.random.split(key)
    bound = 1.0 / math.sqrt(d_in)
    w = jax.random.uniform(kw, (d_out, d_in), jnp.float32, -bound, bound)
    b = jax.random.uniform(kb, (d_out,), jnp.float32, -bound, bound)
    return w, b


def init_params(key, d_model, nhead, dim_feedforward):
    names = ["sa_qcontent", "sa_qpos", "sa_kcontent", "sa_kpos", "sa_v", "sa_out",
             "ca_qcontent", "ca_qpos", "ca_kcontent", "ca_kpos", "ca_v",
             "ca_qpos_sine", "ca_out"]
    keys = jax.random.split(key, len(names) + 2)
    p = {}
    for n, k in zip(names, keys[:len(names)]):
        p[n] = init_linear(k, d_model, d_model)
    p["linear1"] = init_linear(keys[-2], d_model, dim_feedforward)
    p["linear2"] = init_linear(keys[-1], dim_feedforward, d_model)
    for n in ["norm1", "norm2", "norm3"]:
        p[n] = (jnp.ones((d_model,), jnp.float32), jnp.zeros((d_model,), jnp.float32))
    return p


# ----------------------------------- main -------------------------------------


if __name__ == "__main__":
    # d_model=128 keeps every column window 128-lane aligned even at these small test
    # sizes (per the review: toy d=32 leaves lanes mostly idle and isn't representative).
    d_model, nhead, dim_feedforward = 128, 4, 256
    num_queries, bs, hw = 8, 2, 16

    key = jax.random.PRNGKey(0)
    kp, k1, k2, k3, k4, k5 = jax.random.split(key, 6)
    params = init_params(kp, d_model, nhead, dim_feedforward)
    packed = prepare_params(params, nhead, is_first=True, keep_query_pos=False)

    tgt = jax.random.normal(k1, (num_queries, bs, d_model), jnp.float32)
    memory = jax.random.normal(k2, (hw, bs, d_model), jnp.float32)
    pos = jax.random.normal(k3, (hw, bs, d_model), jnp.float32)
    query_pos = jax.random.normal(k4, (num_queries, bs, d_model), jnp.float32)
    query_sine_embed = jax.random.normal(k5, (num_queries, bs, d_model), jnp.float32)

    fwd = jax.jit(functools.partial(decoder_layer_forward, nhead=nhead))
    out = jax.block_until_ready(
        fwd(packed, tgt, memory, pos, query_pos, query_sine_embed))

    ref = reference_forward(params, tgt, memory, pos, query_pos, query_sine_embed,
                            nhead, is_first=True, keep_query_pos=False)
    assert out.shape == (num_queries, bs, d_model)
    # bf16 matmul operands + approx softmax reciprocal -> relaxed tolerance vs fp32 ref
    assert jnp.allclose(out, ref, rtol=3e-2, atol=3e-2), "mismatch vs reference"

    print("KERNEL_OK")
</pallas_src>

<mosaic_0001>
module attributes {stable_mosaic.version = 11 : i64} {
  func.func @_ca_qproj_kernel(%arg0: i32, %arg1: memref<16x128xbf16, #tpu.memory_space<vmem>>, %arg2: memref<16x128xbf16, #tpu.memory_space<vmem>>, %arg3: memref<16x128xbf16, #tpu.memory_space<vmem>>, %arg4: memref<128x128xbf16, #tpu.memory_space<vmem>>, %arg5: memref<128x128xbf16, #tpu.memory_space<vmem>>, %arg6: memref<128x128xbf16, #tpu.memory_space<vmem>>, %arg7: memref<1x128xf32, #tpu.memory_space<vmem>>, %arg8: memref<1x128xf32, #tpu.memory_space<vmem>>, %arg9: memref<16x128xbf16, #tpu.memory_space<vmem>>, %arg10: memref<16x128xbf16, #tpu.memory_space<vmem>>) attributes {dimension_semantics = [#tpu.dimension_semantics<parallel>], iteration_bounds = array<i64: 1>, scalar_prefetch = 0 : i64, scratch_operands = 0 : i64, tpu.core_type = #tpu.core_type<tc>, window_params = [{transform_indices = @transform_0, window_bounds = array<i64: 16, 128>}, {transform_indices = @transform_1, window_bounds = array<i64: 16, 128>}, {transform_indices = @transform_2, window_bounds = array<i64: 16, 128>}, {pipeline_mode = #tpu.pipeline_mode<synchronous>, transform_indices = @transform_3, window_bounds = array<i64: 128, 128>}, {pipeline_mode = #tpu.pipeline_mode<synchronous>, transform_indices = @transform_4, window_bounds = array<i64: 128, 128>}, {pipeline_mode = #tpu.pipeline_mode<synchronous>, transform_indices = @transform_5, window_bounds = array<i64: 128, 128>}, {pipeline_mode = #tpu.pipeline_mode<synchronous>, transform_indices = @transform_6, window_bounds = array<i64: 1, 128>}, {pipeline_mode = #tpu.pipeline_mode<synchronous>, transform_indices = @transform_7, window_bounds = array<i64: 1, 128>}, {transform_indices = @transform_8, window_bounds = array<i64: 16, 128>}, {transform_indices = @transform_9, window_bounds = array<i64: 16, 128>}]} {
    %c0 = arith.constant 0 : index
    %c0_0 = arith.constant 0 : index
    %0 = vector.load %arg1[%c0, %c0_0] : memref<16x128xbf16, #tpu.memory_space<vmem>>, vector<16x128xbf16>
    %c0_1 = arith.constant 0 : index
    %c0_2 = arith.constant 0 : index
    %1 = vector.load %arg4[%c0_1, %c0_2] : memref<128x128xbf16, #tpu.memory_space<vmem>>, vector<128x128xbf16>
    %cst = arith.constant dense<0.000000e+00> : vector<16x128xf32>
    %2 = tpu.matmul %0, %1, %cst {dimension_numbers = #tpu.dot_dimension_numbers<[1], [0], [0], [1], [0, 0, 1, 1], [], []>} : vector<16x128xbf16>, vector<128x128xbf16>, vector<16x128xf32> -> vector<16x128xf32>
    %c0_3 = arith.constant 0 : index
    %c0_4 = arith.constant 0 : index
    %3 = vector.load %arg2[%c0_3, %c0_4] : memref<16x128xbf16, #tpu.memory_space<vmem>>, vector<16x128xbf16>
    %c0_5 = arith.constant 0 : index
    %c0_6 = arith.constant 0 : index
    %4 = vector.load %arg5[%c0_5, %c0_6] : memref<128x128xbf16, #tpu.memory_space<vmem>>, vector<128x128xbf16>
    %cst_7 = arith.constant dense<0.000000e+00> : vector<16x128xf32>
    %5 = tpu.matmul %3, %4, %cst_7 {dimension_numbers = #tpu.dot_dimension_numbers<[1], [0], [0], [1], [0, 0, 1, 1], [], []>} : vector<16x128xbf16>, vector<128x128xbf16>, vector<16x128xf32> -> vector<16x128xf32>
    %6 = arith.addf %2, %5 : vector<16x128xf32>
    %c0_8 = arith.constant 0 : index
    %c0_9 = arith.constant 0 : index
    %7 = vector.load %arg7[%c0_8, %c0_9] : memref<1x128xf32, #tpu.memory_space<vmem>>, vector<1x128xf32>
    %8 = vector.broadcast %7 : vector<1x128xf32> to vector<16x128xf32>
    %9 = arith.addf %6, %8 : vector<16x128xf32>
    %c0_10 = arith.constant 0 : index
    %c0_11 = arith.constant 0 : index
    %10 = vector.load %arg3[%c0_10, %c0_11] : memref<16x128xbf16, #tpu.memory_space<vmem>>, vector<16x128xbf16>
    %c0_12 = arith.constant 0 : index
    %c0_13 = arith.constant 0 : index
    %11 = vector.load %arg6[%c0_12, %c0_13] : memref<128x128xbf16, #tpu.memory_space<vmem>>, vector<128x128xbf16>
    %cst_14 = arith.constant dense<0.000000e+00> : vector<16x128xf32>
    %12 = tpu.matmul %10, %11, %cst_14 {dimension_numbers = #tpu.dot_dimension_numbers<[1], [0], [0], [1], [0, 0, 1, 1], [], []>} : vector<16x128xbf16>, vector<128x128xbf16>, vector<16x128xf32> -> vector<16x128xf32>
    %c0_15 = arith.constant 0 : index
    %c0_16 = arith.constant 0 : index
    %13 = vector.load %arg8[%c0_15, %c0_16] : memref<1x128xf32, #tpu.memory_space<vmem>>, vector<1x128xf32>
    %14 = vector.broadcast %13 : vector<1x128xf32> to vector<16x128xf32>
    %15 = arith.addf %12, %14 : vector<16x128xf32>
    %16 = arith.truncf %9 : vector<16x128xf32> to vector<16x128xbf16>
    %c0_17 = arith.constant 0 : index
    %c0_18 = arith.constant 0 : index
    %17 = vector.load %arg9[%c0_17, %c0_18] : memref<16x128xbf16, #tpu.memory_space<vmem>>, vector<16x128xbf16>
    tpu.vector_store %arg9[%c0_17, %c0_18], %16 {strides = array<i32>} : memref<16x128xbf16, #tpu.memory_space<vmem>>, vector<16x128xbf16>,
    %18 = arith.truncf %15 : vector<16x128xf32> to vector<16x128xbf16>
    %c0_19 = arith.constant 0 : index
    %c0_20 = arith.constant 0 : index
    %19 = vector.load %arg10[%c0_19, %c0_20] : memref<16x128xbf16, #tpu.memory_space<vmem>>, vector<16x128xbf16>
    tpu.vector_store %arg10[%c0_19, %c0_20], %18 {strides = array<i32>} : memref<16x128xbf16, #tpu.memory_space<vmem>>, vector<16x128xbf16>,
    return
  }
  func.func @transform_0(%arg0: i32) -> (i32, i32) {
    %c0_i32 = arith.constant 0 : i32
    %c0_i32_0 = arith.constant 0 : i32
    return %arg0, %c0_i32 : i32, i32
  }
  func.func @transform_1(%arg0: i32) -> (i32, i32) {
    %c0_i32 = arith.constant 0 : i32
    %c0_i32_0 = arith.constant 0 : i32
    return %arg0, %c0_i32 : i32, i32
  }
  func.func @transform_2(%arg0: i32) -> (i32, i32) {
    %c0_i32 = arith.constant 0 : i32
    %c0_i32_0 = arith.constant 0 : i32
    return %arg0, %c0_i32 : i32, i32
  }
  func.func @transform_3(%arg0: i32) -> (i32, i32) {
    %c0_i32 = arith.constant 0 : i32
    %c0_i32_0 = arith.constant 0 : i32
    %c0_i32_1 = arith.constant 0 : i32
    return %c0_i32, %c0_i32_0 : i32, i32
  }
  func.func @transform_4(%arg0: i32) -> (i32, i32) {
    %c0_i32 = arith.constant 0 : i32
    %c0_i32_0 = arith.constant 0 : i32
    %c0_i32_1 = arith.constant 0 : i32
    return %c0_i32, %c0_i32_0 : i32, i32
  }
  func.func @transform_5(%arg0: i32) -> (i32, i32) {
    %c0_i32 = arith.constant 0 : i32
    %c0_i32_0 = arith.constant 0 : i32
    %c0_i32_1 = arith.constant 0 : i32
    return %c0_i32, %c0_i32_0 : i32, i32
  }
  func.func @transform_6(%arg0: i32) -> (i32, i32) {
    %c0_i32 = arith.constant 0 : i32
    %c0_i32_0 = arith.constant 0 : i32
    %c0_i32_1 = arith.constant 0 : i32
    return %c0_i32, %c0_i32_0 : i32, i32
  }
  func.func @transform_7(%arg0: i32) -> (i32, i32) {
    %c0_i32 = arith.constant 0 : i32
    %c0_i32_0 = arith.constant 0 : i32
    %c0_i32_1 = arith.constant 0 : i32
    return %c0_i32, %c0_i32_0 : i32, i32
  }
  func.func @transform_8(%arg0: i32) -> (i32, i32) {
    %c0_i32 = arith.constant 0 : i32
    %c0_i32_0 = arith.constant 0 : i32
    return %arg0, %c0_i32 : i32, i32
  }
  func.func @transform_9(%arg0: i32) -> (i32, i32) {
    %c0_i32 = arith.constant 0 : i32
    %c0_i32_0 = arith.constant 0 : i32
    return %arg0, %c0_i32 : i32, i32
  }
}

module attributes {stable_mosaic.version = 11 : i64} {
  func.func @_proj2_kernel(%arg0: i32, %arg1: memref<16x128xbf16, #tpu.memory_space<vmem>>, %arg2: memref<16x128xbf16, #tpu.memory_space<vmem>>, %arg3: memref<128x384xbf16, #tpu.memory_space<vmem>>, %arg4: memref<128x384xbf16, #tpu.memory_space<vmem>>, %arg5: memref<1x384xf32, #tpu.memory_space<vmem>>, %arg6: memref<16x384xbf16, #tpu.memory_space<vmem>>) attributes {dimension_semantics = [#tpu.dimension_semantics<parallel>], iteration_bounds = array<i64: 1>, scalar_prefetch = 0 : i64, scratch_operands = 0 : i64, tpu.core_type = #tpu.core_type<tc>, window_params = [{transform_indices = @transform_0, window_bounds = array<i64: 16, 128>}, {transform_indices = @transform_1, window_bounds = array<i64: 16, 128>}, {pipeline_mode = #tpu.pipeline_mode<synchronous>, transform_indices = @transform_2, window_bounds = array<i64: 128, 384>}, {pipeline_mode = #tpu.pipeline_mode<synchronous>, transform_indices = @transform_3, window_bounds = array<i64: 128, 384>}, {pipeline_mode = #tpu.pipeline_mode<synchronous>, transform_indices = @transform_4, window_bounds = array<i64: 1, 384>}, {transform_indices = @transform_5, window_bounds = array<i64: 16, 384>}]} {
    %c0 = arith.constant 0 : index
    %c0_0 = arith.constant 0 : index
    %0 = vector.load %arg1[%c0, %c0_0] : memref<16x128xbf16, #tpu.memory_space<vmem>>, vector<16x128xbf16>
    %c0_1 = arith.constant 0 : index
    %c0_2 = arith.constant 0 : index
    %1 = vector.load %arg3[%c0_1, %c0_2] : memref<128x384xbf16, #tpu.memory_space<vmem>>, vector<128x384xbf16>
    %cst = arith.constant dense<0.000000e+00> : vector<16x384xf32>
    %2 = tpu.matmul %0, %1, %cst {dimension_numbers = #tpu.dot_dimension_numbers<[1], [0], [0], [1], [0, 0, 1, 1], [], []>} : vector<16x128xbf16>, vector<128x384xbf16>, vector<16x384xf32> -> vector<16x384xf32>
    %c0_3 = arith.constant 0 : index
    %c0_4 = arith.constant 0 : index
    %3 = vector.load %arg2[%c0_3, %c0_4] : memref<16x128xbf16, #tpu.memory_space<vmem>>, vector<16x128xbf16>
    %c0_5 = arith.constant 0 : index
    %c0_6 = arith.constant 0 : index
    %4 = vector.load %arg4[%c0_5, %c0_6] : memref<128x384xbf16, #tpu.memory_space<vmem>>, vector<128x384xbf16>
    %cst_7 = arith.constant dense<0.000000e+00> : vector<16x384xf32>
    %5 = tpu.matmul %3, %4, %cst_7 {dimension_numbers = #tpu.dot_dimension_numbers<[1], [0], [0], [1], [0, 0, 1, 1], [], []>} : vector<16x128xbf16>, vector<128x384xbf16>, vector<16x384xf32> -> vector<16x384xf32>
    %6 = arith.addf %2, %5 : vector<16x384xf32>
    %c0_8 = arith.constant 0 : index
    %c0_9 = arith.constant 0 : index
    %7 = vector.load %arg5[%c0_8, %c0_9] : memref<1x384xf32, #tpu.memory_space<vmem>>, vector<1x384xf32>
    %8 = vector.broadcast %7 : vector<1x384xf32> to vector<16x384xf32>
    %9 = arith.addf %6, %8 : vector<16x384xf32>
    %10 = arith.truncf %9 : vector<16x384xf32> to vector<16x384xbf16>
    %c0_10 = arith.constant 0 : index
    %c0_11 = arith.constant 0 : index
    %11 = vector.load %arg6[%c0_10, %c0_11] : memref<16x384xbf16, #tpu.memory_space<vmem>>, vector<16x384xbf16>
    tpu.vector_store %arg6[%c0_10, %c0_11], %10 {strides = array<i32>} : memref<16x384xbf16, #tpu.memory_space<vmem>>, vector<16x384xbf16>,
    return
  }
  func.func @transform_0(%arg0: i32) -> (i32, i32) {
    %c0_i32 = arith.constant 0 : i32
    %c0_i32_0 = arith.constant 0 : i32
    return %arg0, %c0_i32 : i32, i32
  }
  func.func @transform_1(%arg0: i32) -> (i32, i32) {
    %c0_i32 = arith.constant 0 : i32
    %c0_i32_0 = arith.constant 0 : i32
    return %arg0, %c0_i32 : i32, i32
  }
  func.func @transform_2(%arg0: i32) -> (i32, i32) {
    %c0_i32 = arith.constant 0 : i32
    %c0_i32_0 = arith.constant 0 : i32
    %c0_i32_1 = arith.constant 0 : i32
    return %c0_i32, %c0_i32_0 : i32, i32
  }
  func.func @transform_3(%arg0: i32) -> (i32, i32) {
    %c0_i32 = arith.constant 0 : i32
    %c0_i32_0 = arith.constant 0 : i32
    %c0_i32_1 = arith.constant 0 : i32
    return %c0_i32, %c0_i32_0 : i32, i32
  }
  func.func @transform_4(%arg0: i32) -> (i32, i32) {
    %c0_i32 = arith.constant 0 : i32
    %c0_i32_0 = arith.constant 0 : i32
    %c0_i32_1 = arith.constant 0 : i32
    return %c0_i32, %c0_i32_0 : i32, i32
  }
  func.func @transform_5(%arg0: i32) -> (i32, i32) {
    %c0_i32 = arith.constant 0 : i32
    %c0_i32_0 = arith.constant 0 : i32
    return %arg0, %c0_i32 : i32, i32
  }
}

module attributes {stable_mosaic.version = 11 : i64} {
  func.func @_proj2_kernel(%arg0: i32, %arg1: memref<32x128xbf16, #tpu.memory_space<vmem>>, %arg2: memref<32x128xbf16, #tpu.memory_space<vmem>>, %arg3: memref<128x384xbf16, #tpu.memory_space<vmem>>, %arg4: memref<128x384xbf16, #tpu.memory_space<vmem>>, %arg5: memref<1x384xf32, #tpu.memory_space<vmem>>, %arg6: memref<32x384xbf16, #tpu.memory_space<vmem>>) attributes {dimension_semantics = [#tpu.dimension_semantics<parallel>], iteration_bounds = array<i64: 1>, scalar_prefetch = 0 : i64, scratch_operands = 0 : i64, tpu.core_type = #tpu.core_type<tc>, window_params = [{transform_indices = @transform_0, window_bounds = array<i64: 32, 128>}, {transform_indices = @transform_1, window_bounds = array<i64: 32, 128>}, {pipeline_mode = #tpu.pipeline_mode<synchronous>, transform_indices = @transform_2, window_bounds = array<i64: 128, 384>}, {pipeline_mode = #tpu.pipeline_mode<synchronous>, transform_indices = @transform_3, window_bounds = array<i64: 128, 384>}, {pipeline_mode = #tpu.pipeline_mode<synchronous>, transform_indices = @transform_4, window_bounds = array<i64: 1, 384>}, {transform_indices = @transform_5, window_bounds = array<i64: 32, 384>}]} {
    %c0 = arith.constant 0 : index
    %c0_0 = arith.constant 0 : index
    %0 = vector.load %arg1[%c0, %c0_0] : memref<32x128xbf16, #tpu.memory_space<vmem>>, vector<32x128xbf16>
    %c0_1 = arith.constant 0 : index
    %c0_2 = arith.constant 0 : index
    %1 = vector.load %arg3[%c0_1, %c0_2] : memref<128x384xbf16, #tpu.memory_space<vmem>>, vector<128x384xbf16>
    %cst = arith.constant dense<0.000000e+00> : vector<32x384xf32>
    %2 = tpu.matmul %0, %1, %cst {dimension_numbers = #tpu.dot_dimension_numbers<[1], [0], [0], [1], [0, 0, 1, 1], [], []>} : vector<32x128xbf16>, vector<128x384xbf16>, vector<32x384xf32> -> vector<32x384xf32>
    %c0_3 = arith.constant 0 : index
    %c0_4 = arith.constant 0 : index
    %3 = vector.load %arg2[%c0_3, %c0_4] : memref<32x128xbf16, #tpu.memory_space<vmem>>, vector<32x128xbf16>
    %c0_5 = arith.constant 0 : index
    %c0_6 = arith.constant 0 : index
    %4 = vector.load %arg4[%c0_5, %c0_6] : memref<128x384xbf16, #tpu.memory_space<vmem>>, vector<128x384xbf16>
    %cst_7 = arith.constant dense<0.000000e+00> : vector<32x384xf32>
    %5 = tpu.matmul %3, %4, %cst_7 {dimension_numbers = #tpu.dot_dimension_numbers<[1], [0], [0], [1], [0, 0, 1, 1], [], []>} : vector<32x128xbf16>, vector<128x384xbf16>, vector<32x384xf32> -> vector<32x384xf32>
    %6 = arith.addf %2, %5 : vector<32x384xf32>
    %c0_8 = arith.constant 0 : index
    %c0_9 = arith.constant 0 : index
    %7 = vector.load %arg5[%c0_8, %c0_9] : memref<1x384xf32, #tpu.memory_space<vmem>>, vector<1x384xf32>
    %8 = vector.broadcast %7 : vector<1x384xf32> to vector<32x384xf32>
    %9 = arith.addf %6, %8 : vector<32x384xf32>
    %10 = arith.truncf %9 : vector<32x384xf32> to vector<32x384xbf16>
    %c0_10 = arith.constant 0 : index
    %c0_11 = arith.constant 0 : index
    %11 = vector.load %arg6[%c0_10, %c0_11] : memref<32x384xbf16, #tpu.memory_space<vmem>>, vector<32x384xbf16>
    tpu.vector_store %arg6[%c0_10, %c0_11], %10 {strides = array<i32>} : memref<32x384xbf16, #tpu.memory_space<vmem>>, vector<32x384xbf16>,
    return
  }
  func.func @transform_0(%arg0: i32) -> (i32, i32) {
    %c0_i32 = arith.constant 0 : i32
    %c0_i32_0 = arith.constant 0 : i32
    return %arg0, %c0_i32 : i32, i32
  }
  func.func @transform_1(%arg0: i32) -> (i32, i32) {
    %c0_i32 = arith.constant 0 : i32
    %c0_i32_0 = arith.constant 0 : i32
    return %arg0, %c0_i32 : i32, i32
  }
  func.func @transform_2(%arg0: i32) -> (i32, i32) {
    %c0_i32 = arith.constant 0 : i32
    %c0_i32_0 = arith.constant 0 : i32
    %c0_i32_1 = arith.constant 0 : i32
    return %c0_i32, %c0_i32_0 : i32, i32
  }
  func.func @transform_3(%arg0: i32) -> (i32, i32) {
    %c0_i32 = arith.constant 0 : i32
    %c0_i32_0 = arith.constant 0 : i32
    %c0_i32_1 = arith.constant 0 : i32
    return %c0_i32, %c0_i32_0 : i32, i32
  }
  func.func @transform_4(%arg0: i32) -> (i32, i32) {
    %c0_i32 = arith.constant 0 : i32
    %c0_i32_0 = arith.constant 0 : i32
    %c0_i32_1 = arith.constant 0 : i32
    return %c0_i32, %c0_i32_0 : i32, i32
  }
  func.func @transform_5(%arg0: i32) -> (i32, i32) {
    %c0_i32 = arith.constant 0 : i32
    %c0_i32_0 = arith.constant 0 : i32
    return %arg0, %c0_i32 : i32, i32
  }
}

module attributes {stable_mosaic.version = 11 : i64} {
  func.func @_sa_attn_kernel(%arg0: i32, %arg1: i32, %arg2: memref<1x8x128xbf16, #tpu.memory_space<vmem>>, %arg3: memref<1x8x128xbf16, #tpu.memory_space<vmem>>, %arg4: memref<1x8x128xbf16, #tpu.memory_space<vmem>>, %arg5: memref<1x8x128xbf16, #tpu.memory_space<vmem>>, %arg6: memref<128x128xbf16, #tpu.memory_space<vmem>>, %arg7: memref<1x128xf32, #tpu.memory_space<vmem>>, %arg8: memref<1x128xf32, #tpu.memory_space<vmem>>, %arg9: memref<1x128xf32, #tpu.memory_space<vmem>>, %arg10: memref<1x8x128xbf16, #tpu.memory_space<vmem>>) attributes {dimension_semantics = [#tpu.dimension_semantics<parallel>, #tpu.dimension_semantics<parallel>], iteration_bounds = array<i64: 2, 1>, scalar_prefetch = 0 : i64, scratch_operands = 0 : i64, tpu.core_type = #tpu.core_type<tc>, window_params = [{transform_indices = @transform_0, window_bounds = array<i64: 1, 8, 128>}, {transform_indices = @transform_1, window_bounds = array<i64: 1, 8, 128>}, {transform_indices = @transform_2, window_bounds = array<i64: 1, 8, 128>}, {transform_indices = @transform_3, window_bounds = array<i64: 1, 8, 128>}, {pipeline_mode = #tpu.pipeline_mode<synchronous>, transform_indices = @transform_4, window_bounds = array<i64: 128, 128>}, {pipeline_mode = #tpu.pipeline_mode<synchronous>, transform_indices = @transform_5, window_bounds = array<i64: 1, 128>}, {pipeline_mode = #tpu.pipeline_mode<synchronous>, transform_indices = @transform_6, window_bounds = array<i64: 1, 128>}, {pipeline_mode = #tpu.pipeline_mode<synchronous>, transform_indices = @transform_7, window_bounds = array<i64: 1, 128>}, {transform_indices = @transform_8, window_bounds = array<i64: 1, 8, 128>}]} {
    %c0 = arith.constant 0 : index
    %c0_0 = arith.constant 0 : index
    %c0_1 = arith.constant 0 : index
    %0 = vector.load %arg2[%c0, %c0_0, %c0_1] : memref<1x8x128xbf16, #tpu.memory_space<vmem>>, vector<1x8x128xbf16>
    %1 = vector.shape_cast %0 : vector<1x8x128xbf16> to vector<8x128xbf16>
    %c0_2 = arith.constant 0 : index
    %c0_3 = arith.constant 0 : index
    %c0_4 = arith.constant 0 : index
    %2 = vector.load %arg3[%c0_2, %c0_3, %c0_4] : memref<1x8x128xbf16, #tpu.memory_space<vmem>>, vector<1x8x128xbf16>
    %3 = vector.shape_cast %2 : vector<1x8x128xbf16> to vector<8x128xbf16>
    %4 = tpu.transpose %3, [1, 0] : vector<8x128xbf16> -> vector<128x8xbf16>
    %c0_5 = arith.constant 0 : index
    %c0_6 = arith.constant 0 : index
    %c0_7 = arith.constant 0 : index
    %5 = vector.load %arg4[%c0_5, %c0_6, %c0_7] : memref<1x8x128xbf16, #tpu.memory_space<vmem>>, vector<1x8x128xbf16>
    %6 = vector.shape_cast %5 : vector<1x8x128xbf16> to vector<8x128xbf16>
    %cst = arith.constant 0.000000e+00 : f32
    %7 = vector.broadcast %cst : f32 to vector<8x128xf32>
    %8 = vector.extract_strided_slice %1 {offsets = [0, 0], sizes = [8, 32], strides = [1, 1]} : vector<8x128xbf16> to vector<8x32xbf16>
    %9 = vector.extract_strided_slice %4 {offsets = [0, 0], sizes = [32, 8], strides = [1, 1]} : vector<128x8xbf16> to vector<32x8xbf16>
    %cst_8 = arith.constant dense<0.000000e+00> : vector<8x8xf32>
    %10 = tpu.matmul %8, %9, %cst_8 {dimension_numbers = #tpu.dot_dimension_numbers<[1], [0], [0], [1], [0, 0, 1, 1], [], []>} : vector<8x32xbf16>, vector<32x8xbf16>, vector<8x8xf32> -> vector<8x8xf32>
    %cst_9 = arith.constant dense<0xFF800000> : vector<8xf32>
    %11 = vector.multi_reduction <maximumf>, %10, %cst_9 [1] : vector<8x8xf32> to vector<8xf32>
    %12 = vector.shape_cast %11 : vector<8xf32> to vector<8x1xf32>
    %13 = vector.broadcast %12 : vector<8x1xf32> to vector<8x8xf32>
    %14 = arith.subf %10, %13 : vector<8x8xf32>
    %15 = math.exp %14 : vector<8x8xf32>
    %cst_10 = arith.constant dense<0.000000e+00> : vector<8xf32>
    %16 = vector.multi_reduction <add>, %15, %cst_10 [1] : vector<8x8xf32> to vector<8xf32>
    %17 = vector.shape_cast %16 : vector<8xf32> to vector<8x1xf32>
    %18 = tpu.reciprocal %17 {approx = true} : vector<8x1xf32> -> vector<8x1xf32>
    %19 = vector.broadcast %18 : vector<8x1xf32> to vector<8x8xf32>
    %20 = arith.mulf %15, %19 : vector<8x8xf32>
    %21 = arith.truncf %20 : vector<8x8xf32> to vector<8x8xbf16>
    %22 = vector.extract_strided_slice %6 {offsets = [0, 0], sizes = [8, 32], strides = [1, 1]} : vector<8x128xbf16> to vector<8x32xbf16>
    %cst_11 = arith.constant dense<0.000000e+00> : vector<8x32xf32>
    %23 = tpu.matmul %21, %22, %cst_11 {dimension_numbers = #tpu.dot_dimension_numbers<[1], [0], [0], [1], [0, 0, 1, 1], [], []>} : vector<8x8xbf16>, vector<8x32xbf16>, vector<8x32xf32> -> vector<8x32xf32>
    %24 = arith.truncf %23 : vector<8x32xf32> to vector<8x32xbf16>
    %c0_12 = arith.constant 0 : index
    %c0_13 = arith.constant 0 : index
    %25 = vector.load %arg6[%c0_12, %c0_13] : memref<128x128xbf16, #tpu.memory_space<vmem>>, vector<32x128xbf16>
    %cst_14 = arith.constant dense<0.000000e+00> : vector<8x128xf32>
    %26 = tpu.matmul %24, %25, %cst_14 {dimension_numbers = #tpu.dot_dimension_numbers<[1], [0], [0], [1], [0, 0, 1, 1], [], []>} : vector<8x32xbf16>, vector<32x128xbf16>, vector<8x128xf32> -> vector<8x128xf32>
    %27 = arith.addf %7, %26 : vector<8x128xf32>
    %28 = vector.extract_strided_slice %1 {offsets = [0, 32], sizes = [8, 32], strides = [1, 1]} : vector<8x128xbf16> to vector<8x32xbf16>
    %29 = vector.extract_strided_slice %4 {offsets = [32, 0], sizes = [32, 8], strides = [1, 1]} : vector<128x8xbf16> to vector<32x8xbf16>
    %cst_15 = arith.constant dense<0.000000e+00> : vector<8x8xf32>
    %30 = tpu.matmul %28, %29, %cst_15 {dimension_numbers = #tpu.dot_dimension_numbers<[1], [0], [0], [1], [0, 0, 1, 1], [], []>} : vector<8x32xbf16>, vector<32x8xbf16>, vector<8x8xf32> -> vector<8x8xf32>
    %cst_16 = arith.constant dense<0xFF800000> : vector<8xf32>
    %31 = vector.multi_reduction <maximumf>, %30, %cst_16 [1] : vector<8x8xf32> to vector<8xf32>
    %32 = vector.shape_cast %31 : vector<8xf32> to vector<8x1xf32>
    %33 = vector.broadcast %32 : vector<8x1xf32> to vector<8x8xf32>
    %34 = arith.subf %30, %33 : vector<8x8xf32>
    %35 = math.exp %34 : vector<8x8xf32>
    %cst_17 = arith.constant dense<0.000000e+00> : vector<8xf32>
    %36 = vector.multi_reduction <add>, %35, %cst_17 [1] : vector<8x8xf32> to vector<8xf32>
    %37 = vector.shape_cast %36 : vector<8xf32> to vector<8x1xf32>
    %38 = tpu.reciprocal %37 {approx = true} : vector<8x1xf32> -> vector<8x1xf32>
    %39 = vector.broadcast %38 : vector<8x1xf32> to vector<8x8xf32>
    %40 = arith.mulf %35, %39 : vector<8x8xf32>
    %41 = arith.truncf %40 : vector<8x8xf32> to vector<8x8xbf16>
    %42 = vector.extract_strided_slice %6 {offsets = [0, 32], sizes = [8, 32], strides = [1, 1]} : vector<8x128xbf16> to vector<8x32xbf16>
    %cst_18 = arith.constant dense<0.000000e+00> : vector<8x32xf32>
    %43 = tpu.matmul %41, %42, %cst_18 {dimension_numbers = #tpu.dot_dimension_numbers<[1], [0], [0], [1], [0, 0, 1, 1], [], []>} : vector<8x8xbf16>, vector<8x32xbf16>, vector<8x32xf32> -> vector<8x32xf32>
    %44 = arith.truncf %43 : vector<8x32xf32> to vector<8x32xbf16>
    %c32 = arith.constant 32 : index
    %c0_19 = arith.constant 0 : index
    %45 = vector.load %arg6[%c32, %c0_19] : memref<128x128xbf16, #tpu.memory_space<vmem>>, vector<32x128xbf16>
    %cst_20 = arith.constant dense<0.000000e+00> : vector<8x128xf32>
    %46 = tpu.matmul %44, %45, %cst_20 {dimension_numbers = #tpu.dot_dimension_numbers<[1], [0], [0], [1], [0, 0, 1, 1], [], []>} : vector<8x32xbf16>, vector<32x128xbf16>, vector<8x128xf32> -> vector<8x128xf32>
    %47 = arith.addf %27, %46 : vector<8x128xf32>
    %48 = vector.extract_strided_slice %1 {offsets = [0, 64], sizes = [8, 32], strides = [1, 1]} : vector<8x128xbf16> to vector<8x32xbf16>
    %49 = vector.extract_strided_slice %4 {offsets = [64, 0], sizes = [32, 8], strides = [1, 1]} : vector<128x8xbf16> to vector<32x8xbf16>
    %cst_21 = arith.constant dense<0.000000e+00> : vector<8x8xf32>
    %50 = tpu.matmul %48, %49, %cst_21 {dimension_numbers = #tpu.dot_dimension_numbers<[1], [0], [0], [1], [0, 0, 1, 1], [], []>} : vector<8x32xbf16>, vector<32x8xbf16>, vector<8x8xf32> -> vector<8x8xf32>
    %cst_22 = arith.constant dense<0xFF800000> : vector<8xf32>
    %51 = vector.multi_reduction <maximumf>, %50, %cst_22 [1] : vector<8x8xf32> to vector<8xf32>
    %52 = vector.shape_cast %51 : vector<8xf32> to vector<8x1xf32>
    %53 = vector.broadcast %52 : vector<8x1xf32> to vector<8x8xf32>
    %54 = arith.subf %50, %53 : vector<8x8xf32>
    %55 = math.exp %54 : vector<8x8xf32>
    %cst_23 = arith.constant dense<0.000000e+00> : vector<8xf32>
    %56 = vector.multi_reduction <add>, %55, %cst_23 [1] : vector<8x8xf32> to vector<8xf32>
    %57 = vector.shape_cast %56 : vector<8xf32> to vector<8x1xf32>
    %58 = tpu.reciprocal %57 {approx = true} : vector<8x1xf32> -> vector<8x1xf32>
    %59 = vector.broadcast %58 : vector<8x1xf32> to vector<8x8xf32>
    %60 = arith.mulf %55, %59 : vector<8x8xf32>
    %61 = arith.truncf %60 : vector<8x8xf32> to vector<8x8xbf16>
    %62 = vector.extract_strided_slice %6 {offsets = [0, 64], sizes = [8, 32], strides = [1, 1]} : vector<8x128xbf16> to vector<8x32xbf16>
    %cst_24 = arith.constant dense<0.000000e+00> : vector<8x32xf32>
    %63 = tpu.matmul %61, %62, %cst_24 {dimension_numbers = #tpu.dot_dimension_numbers<[1], [0], [0], [1], [0, 0, 1, 1], [], []>} : vector<8x8xbf16>, vector<8x32xbf16>, vector<8x32xf32> -> vector<8x32xf32>
    %64 = arith.truncf %63 : vector<8x32xf32> to vector<8x32xbf16>
    %c64 = arith.constant 64 : index
    %c0_25 = arith.constant 0 : index
    %65 = vector.load %arg6[%c64, %c0_25] : memref<128x128xbf16, #tpu.memory_space<vmem>>, vector<32x128xbf16>
    %cst_26 = arith.constant dense<0.000000e+00> : vector<8x128xf32>
    %66 = tpu.matmul %64, %65, %cst_26 {dimension_numbers = #tpu.dot_dimension_numbers<[1], [0], [0], [1], [0, 0, 1, 1], [], []>} : vector<8x32xbf16>, vector<32x128xbf16>, vector<8x128xf32> -> vector<8x128xf32>
    %67 = arith.addf %47, %66 : vector<8x128xf32>
    %68 = vector.extract_strided_slice %1 {offsets = [0, 96], sizes = [8, 32], strides = [1, 1]} : vector<8x128xbf16> to vector<8x32xbf16>
    %69 = vector.extract_strided_slice %4 {offsets = [96, 0], sizes = [32, 8], strides = [1, 1]} : vector<128x8xbf16> to vector<32x8xbf16>
    %cst_27 = arith.constant dense<0.000000e+00> : vector<8x8xf32>
    %70 = tpu.matmul %68, %69, %cst_27 {dimension_numbers = #tpu.dot_dimension_numbers<[1], [0], [0], [1], [0, 0, 1, 1], [], []>} : vector<8x32xbf16>, vector<32x8xbf16>, vector<8x8xf32> -> vector<8x8xf32>
    %cst_28 = arith.constant dense<0xFF800000> : vector<8xf32>
    %71 = vector.multi_reduction <maximumf>, %70, %cst_28 [1] : vector<8x8xf32> to vector<8xf32>
    %72 = vector.shape_cast %71 : vector<8xf32> to vector<8x1xf32>
    %73 = vector.broadcast %72 : vector<8x1xf32> to vector<8x8xf32>
    %74 = arith.subf %70, %73 : vector<8x8xf32>
    %75 = math.exp %74 : vector<8x8xf32>
    %cst_29 = arith.constant dense<0.000000e+00> : vector<8xf32>
    %76 = vector.multi_reduction <add>, %75, %cst_29 [1] : vector<8x8xf32> to vector<8xf32>
    %77 = vector.shape_cast %76 : vector<8xf32> to vector<8x1xf32>
    %78 = tpu.reciprocal %77 {approx = true} : vector<8x1xf32> -> vector<8x1xf32>
    %79 = vector.broadcast %78 : vector<8x1xf32> to vector<8x8xf32>
    %80 = arith.mulf %75, %79 : vector<8x8xf32>
    %81 = arith.truncf %80 : vector<8x8xf32> to vector<8x8xbf16>
    %82 = vector.extract_strided_slice %6 {offsets = [0, 96], sizes = [8, 32], strides = [1, 1]} : vector<8x128xbf16> to vector<8x32xbf16>
    %cst_30 = arith.constant dense<0.000000e+00> : vector<8x32xf32>
    %83 = tpu.matmul %81, %82, %cst_30 {dimension_numbers = #tpu.dot_dimension_numbers<[1], [0], [0], [1], [0, 0, 1, 1], [], []>} : vector<8x8xbf16>, vector<8x32xbf16>, vector<8x32xf32> -> vector<8x32xf32>
    %84 = arith.truncf %83 : vector<8x32xf32> to vector<8x32xbf16>
    %c96 = arith.constant 96 : index
    %c0_31 = arith.constant 0 : index
    %85 = vector.load %arg6[%c96, %c0_31] : memref<128x128xbf16, #tpu.memory_space<vmem>>, vector<32x128xbf16>
    %cst_32 = arith.constant dense<0.000000e+00> : vector<8x128xf32>
    %86 = tpu.matmul %84, %85, %cst_32 {dimension_numbers = #tpu.dot_dimension_numbers<[1], [0], [0], [1], [0, 0, 1, 1], [], []>} : vector<8x32xbf16>, vector<32x128xbf16>, vector<8x128xf32> -> vector<8x128xf32>
    %87 = arith.addf %67, %86 : vector<8x128xf32>
    %c0_33 = arith.constant 0 : index
    %c0_34 = arith.constant 0 : index
    %88 = vector.load %arg7[%c0_33, %c0_34] : memref<1x128xf32, #tpu.memory_space<vmem>>, vector<1x128xf32>
    %89 = vector.broadcast %88 : vector<1x128xf32> to vector<8x128xf32>
    %90 = arith.addf %87, %89 : vector<8x128xf32>
    %c0_35 = arith.constant 0 : index
    %c0_36 = arith.constant 0 : index
    %c0_37 = arith.constant 0 : index
    %91 = vector.load %arg5[%c0_35, %c0_36, %c0_37] : memref<1x8x128xbf16, #tpu.memory_space<vmem>>, vector<1x8x128xbf16>
    %92 = vector.shape_cast %91 : vector<1x8x128xbf16> to vector<8x128xbf16>
    %93 = arith.extf %92 : vector<8x128xbf16> to vector<8x128xf32>
    %94 = arith.addf %90, %93 : vector<8x128xf32>
    %cst_38 = arith.constant dense<0.000000e+00> : vector<8xf32>
    %95 = vector.multi_reduction <add>, %94, %cst_38 [1] : vector<8x128xf32> to vector<8xf32>
    %96 = vector.shape_cast %95 : vector<8xf32> to vector<8x1xf32>
    %cst_39 = arith.constant 1.280000e+02 : f32
    %97 = vector.broadcast %cst_39 : f32 to vector<8x1xf32>
    %98 = arith.divf %96, %97 : vector<8x1xf32>
    %99 = vector.broadcast %98 : vector<8x1xf32> to vector<8x128xf32>
    %100 = arith.subf %94, %99 : vector<8x128xf32>
    %101 = arith.mulf %100, %100 : vector<8x128xf32>
    %cst_40 = arith.constant dense<0.000000e+00> : vector<8xf32>
    %102 = vector.multi_reduction <add>, %101, %cst_40 [1] : vector<8x128xf32> to vector<8xf32>
    %103 = vector.shape_cast %102 : vector<8xf32> to vector<8x1xf32>
    %cst_41 = arith.constant 1.280000e+02 : f32
    %104 = vector.broadcast %cst_41 : f32 to vector<8x1xf32>
    %105 = arith.divf %103, %104 : vector<8x1xf32>
    %106 = vector.broadcast %98 : vector<8x1xf32> to vector<8x128xf32>
    %107 = arith.subf %94, %106 : vector<8x128xf32>
    %cst_42 = arith.constant 9.99999974E-6 : f32
    %108 = vector.broadcast %cst_42 : f32 to vector<8x1xf32>
    %109 = arith.addf %105, %108 : vector<8x1xf32>
    %110 = math.rsqrt %109 : vector<8x1xf32>
    %111 = vector.broadcast %110 : vector<8x1xf32> to vector<8x128xf32>
    %112 = arith.mulf %107, %111 : vector<8x128xf32>
    %c0_43 = arith.constant 0 : index
    %c0_44 = arith.constant 0 : index
    %113 = vector.load %arg8[%c0_43, %c0_44] : memref<1x128xf32, #tpu.memory_space<vmem>>, vector<1x128xf32>
    %114 = vector.broadcast %113 : vector<1x128xf32> to vector<8x128xf32>
    %115 = arith.mulf %112, %114 : vector<8x128xf32>
    %c0_45 = arith.constant 0 : index
    %c0_46 = arith.constant 0 : index
    %116 = vector.load %arg9[%c0_45, %c0_46] : memref<1x128xf32, #tpu.memory_space<vmem>>, vector<1x128xf32>
    %117 = vector.broadcast %116 : vector<1x128xf32> to vector<8x128xf32>
    %118 = arith.addf %115, %117 : vector<8x128xf32>
    %119 = arith.truncf %118 : vector<8x128xf32> to vector<8x128xbf16>
    %c0_47 = arith.constant 0 : index
    %c0_48 = arith.constant 0 : index
    %c0_49 = arith.constant 0 : index
    %120 = vector.load %arg10[%c0_47, %c0_48, %c0_49] : memref<1x8x128xbf16, #tpu.memory_space<vmem>>, vector<1x8x128xbf16>
    %121 = vector.shape_cast %120 : vector<1x8x128xbf16> to vector<8x128xbf16>
    %122 = vector.shape_cast %119 : vector<8x128xbf16> to vector<1x8x128xbf16>
    tpu.vector_store %arg10[%c0_47, %c0_48, %c0_49], %122 {strides = array<i32>} : memref<1x8x128xbf16, #tpu.memory_space<vmem>>, vector<1x8x128xbf16>,
    return
  }
  func.func @transform_0(%arg0: i32, %arg1: i32) -> (i32, i32, i32) {
    %c0_i32 = arith.constant 0 : i32
    %c0_i32_0 = arith.constant 0 : i32
    return %arg0, %arg1, %c0_i32 : i32, i32, i32
  }
  func.func @transform_1(%arg0: i32, %arg1: i32) -> (i32, i32, i32) {
    %c0_i32 = arith.constant 0 : i32
    %c1_i32 = arith.constant 1 : i32
    %c0_i32_0 = arith.constant 0 : i32
    return %arg0, %c0_i32, %c1_i32 : i32, i32, i32
  }
  func.func @transform_2(%arg0: i32, %arg1: i32) -> (i32, i32, i32) {
    %c0_i32 = arith.constant 0 : i32
    %c2_i32 = arith.constant 2 : i32
    %c0_i32_0 = arith.constant 0 : i32
    return %arg0, %c0_i32, %c2_i32 : i32, i32, i32
  }
  func.func @transform_3(%arg0: i32, %arg1: i32) -> (i32, i32, i32) {
    %c0_i32 = arith.constant 0 : i32
    %c0_i32_0 = arith.constant 0 : i32
    return %arg0, %arg1, %c0_i32 : i32, i32, i32
  }
  func.func @transform_4(%arg0: i32, %arg1: i32) -> (i32, i32) {
    %c0_i32 = arith.constant 0 : i32
    %c0_i32_0 = arith.constant 0 : i32
    %c0_i32_1 = arith.constant 0 : i32
    return %c0_i32, %c0_i32_0 : i32, i32
  }
  func.func @transform_5(%arg0: i32, %arg1: i32) -> (i32, i32) {
    %c0_i32 = arith.constant 0 : i32
    %c0_i32_0 = arith.constant 0 : i32
    %c0_i32_1 = arith.constant 0 : i32
    return %c0_i32, %c0_i32_0 : i32, i32
  }
  func.func @transform_6(%arg0: i32, %arg1: i32) -> (i32, i32) {
    %c0_i32 = arith.constant 0 : i32
    %c0_i32_0 = arith.constant 0 : i32
    %c0_i32_1 = arith.constant 0 : i32
    return %c0_i32, %c0_i32_0 : i32, i32
  }
  func.func @transform_7(%arg0: i32, %arg1: i32) -> (i32, i32) {
    %c0_i32 = arith.constant 0 : i32
    %c0_i32_0 = arith.constant 0 : i32
    %c0_i32_1 = arith.constant 0 : i32
    return %c0_i32, %c0_i32_0 : i32, i32
  }
  func.func @transform_8(%arg0: i32, %arg1: i32) -> (i32, i32, i32) {
    %c0_i32 = arith.constant 0 : i32
    %c0_i32_0 = arith.constant 0 : i32
    return %arg0, %arg1, %c0_i32 : i32, i32, i32
  }
}

module attributes {stable_mosaic.version = 11 : i64} {
  func.func @_ca_attn_kernel(%arg0: i32, %arg1: i32, %arg2: memref<1x8x128xbf16, #tpu.memory_space<vmem>>, %arg3: memref<1x8x128xbf16, #tpu.memory_space<vmem>>, %arg4: memref<1x16x128xbf16, #tpu.memory_space<vmem>>, %arg5: memref<1x16x128xbf16, #tpu.memory_space<vmem>>, %arg6: memref<1x16x128xbf16, #tpu.memory_space<vmem>>, %arg7: memref<1x8x128xbf16, #tpu.memory_space<vmem>>, %arg8: memref<128x128xbf16, #tpu.memory_space<vmem>>, %arg9: memref<1x128xf32, #tpu.memory_space<vmem>>, %arg10: memref<1x128xf32, #tpu.memory_space<vmem>>, %arg11: memref<1x128xf32, #tpu.memory_space<vmem>>, %arg12: memref<1x8x128xbf16, #tpu.memory_space<vmem>>) attributes {dimension_semantics = [#tpu.dimension_semantics<parallel>, #tpu.dimension_semantics<parallel>], iteration_bounds = array<i64: 2, 1>, scalar_prefetch = 0 : i64, scratch_operands = 0 : i64, tpu.core_type = #tpu.core_type<tc>, window_params = [{transform_indices = @transform_0, window_bounds = array<i64: 1, 8, 128>}, {transform_indices = @transform_1, window_bounds = array<i64: 1, 8, 128>}, {transform_indices = @transform_2, window_bounds = array<i64: 1, 16, 128>}, {transform_indices = @transform_3, window_bounds = array<i64: 1, 16, 128>}, {transform_indices = @transform_4, window_bounds = array<i64: 1, 16, 128>}, {transform_indices = @transform_5, window_bounds = array<i64: 1, 8, 128>}, {pipeline_mode = #tpu.pipeline_mode<synchronous>, transform_indices = @transform_6, window_bounds = array<i64: 128, 128>}, {pipeline_mode = #tpu.pipeline_mode<synchronous>, transform_indices = @transform_7, window_bounds = array<i64: 1, 128>}, {pipeline_mode = #tpu.pipeline_mode<synchronous>, transform_indices = @transform_8, window_bounds = array<i64: 1, 128>}, {pipeline_mode = #tpu.pipeline_mode<synchronous>, transform_indices = @transform_9, window_bounds = array<i64: 1, 128>}, {transform_indices = @transform_10, window_bounds = array<i64: 1, 8, 128>}]} {
    %c0 = arith.constant 0 : index
    %c0_0 = arith.constant 0 : index
    %c0_1 = arith.constant 0 : index
    %0 = vector.load %arg2[%c0, %c0_0, %c0_1] : memref<1x8x128xbf16, #tpu.memory_space<vmem>>, vector<1x8x128xbf16>
    %1 = vector.shape_cast %0 : vector<1x8x128xbf16> to vector<8x128xbf16>
    %c0_2 = arith.constant 0 : index
    %c0_3 = arith.constant 0 : index
    %c0_4 = arith.constant 0 : index
    %2 = vector.load %arg3[%c0_2, %c0_3, %c0_4] : memref<1x8x128xbf16, #tpu.memory_space<vmem>>, vector<1x8x128xbf16>
    %3 = vector.shape_cast %2 : vector<1x8x128xbf16> to vector<8x128xbf16>
    %c0_5 = arith.constant 0 : index
    %c0_6 = arith.constant 0 : index
    %c0_7 = arith.constant 0 : index
    %4 = vector.load %arg4[%c0_5, %c0_6, %c0_7] : memref<1x16x128xbf16, #tpu.memory_space<vmem>>, vector<1x16x128xbf16>
    %5 = vector.shape_cast %4 : vector<1x16x128xbf16> to vector<16x128xbf16>
    %6 = tpu.transpose %5, [1, 0] : vector<16x128xbf16> -> vector<128x16xbf16>
    %c0_8 = arith.constant 0 : index
    %c0_9 = arith.constant 0 : index
    %c0_10 = arith.constant 0 : index
    %7 = vector.load %arg5[%c0_8, %c0_9, %c0_10] : memref<1x16x128xbf16, #tpu.memory_space<vmem>>, vector<1x16x128xbf16>
    %8 = vector.shape_cast %7 : vector<1x16x128xbf16> to vector<16x128xbf16>
    %9 = tpu.transpose %8, [1, 0] : vector<16x128xbf16> -> vector<128x16xbf16>
    %c0_11 = arith.constant 0 : index
    %c0_12 = arith.constant 0 : index
    %c0_13 = arith.constant 0 : index
    %10 = vector.load %arg6[%c0_11, %c0_12, %c0_13] : memref<1x16x128xbf16, #tpu.memory_space<vmem>>, vector<1x16x128xbf16>
    %11 = vector.shape_cast %10 : vector<1x16x128xbf16> to vector<16x128xbf16>
    %cst = arith.constant 0.000000e+00 : f32
    %12 = vector.broadcast %cst : f32 to vector<8x128xf32>
    %13 = vector.extract_strided_slice %1 {offsets = [0, 0], sizes = [8, 32], strides = [1, 1]} : vector<8x128xbf16> to vector<8x32xbf16>
    %14 = vector.extract_strided_slice %6 {offsets = [0, 0], sizes = [32, 16], strides = [1, 1]} : vector<128x16xbf16> to vector<32x16xbf16>
    %cst_14 = arith.constant dense<0.000000e+00> : vector<8x16xf32>
    %15 = tpu.matmul %13, %14, %cst_14 {dimension_numbers = #tpu.dot_dimension_numbers<[1], [0], [0], [1], [0, 0, 1, 1], [], []>} : vector<8x32xbf16>, vector<32x16xbf16>, vector<8x16xf32> -> vector<8x16xf32>
    %16 = vector.extract_strided_slice %3 {offsets = [0, 0], sizes = [8, 32], strides = [1, 1]} : vector<8x128xbf16> to vector<8x32xbf16>
    %17 = vector.extract_strided_slice %9 {offsets = [0, 0], sizes = [32, 16], strides = [1, 1]} : vector<128x16xbf16> to vector<32x16xbf16>
    %cst_15 = arith.constant dense<0.000000e+00> : vector<8x16xf32>
    %18 = tpu.matmul %16, %17, %cst_15 {dimension_numbers = #tpu.dot_dimension_numbers<[1], [0], [0], [1], [0, 0, 1, 1], [], []>} : vector<8x32xbf16>, vector<32x16xbf16>, vector<8x16xf32> -> vector<8x16xf32>
    %19 = arith.addf %15, %18 : vector<8x16xf32>
    %cst_16 = arith.constant dense<0xFF800000> : vector<8xf32>
    %20 = vector.multi_reduction <maximumf>, %19, %cst_16 [1] : vector<8x16xf32> to vector<8xf32>
    %21 = vector.shape_cast %20 : vector<8xf32> to vector<8x1xf32>
    %22 = vector.broadcast %21 : vector<8x1xf32> to vector<8x16xf32>
    %23 = arith.subf %19, %22 : vector<8x16xf32>
    %24 = math.exp %23 : vector<8x16xf32>
    %cst_17 = arith.constant dense<0.000000e+00> : vector<8xf32>
    %25 = vector.multi_reduction <add>, %24, %cst_17 [1] : vector<8x16xf32> to vector<8xf32>
    %26 = vector.shape_cast %25 : vector<8xf32> to vector<8x1xf32>
    %27 = tpu.reciprocal %26 {approx = true} : vector<8x1xf32> -> vector<8x1xf32>
    %28 = vector.broadcast %27 : vector<8x1xf32> to vector<8x16xf32>
    %29 = arith.mulf %24, %28 : vector<8x16xf32>
    %30 = arith.truncf %29 : vector<8x16xf32> to vector<8x16xbf16>
    %31 = vector.extract_strided_slice %11 {offsets = [0, 0], sizes = [16, 32], strides = [1, 1]} : vector<16x128xbf16> to vector<16x32xbf16>
    %cst_18 = arith.constant dense<0.000000e+00> : vector<8x32xf32>
    %32 = tpu.matmul %30, %31, %cst_18 {dimension_numbers = #tpu.dot_dimension_numbers<[1], [0], [0], [1], [0, 0, 1, 1], [], []>} : vector<8x16xbf16>, vector<16x32xbf16>, vector<8x32xf32> -> vector<8x32xf32>
    %33 = arith.truncf %32 : vector<8x32xf32> to vector<8x32xbf16>
    %c0_19 = arith.constant 0 : index
    %c0_20 = arith.constant 0 : index
    %34 = vector.load %arg8[%c0_19, %c0_20] : memref<128x128xbf16, #tpu.memory_space<vmem>>, vector<32x128xbf16>
    %cst_21 = arith.constant dense<0.000000e+00> : vector<8x128xf32>
    %35 = tpu.matmul %33, %34, %cst_21 {dimension_numbers = #tpu.dot_dimension_numbers<[1], [0], [0], [1], [0, 0, 1, 1], [], []>} : vector<8x32xbf16>, vector<32x128xbf16>, vector<8x128xf32> -> vector<8x128xf32>
    %36 = arith.addf %12, %35 : vector<8x128xf32>
    %37 = vector.extract_strided_slice %1 {offsets = [0, 32], sizes = [8, 32], strides = [1, 1]} : vector<8x128xbf16> to vector<8x32xbf16>
    %38 = vector.extract_strided_slice %6 {offsets = [32, 0], sizes = [32, 16], strides = [1, 1]} : vector<128x16xbf16> to vector<32x16xbf16>
    %cst_22 = arith.constant dense<0.000000e+00> : vector<8x16xf32>
    %39 = tpu.matmul %37, %38, %cst_22 {dimension_numbers = #tpu.dot_dimension_numbers<[1], [0], [0], [1], [0, 0, 1, 1], [], []>} : vector<8x32xbf16>, vector<32x16xbf16>, vector<8x16xf32> -> vector<8x16xf32>
    %40 = vector.extract_strided_slice %3 {offsets = [0, 32], sizes = [8, 32], strides = [1, 1]} : vector<8x128xbf16> to vector<8x32xbf16>
    %41 = vector.extract_strided_slice %9 {offsets = [32, 0], sizes = [32, 16], strides = [1, 1]} : vector<128x16xbf16> to vector<32x16xbf16>
    %cst_23 = arith.constant dense<0.000000e+00> : vector<8x16xf32>
    %42 = tpu.matmul %40, %41, %cst_23 {dimension_numbers = #tpu.dot_dimension_numbers<[1], [0], [0], [1], [0, 0, 1, 1], [], []>} : vector<8x32xbf16>, vector<32x16xbf16>, vector<8x16xf32> -> vector<8x16xf32>
    %43 = arith.addf %39, %42 : vector<8x16xf32>
    %cst_24 = arith.constant dense<0xFF800000> : vector<8xf32>
    %44 = vector.multi_reduction <maximumf>, %43, %cst_24 [1] : vector<8x16xf32> to vector<8xf32>
    %45 = vector.shape_cast %44 : vector<8xf32> to vector<8x1xf32>
    %46 = vector.broadcast %45 : vector<8x1xf32> to vector<8x16xf32>
    %47 = arith.subf %43, %46 : vector<8x16xf32>
    %48 = math.exp %47 : vector<8x16xf32>
    %cst_25 = arith.constant dense<0.000000e+00> : vector<8xf32>
    %49 = vector.multi_reduction <add>, %48, %cst_25 [1] : vector<8x16xf32> to vector<8xf32>
    %50 = vector.shape_cast %49 : vector<8xf32> to vector<8x1xf32>
    %51 = tpu.reciprocal %50 {approx = true} : vector<8x1xf32> -> vector<8x1xf32>
    %52 = vector.broadcast %51 : vector<8x1xf32> to vector<8x16xf32>
    %53 = arith.mulf %48, %52 : vector<8x16xf32>
    %54 = arith.truncf %53 : vector<8x16xf32> to vector<8x16xbf16>
    %55 = vector.extract_strided_slice %11 {offsets = [0, 32], sizes = [16, 32], strides = [1, 1]} : vector<16x128xbf16> to vector<16x32xbf16>
    %cst_26 = arith.constant dense<0.000000e+00> : vector<8x32xf32>
    %56 = tpu.matmul %54, %55, %cst_26 {dimension_numbers = #tpu.dot_dimension_numbers<[1], [0], [0], [1], [0, 0, 1, 1], [], []>} : vector<8x16xbf16>, vector<16x32xbf16>, vector<8x32xf32> -> vector<8x32xf32>
    %57 = arith.truncf %56 : vector<8x32xf32> to vector<8x32xbf16>
    %c32 = arith.constant 32 : index
    %c0_27 = arith.constant 0 : index
    %58 = vector.load %arg8[%c32, %c0_27] : memref<128x128xbf16, #tpu.memory_space<vmem>>, vector<32x128xbf16>
    %cst_28 = arith.constant dense<0.000000e+00> : vector<8x128xf32>
    %59 = tpu.matmul %57, %58, %cst_28 {dimension_numbers = #tpu.dot_dimension_numbers<[1], [0], [0], [1], [0, 0, 1, 1], [], []>} : vector<8x32xbf16>, vector<32x128xbf16>, vector<8x128xf32> -> vector<8x128xf32>
    %60 = arith.addf %36, %59 : vector<8x128xf32>
    %61 = vector.extract_strided_slice %1 {offsets = [0, 64], sizes = [8, 32], strides = [1, 1]} : vector<8x128xbf16> to vector<8x32xbf16>
    %62 = vector.extract_strided_slice %6 {offsets = [64, 0], sizes = [32, 16], strides = [1, 1]} : vector<128x16xbf16> to vector<32x16xbf16>
    %cst_29 = arith.constant dense<0.000000e+00> : vector<8x16xf32>
    %63 = tpu.matmul %61, %62, %cst_29 {dimension_numbers = #tpu.dot_dimension_numbers<[1], [0], [0], [1], [0, 0, 1, 1], [], []>} : vector<8x32xbf16>, vector<32x16xbf16>, vector<8x16xf32> -> vector<8x16xf32>
    %64 = vector.extract_strided_slice %3 {offsets = [0, 64], sizes = [8, 32], strides = [1, 1]} : vector<8x128xbf16> to vector<8x32xbf16>
    %65 = vector.extract_strided_slice %9 {offsets = [64, 0], sizes = [32, 16], strides = [1, 1]} : vector<128x16xbf16> to vector<32x16xbf16>
    %cst_30 = arith.constant dense<0.000000e+00> : vector<8x16xf32>
    %66 = tpu.matmul %64, %65, %cst_30 {dimension_numbers = #tpu.dot_dimension_numbers<[1], [0], [0], [1], [0, 0, 1, 1], [], []>} : vector<8x32xbf16>, vector<32x16xbf16>, vector<8x16xf32> -> vector<8x16xf32>
    %67 = arith.addf %63, %66 : vector<8x16xf32>
    %cst_31 = arith.constant dense<0xFF800000> : vector<8xf32>
    %68 = vector.multi_reduction <maximumf>, %67, %cst_31 [1] : vector<8x16xf32> to vector<8xf32>
    %69 = vector.shape_cast %68 : vector<8xf32> to vector<8x1xf32>
    %70 = vector.broadcast %69 : vector<8x1xf32> to vector<8x16xf32>
    %71 = arith.subf %67, %70 : vector<8x16xf32>
    %72 = math.exp %71 : vector<8x16xf32>
    %cst_32 = arith.constant dense<0.000000e+00> : vector<8xf32>
    %73 = vector.multi_reduction <add>, %72, %cst_32 [1] : vector<8x16xf32> to vector<8xf32>
    %74 = vector.shape_cast %73 : vector<8xf32> to vector<8x1xf32>
    %75 = tpu.reciprocal %74 {approx = true} : vector<8x1xf32> -> vector<8x1xf32>
    %76 = vector.broadcast %75 : vector<8x1xf32> to vector<8x16xf32>
    %77 = arith.mulf %72, %76 : vector<8x16xf32>
    %78 = arith.truncf %77 : vector<8x16xf32> to vector<8x16xbf16>
    %79 = vector.extract_strided_slice %11 {offsets = [0, 64], sizes = [16, 32], strides = [1, 1]} : vector<16x128xbf16> to vector<16x32xbf16>
    %cst_33 = arith.constant dense<0.000000e+00> : vector<8x32xf32>
    %80 = tpu.matmul %78, %79, %cst_33 {dimension_numbers = #tpu.dot_dimension_numbers<[1], [0], [0], [1], [0, 0, 1, 1], [], []>} : vector<8x16xbf16>, vector<16x32xbf16>, vector<8x32xf32> -> vector<8x32xf32>
    %81 = arith.truncf %80 : vector<8x32xf32> to vector<8x32xbf16>
    %c64 = arith.constant 64 : index
    %c0_34 = arith.constant 0 : index
    %82 = vector.load %arg8[%c64, %c0_34] : memref<128x128xbf16, #tpu.memory_space<vmem>>, vector<32x128xbf16>
    %cst_35 = arith.constant dense<0.000000e+00> : vector<8x128xf32>
    %83 = tpu.matmul %81, %82, %cst_35 {dimension_numbers = #tpu.dot_dimension_numbers<[1], [0], [0], [1], [0, 0, 1, 1], [], []>} : vector<8x32xbf16>, vector<32x128xbf16>, vector<8x128xf32> -> vector<8x128xf32>
    %84 = arith.addf %60, %83 : vector<8x128xf32>
    %85 = vector.extract_strided_slice %1 {offsets = [0, 96], sizes = [8, 32], strides = [1, 1]} : vector<8x128xbf16> to vector<8x32xbf16>
    %86 = vector.extract_strided_slice %6 {offsets = [96, 0], sizes = [32, 16], strides = [1, 1]} : vector<128x16xbf16> to vector<32x16xbf16>
    %cst_36 = arith.constant dense<0.000000e+00> : vector<8x16xf32>
    %87 = tpu.matmul %85, %86, %cst_36 {dimension_numbers = #tpu.dot_dimension_numbers<[1], [0], [0], [1], [0, 0, 1, 1], [], []>} : vector<8x32xbf16>, vector<32x16xbf16>, vector<8x16xf32> -> vector<8x16xf32>
    %88 = vector.extract_strided_slice %3 {offsets = [0, 96], sizes = [8, 32], strides = [1, 1]} : vector<8x128xbf16> to vector<8x32xbf16>
    %89 = vector.extract_strided_slice %9 {offsets = [96, 0], sizes = [32, 16], strides = [1, 1]} : vector<128x16xbf16> to vector<32x16xbf16>
    %cst_37 = arith.constant dense<0.000000e+00> : vector<8x16xf32>
    %90 = tpu.matmul %88, %89, %cst_37 {dimension_numbers = #tpu.dot_dimension_numbers<[1], [0], [0], [1], [0, 0, 1, 1], [], []>} : vector<8x32xbf16>, vector<32x16xbf16>, vector<8x16xf32> -> vector<8x16xf32>
    %91 = arith.addf %87, %90 : vector<8x16xf32>
    %cst_38 = arith.constant dense<0xFF800000> : vector<8xf32>
    %92 = vector.multi_reduction <maximumf>, %91, %cst_38 [1] : vector<8x16xf32> to vector<8xf32>
    %93 = vector.shape_cast %92 : vector<8xf32> to vector<8x1xf32>
    %94 = vector.broadcast %93 : vector<8x1xf32> to vector<8x16xf32>
    %95 = arith.subf %91, %94 : vector<8x16xf32>
    %96 = math.exp %95 : vector<8x16xf32>
    %cst_39 = arith.constant dense<0.000000e+00> : vector<8xf32>
    %97 = vector.multi_reduction <add>, %96, %cst_39 [1] : vector<8x16xf32> to vector<8xf32>
    %98 = vector.shape_cast %97 : vector<8xf32> to vector<8x1xf32>
    %99 = tpu.reciprocal %98 {approx = true} : vector<8x1xf32> -> vector<8x1xf32>
    %100 = vector.broadcast %99 : vector<8x1xf32> to vector<8x16xf32>
    %101 = arith.mulf %96, %100 : vector<8x16xf32>
    %102 = arith.truncf %101 : vector<8x16xf32> to vector<8x16xbf16>
    %103 = vector.extract_strided_slice %11 {offsets = [0, 96], sizes = [16, 32], strides = [1, 1]} : vector<16x128xbf16> to vector<16x32xbf16>
    %cst_40 = arith.constant dense<0.000000e+00> : vector<8x32xf32>
    %104 = tpu.matmul %102, %103, %cst_40 {dimension_numbers = #tpu.dot_dimension_numbers<[1], [0], [0], [1], [0, 0, 1, 1], [], []>} : vector<8x16xbf16>, vector<16x32xbf16>, vector<8x32xf32> -> vector<8x32xf32>
    %105 = arith.truncf %104 : vector<8x32xf32> to vector<8x32xbf16>
    %c96 = arith.constant 96 : index
    %c0_41 = arith.constant 0 : index
    %106 = vector.load %arg8[%c96, %c0_41] : memref<128x128xbf16, #tpu.memory_space<vmem>>, vector<32x128xbf16>
    %cst_42 = arith.constant dense<0.000000e+00> : vector<8x128xf32>
    %107 = tpu.matmul %105, %106, %cst_42 {dimension_numbers = #tpu.dot_dimension_numbers<[1], [0], [0], [1], [0, 0, 1, 1], [], []>} : vector<8x32xbf16>, vector<32x128xbf16>, vector<8x128xf32> -> vector<8x128xf32>
    %108 = arith.addf %84, %107 : vector<8x128xf32>
    %c0_43 = arith.constant 0 : index
    %c0_44 = arith.constant 0 : index
    %109 = vector.load %arg9[%c0_43, %c0_44] : memref<1x128xf32, #tpu.memory_space<vmem>>, vector<1x128xf32>
    %110 = vector.broadcast %109 : vector<1x128xf32> to vector<8x128xf32>
    %111 = arith.addf %108, %110 : vector<8x128xf32>
    %c0_45 = arith.constant 0 : index
    %c0_46 = arith.constant 0 : index
    %c0_47 = arith.constant 0 : index
    %112 = vector.load %arg7[%c0_45, %c0_46, %c0_47] : memref<1x8x128xbf16, #tpu.memory_space<vmem>>, vector<1x8x128xbf16>
    %113 = vector.shape_cast %112 : vector<1x8x128xbf16> to vector<8x128xbf16>
    %114 = arith.extf %113 : vector<8x128xbf16> to vector<8x128xf32>
    %115 = arith.addf %111, %114 : vector<8x128xf32>
    %cst_48 = arith.constant dense<0.000000e+00> : vector<8xf32>
    %116 = vector.multi_reduction <add>, %115, %cst_48 [1] : vector<8x128xf32> to vector<8xf32>
    %117 = vector.shape_cast %116 : vector<8xf32> to vector<8x1xf32>
    %cst_49 = arith.constant 1.280000e+02 : f32
    %118 = vector.broadcast %cst_49 : f32 to vector<8x1xf32>
    %119 = arith.divf %117, %118 : vector<8x1xf32>
    %120 = vector.broadcast %119 : vector<8x1xf32> to vector<8x128xf32>
    %121 = arith.subf %115, %120 : vector<8x128xf32>
    %122 = arith.mulf %121, %121 : vector<8x128xf32>
    %cst_50 = arith.constant dense<0.000000e+00> : vector<8xf32>
    %123 = vector.multi_reduction <add>, %122, %cst_50 [1] : vector<8x128xf32> to vector<8xf32>
    %124 = vector.shape_cast %123 : vector<8xf32> to vector<8x1xf32>
    %cst_51 = arith.constant 1.280000e+02 : f32
    %125 = vector.broadcast %cst_51 : f32 to vector<8x1xf32>
    %126 = arith.divf %124, %125 : vector<8x1xf32>
    %127 = vector.broadcast %119 : vector<8x1xf32> to vector<8x128xf32>
    %128 = arith.subf %115, %127 : vector<8x128xf32>
    %cst_52 = arith.constant 9.99999974E-6 : f32
    %129 = vector.broadcast %cst_52 : f32 to vector<8x1xf32>
    %130 = arith.addf %126, %129 : vector<8x1xf32>
    %131 = math.rsqrt %130 : vector<8x1xf32>
    %132 = vector.broadcast %131 : vector<8x1xf32> to vector<8x128xf32>
    %133 = arith.mulf %128, %132 : vector<8x128xf32>
    %c0_53 = arith.constant 0 : index
    %c0_54 = arith.constant 0 : index
    %134 = vector.load %arg10[%c0_53, %c0_54] : memref<1x128xf32, #tpu.memory_space<vmem>>, vector<1x128xf32>
    %135 = vector.broadcast %134 : vector<1x128xf32> to vector<8x128xf32>
    %136 = arith.mulf %133, %135 : vector<8x128xf32>
    %c0_55 = arith.constant 0 : index
    %c0_56 = arith.constant 0 : index
    %137 = vector.load %arg11[%c0_55, %c0_56] : memref<1x128xf32, #tpu.memory_space<vmem>>, vector<1x128xf32>
    %138 = vector.broadcast %137 : vector<1x128xf32> to vector<8x128xf32>
    %139 = arith.addf %136, %138 : vector<8x128xf32>
    %140 = arith.truncf %139 : vector<8x128xf32> to vector<8x128xbf16>
    %c0_57 = arith.constant 0 : index
    %c0_58 = arith.constant 0 : index
    %c0_59 = arith.constant 0 : index
    %141 = vector.load %arg12[%c0_57, %c0_58, %c0_59] : memref<1x8x128xbf16, #tpu.memory_space<vmem>>, vector<1x8x128xbf16>
    %142 = vector.shape_cast %141 : vector<1x8x128xbf16> to vector<8x128xbf16>
    %143 = vector.shape_cast %140 : vector<8x128xbf16> to vector<1x8x128xbf16>
    tpu.vector_store %arg12[%c0_57, %c0_58, %c0_59], %143 {strides = array<i32>} : memref<1x8x128xbf16, #tpu.memory_space<vmem>>, vector<1x8x128xbf16>,
    return
  }
  func.func @transform_0(%arg0: i32, %arg1: i32) -> (i32, i32, i32) {
    %c0_i32 = arith.constant 0 : i32
    %c0_i32_0 = arith.constant 0 : i32
    return %arg0, %arg1, %c0_i32 : i32, i32, i32
  }
  func.func @transform_1(%arg0: i32, %arg1: i32) -> (i32, i32, i32) {
    %c0_i32 = arith.constant 0 : i32
    %c0_i32_0 = arith.constant 0 : i32
    return %arg0, %arg1, %c0_i32 : i32, i32, i32
  }
  func.func @transform_2(%arg0: i32, %arg1: i32) -> (i32, i32, i32) {
    %c0_i32 = arith.constant 0 : i32
    %c0_i32_0 = arith.constant 0 : i32
    %c0_i32_1 = arith.constant 0 : i32
    return %arg0, %c0_i32, %c0_i32_0 : i32, i32, i32
  }
  func.func @transform_3(%arg0: i32, %arg1: i32) -> (i32, i32, i32) {
    %c0_i32 = arith.constant 0 : i32
    %c1_i32 = arith.constant 1 : i32
    %c0_i32_0 = arith.constant 0 : i32
    return %arg0, %c0_i32, %c1_i32 : i32, i32, i32
  }
  func.func @transform_4(%arg0: i32, %arg1: i32) -> (i32, i32, i32) {
    %c0_i32 = arith.constant 0 : i32
    %c2_i32 = arith.constant 2 : i32
    %c0_i32_0 = arith.constant 0 : i32
    return %arg0, %c0_i32, %c2_i32 : i32, i32, i32
  }
  func.func @transform_5(%arg0: i32, %arg1: i32) -> (i32, i32, i32) {
    %c0_i32 = arith.constant 0 : i32
    %c0_i32_0 = arith.constant 0 : i32
    return %arg0, %arg1, %c0_i32 : i32, i32, i32
  }
  func.func @transform_6(%arg0: i32, %arg1: i32) -> (i32, i32) {
    %c0_i32 = arith.constant 0 : i32
    %c0_i32_0 = arith.constant 0 : i32
    %c0_i32_1 = arith.constant 0 : i32
    return %c0_i32, %c0_i32_0 : i32, i32
  }
  func.func @transform_7(%arg0: i32, %arg1: i32) -> (i32, i32) {
    %c0_i32 = arith.constant 0 : i32
    %c0_i32_0 = arith.constant 0 : i32
    %c0_i32_1 = arith.constant 0 : i32
    return %c0_i32, %c0_i32_0 : i32, i32
  }
  func.func @transform_8(%arg0: i32, %arg1: i32) -> (i32, i32) {
    %c0_i32 = arith.constant 0 : i32
    %c0_i32_0 = arith.constant 0 : i32
    %c0_i32_1 = arith.constant 0 : i32
    return %c0_i32, %c0_i32_0 : i32, i32
  }
  func.func @transform_9(%arg0: i32, %arg1: i32) -> (i32, i32) {
    %c0_i32 = arith.constant 0 : i32
    %c0_i32_0 = arith.constant 0 : i32
    %c0_i32_1 = arith.constant 0 : i32
    return %c0_i32, %c0_i32_0 : i32, i32
  }
  func.func @transform_10(%arg0: i32, %arg1: i32) -> (i32, i32, i32) {
    %c0_i32 = arith.constant 0 : i32
    %c0_i32_0 = arith.constant 0 : i32
    return %arg0, %arg1, %c0_i32 : i32, i32, i32
  }
}

module attributes {stable_mosaic.version = 11 : i64} {
  func.func @_ffn_ln_kernel(%arg0: i32, %arg1: memref<16x128xbf16, #tpu.memory_space<vmem>>, %arg2: memref<128x256xbf16, #tpu.memory_space<vmem>>, %arg3: memref<1x256xf32, #tpu.memory_space<vmem>>, %arg4: memref<256x128xbf16, #tpu.memory_space<vmem>>, %arg5: memref<1x128xf32, #tpu.memory_space<vmem>>, %arg6: memref<1x128xf32, #tpu.memory_space<vmem>>, %arg7: memref<1x128xf32, #tpu.memory_space<vmem>>, %arg8: memref<16x128xbf16, #tpu.memory_space<vmem>>) attributes {dimension_semantics = [#tpu.dimension_semantics<parallel>], iteration_bounds = array<i64: 1>, scalar_prefetch = 0 : i64, scratch_operands = 0 : i64, tpu.core_type = #tpu.core_type<tc>, window_params = [{transform_indices = @transform_0, window_bounds = array<i64: 16, 128>}, {pipeline_mode = #tpu.pipeline_mode<synchronous>, transform_indices = @transform_1, window_bounds = array<i64: 128, 256>}, {pipeline_mode = #tpu.pipeline_mode<synchronous>, transform_indices = @transform_2, window_bounds = array<i64: 1, 256>}, {pipeline_mode = #tpu.pipeline_mode<synchronous>, transform_indices = @transform_3, window_bounds = array<i64: 256, 128>}, {pipeline_mode = #tpu.pipeline_mode<synchronous>, transform_indices = @transform_4, window_bounds = array<i64: 1, 128>}, {pipeline_mode = #tpu.pipeline_mode<synchronous>, transform_indices = @transform_5, window_bounds = array<i64: 1, 128>}, {pipeline_mode = #tpu.pipeline_mode<synchronous>, transform_indices = @transform_6, window_bounds = array<i64: 1, 128>}, {transform_indices = @transform_7, window_bounds = array<i64: 16, 128>}]} {
    %c0 = arith.constant 0 : index
    %c0_0 = arith.constant 0 : index
    %0 = vector.load %arg1[%c0, %c0_0] : memref<16x128xbf16, #tpu.memory_space<vmem>>, vector<16x128xbf16>
    %cst = arith.constant 0.000000e+00 : f32
    %1 = vector.broadcast %cst : f32 to vector<16x128xf32>
    %c0_1 = arith.constant 0 : index
    %c0_2 = arith.constant 0 : index
    %2 = vector.load %arg2[%c0_1, %c0_2] : memref<128x256xbf16, #tpu.memory_space<vmem>>, vector<128x256xbf16>
    %cst_3 = arith.constant dense<0.000000e+00> : vector<16x256xf32>
    %3 = tpu.matmul %0, %2, %cst_3 {dimension_numbers = #tpu.dot_dimension_numbers<[1], [0], [0], [1], [0, 0, 1, 1], [], []>} : vector<16x128xbf16>, vector<128x256xbf16>, vector<16x256xf32> -> vector<16x256xf32>
    %c0_4 = arith.constant 0 : index
    %c0_5 = arith.constant 0 : index
    %4 = vector.load %arg3[%c0_4, %c0_5] : memref<1x256xf32, #tpu.memory_space<vmem>>, vector<1x256xf32>
    %5 = vector.broadcast %4 : vector<1x256xf32> to vector<16x256xf32>
    %6 = arith.addf %3, %5 : vector<16x256xf32>
    %cst_6 = arith.constant 0.000000e+00 : f32
    %7 = vector.broadcast %cst_6 : f32 to vector<16x256xf32>
    %8 = arith.maximumf %6, %7 : vector<16x256xf32>
    %9 = arith.truncf %8 : vector<16x256xf32> to vector<16x256xbf16>
    %c0_7 = arith.constant 0 : index
    %c0_8 = arith.constant 0 : index
    %10 = vector.load %arg4[%c0_7, %c0_8] : memref<256x128xbf16, #tpu.memory_space<vmem>>, vector<256x128xbf16>
    %cst_9 = arith.constant dense<0.000000e+00> : vector<16x128xf32>
    %11 = tpu.matmul %9, %10, %cst_9 {dimension_numbers = #tpu.dot_dimension_numbers<[1], [0], [0], [1], [0, 0, 1, 1], [], []>} : vector<16x256xbf16>, vector<256x128xbf16>, vector<16x128xf32> -> vector<16x128xf32>
    %12 = arith.addf %1, %11 : vector<16x128xf32>
    %c0_10 = arith.constant 0 : index
    %c0_11 = arith.constant 0 : index
    %13 = vector.load %arg5[%c0_10, %c0_11] : memref<1x128xf32, #tpu.memory_space<vmem>>, vector<1x128xf32>
    %14 = vector.broadcast %13 : vector<1x128xf32> to vector<16x128xf32>
    %15 = arith.addf %12, %14 : vector<16x128xf32>
    %16 = arith.extf %0 : vector<16x128xbf16> to vector<16x128xf32>
    %17 = arith.addf %15, %16 : vector<16x128xf32>
    %cst_12 = arith.constant dense<0.000000e+00> : vector<16xf32>
    %18 = vector.multi_reduction <add>, %17, %cst_12 [1] : vector<16x128xf32> to vector<16xf32>
    %19 = vector.shape_cast %18 : vector<16xf32> to vector<16x1xf32>
    %cst_13 = arith.constant 1.280000e+02 : f32
    %20 = vector.broadcast %cst_13 : f32 to vector<16x1xf32>
    %21 = arith.divf %19, %20 : vector<16x1xf32>
    %22 = vector.broadcast %21 : vector<16x1xf32> to vector<16x128xf32>
    %23 = arith.subf %17, %22 : vector<16x128xf32>
    %24 = arith.mulf %23, %23 : vector<16x128xf32>
    %cst_14 = arith.constant dense<0.000000e+00> : vector<16xf32>
    %25 = vector.multi_reduction <add>, %24, %cst_14 [1] : vector<16x128xf32> to vector<16xf32>
    %26 = vector.shape_cast %25 : vector<16xf32> to vector<16x1xf32>
    %cst_15 = arith.constant 1.280000e+02 : f32
    %27 = vector.broadcast %cst_15 : f32 to vector<16x1xf32>
    %28 = arith.divf %26, %27 : vector<16x1xf32>
    %29 = vector.broadcast %21 : vector<16x1xf32> to vector<16x128xf32>
    %30 = arith.subf %17, %29 : vector<16x128xf32>
    %cst_16 = arith.constant 9.99999974E-6 : f32
    %31 = vector.broadcast %cst_16 : f32 to vector<16x1xf32>
    %32 = arith.addf %28, %31 : vector<16x1xf32>
    %33 = math.rsqrt %32 : vector<16x1xf32>
    %34 = vector.broadcast %33 : vector<16x1xf32> to vector<16x128xf32>
    %35 = arith.mulf %30, %34 : vector<16x128xf32>
    %c0_17 = arith.constant 0 : index
    %c0_18 = arith.constant 0 : index
    %36 = vector.load %arg6[%c0_17, %c0_18] : memref<1x128xf32, #tpu.memory_space<vmem>>, vector<1x128xf32>
    %37 = vector.broadcast %36 : vector<1x128xf32> to vector<16x128xf32>
    %38 = arith.mulf %35, %37 : vector<16x128xf32>
    %c0_19 = arith.constant 0 : index
    %c0_20 = arith.constant 0 : index
    %39 = vector.load %arg7[%c0_19, %c0_20] : memref<1x128xf32, #tpu.memory_space<vmem>>, vector<1x128xf32>
    %40 = vector.broadcast %39 : vector<1x128xf32> to vector<16x128xf32>
    %41 = arith.addf %38, %40 : vector<16x128xf32>
    %42 = arith.truncf %41 : vector<16x128xf32> to vector<16x128xbf16>
    %c0_21 = arith.constant 0 : index
    %c0_22 = arith.constant 0 : index
    %43 = vector.load %arg8[%c0_21, %c0_22] : memref<16x128xbf16, #tpu.memory_space<vmem>>, vector<16x128xbf16>
    tpu.vector_store %arg8[%c0_21, %c0_22], %42 {strides = array<i32>} : memref<16x128xbf16, #tpu.memory_space<vmem>>, vector<16x128xbf16>,
    return
  }
  func.func @transform_0(%arg0: i32) -> (i32, i32) {
    %c0_i32 = arith.constant 0 : i32
    %c0_i32_0 = arith.constant 0 : i32
    return %arg0, %c0_i32 : i32, i32
  }
  func.func @transform_1(%arg0: i32) -> (i32, i32) {
    %c0_i32 = arith.constant 0 : i32
    %c0_i32_0 = arith.constant 0 : i32
    %c0_i32_1 = arith.constant 0 : i32
    return %c0_i32, %c0_i32_0 : i32, i32
  }
  func.func @transform_2(%arg0: i32) -> (i32, i32) {
    %c0_i32 = arith.constant 0 : i32
    %c0_i32_0 = arith.constant 0 : i32
    %c0_i32_1 = arith.constant 0 : i32
    return %c0_i32, %c0_i32_0 : i32, i32
  }
  func.func @transform_3(%arg0: i32) -> (i32, i32) {
    %c0_i32 = arith.constant 0 : i32
    %c0_i32_0 = arith.constant 0 : i32
    %c0_i32_1 = arith.constant 0 : i32
    return %c0_i32, %c0_i32_0 : i32, i32
  }
  func.func @transform_4(%arg0: i32) -> (i32, i32) {
    %c0_i32 = arith.constant 0 : i32
    %c0_i32_0 = arith.constant 0 : i32
    %c0_i32_1 = arith.constant 0 : i32
    return %c0_i32, %c0_i32_0 : i32, i32
  }
  func.func @transform_5(%arg0: i32) -> (i32, i32) {
    %c0_i32 = arith.constant 0 : i32
    %c0_i32_0 = arith.constant 0 : i32
    %c0_i32_1 = arith.constant 0 : i32
    return %c0_i32, %c0_i32_0 : i32, i32
  }
  func.func @transform_6(%arg0: i32) -> (i32, i32) {
    %c0_i32 = arith.constant 0 : i32
    %c0_i32_0 = arith.constant 0 : i32
    %c0_i32_1 = arith.constant 0 : i32
    return %c0_i32, %c0_i32_0 : i32, i32
  }
  func.func @transform_7(%arg0: i32) -> (i32, i32) {
    %c0_i32 = arith.constant 0 : i32
    %c0_i32_0 = arith.constant 0 : i32
    return %arg0, %c0_i32 : i32, i32
  }
}

</mosaic_0001>

<bundles_post_ra>
// kernel: decoder_layer_forward.8
= control target key start
LH: loop header
LB: loop body
LE: loop exit
PB: predicated region body
PF: predicated region fallthrough
CT: control target
= control target key end

     0   :  { %v578_v0 = vmov 0.0   ;;  %vm579_vm0 = vmmov 0   ;;  %s753_s4 = inlined_call_operand.vmem [shape: bf16[128,128], index: 4, kind: input, shape index: {}]   ;;  %s754_s3 = inlined_call_operand.vmem [shape: bf16[128,128], index: 3, kind: input, shape index: {}]   ;;  %s755_s1 = inlined_call_operand.vmem [shape: bf16[16,128], index: 1, kind: input, shape index: {}]   ;;  %s756_s0 = inlined_call_operand.vmem [shape: bf16[16,128], index: 0, kind: input, shape index: {}]   ;;  %s757_s5 = inlined_call_operand.vmem [shape: bf16[128,128], index: 5, kind: input, shape index: {}]   ;;  %s758_s2 = inlined_call_operand.vmem [shape: bf16[16,128], index: 2, kind: input, shape index: {}]   ;;  %s759_s6 = inlined_call_operand.vmem [shape: f32[1,128], index: 6, kind: input, shape index: {}]   ;;  %s760_s8 = inlined_call_operand.vmem [shape: bf16[16,128], index: 8, kind: output, shape index: {0}]   ;;  %s761_s7 = inlined_call_operand.vmem [shape: f32[1,128], index: 7, kind: input, shape index: {}]   ;;  %s762_s9 = inlined_call_operand.vmem [shape: bf16[16,128], index: 9, kind: output, shape index: {1}]  }
   0x1   :  { %489 = vmatprep.subr.bf16.mxu0 %v578_v0  ;;  %509 = vmatprep.subr.bf16.mxu1 %v578_v0  ;;  %v551_v1 = vld [vmem:[%s753_s4] sm:$0xff]   ;;  %v553_v3 = vld [vmem:[%s753_s4 + $0x8] sm:$0xff]   ;;  %v555_v5 = vld [vmem:[%s753_s4 + $0x10] sm:$0xff]  }
   0x2   :  { %v552_v2 = vld [vmem:[%s754_s3] sm:$0xff]   ;;  %505 = vmatprep.mubr.msk.bf16.mxu0 %vm579_vm0, %v578_v0  ;;  %525 = vmatprep.mubr.msk.bf16.mxu1 %vm579_vm0, %v578_v0  ;;  %v554_v4 = vld [vmem:[%s754_s3 + $0x8] sm:$0xff]   ;;  %v556_v6 = vld [vmem:[%s754_s3 + $0x10] sm:$0xff]  }
   0x3   :  { %490 = vmatpush3.bf16.msra.mxu0 %v551_v1  ;;  %510 = vmatpush3.bf16.msra.mxu1 %v552_v2  ;;  %v557_v7 = vld [vmem:[%s753_s4 + $0x18] sm:$0xff]   ;;  %v559_v9 = vld [vmem:[%s753_s4 + $0x20] sm:$0xff]   ;;  %v561_v11 = vld [vmem:[%s753_s4 + $0x28] sm:$0xff]  }
   0x4   :  { %491 = vmatprep.subr.bf16.mxu0 %v578_v0  ;;  %511 = vmatprep.subr.bf16.mxu1 %v578_v0  ;;  %v558_v8 = vld [vmem:[%s754_s3 + $0x18] sm:$0xff]   ;;  %v560_v10 = vld [vmem:[%s754_s3 + $0x20] sm:$0xff]   ;;  %v562_v12 = vld [vmem:[%s754_s3 + $0x28] sm:$0xff]  }
   0x5   :  { %v563_v13 = vld [vmem:[%s753_s4 + $0x30] sm:$0xff]   ;;  %v565_v15 = vld [vmem:[%s753_s4 + $0x38] sm:$0xff]   ;;  %v567_v17 = vld [vmem:[%s755_s1] sm:$0xff]  }
   0x6   :  { %v564_v14 = vld [vmem:[%s754_s3 + $0x30] sm:$0xff]   ;;  %v566_v16 = vld [vmem:[%s754_s3 + $0x38] sm:$0xff]   ;;  %v568_v18 = vld [vmem:[%s756_s0] sm:$0xff]  }
   0x7   :  { %492 = vmatpush3.bf16.msra.mxu0 %v553_v3  ;;  %512 = vmatpush3.bf16.msra.mxu1 %v554_v4  ;;  %v569_v19 = vld [vmem:[%s757_s5] sm:$0xff]   ;;  %v570_v20 = vld [vmem:[%s757_s5 + $0x8] sm:$0xff]   ;;  %v571_v21 = vld [vmem:[%s757_s5 + $0x10] sm:$0xff]  }
   0x8   :  { %493 = vmatprep.subr.bf16.mxu0 %v578_v0  ;;  %513 = vmatprep.subr.bf16.mxu1 %v578_v0  ;;  %v572_v22 = vld [vmem:[%s757_s5 + $0x18] sm:$0xff]   ;;  %v573_v23 = vld [vmem:[%s757_s5 + $0x20] sm:$0xff]   ;;  %v574_v24 = vld [vmem:[%s757_s5 + $0x28] sm:$0xff]  }
   0x9   :  { %v575_v25 = vld [vmem:[%s757_s5 + $0x30] sm:$0xff]   ;;  %v576_v26 = vld [vmem:[%s757_s5 + $0x38] sm:$0xff]   ;;  %v577_v27 = vld [vmem:[%s758_s2] sm:$0xff]  }
   0xa   :  { %v433_v30 = vld [vmem:[%s759_s6] ss:$0 sm:$0xff] }
   0xb   :  { %494 = vmatpush3.bf16.msra.mxu0 %v555_v5  ;;  %514 = vmatpush3.bf16.msra.mxu1 %v556_v6  ;;  %v434_v42 = vld [vmem:[%s761_s7] ss:$0 sm:$0xff] }
   0xc   :  { %495 = vmatprep.subr.bf16.mxu0 %v578_v0  ;;  %515 = vmatprep.subr.bf16.mxu1 %v578_v0 }
   0xf   :  { %496 = vmatpush3.bf16.msra.mxu0 %v557_v7  ;;  %516 = vmatpush3.bf16.msra.mxu1 %v558_v8 }
  0x10   :  { %497 = vmatprep.subr.bf16.mxu0 %v578_v0  ;;  %517 = vmatprep.subr.bf16.mxu1 %v578_v0 }
  0x13   :  { %498 = vmatpush3.bf16.msra.mxu0 %v559_v9  ;;  %518 = vmatpush3.bf16.msra.mxu1 %v560_v10 }
  0x14   :  { %499 = vmatprep.subr.bf16.mxu0 %v578_v0  ;;  %519 = vmatprep.subr.bf16.mxu1 %v578_v0 }
  0x17   :  { %500 = vmatpush3.bf16.msra.mxu0 %v561_v11  ;;  %520 = vmatpush3.bf16.msra.mxu1 %v562_v12 }
  0x18   :  { %501 = vmatprep.subr.bf16.mxu0 %v578_v0  ;;  %521 = vmatprep.subr.bf16.mxu1 %v578_v0 }
  0x1b   :  { %502 = vmatpush3.bf16.msra.mxu0 %v563_v13  ;;  %522 = vmatpush3.bf16.msra.mxu1 %v564_v14 }
  0x1c   :  { %503 = vmatprep.subr.bf16.mxu0 %v578_v0  ;;  %523 = vmatprep.subr.bf16.mxu1 %v578_v0 }
  0x1f   :  { %504 = vmatpush3.bf16.msra.mxu0 %v565_v15  ;;  %524 = vmatpush3.bf16.msra.mxu1 %v566_v16 }
  0x20   :  { %529 = vmatprep.subr.bf16.mxu0 %v578_v0 }
  0x22   :  { %506 = vmatmul.mubr.bf16.vlgmr.msra.gmra.mrb[0].mxu0 %v567_v17  ;;  %526 = vmatmul.mubr.bf16.vlgmr.msra.gmra.mrb[0].mxu1 %v568_v18 }
  0x23   :  { %530 = vmatpush3.bf16.msra.mxu0 %v569_v19  ;;  %545 = vmatprep.mubr.msk.bf16.mxu0 %vm579_vm0, %v578_v0 }
  0x24   :  { %531 = vmatprep.subr.bf16.mxu0 %v578_v0 }
  0x27   :  { %532 = vmatpush3.bf16.msra.mxu0 %v570_v20 }
  0x28   :  { %533 = vmatprep.subr.bf16.mxu0 %v578_v0 }
  0x2b   :  { %534 = vmatpush3.bf16.msra.mxu0 %v571_v21 }
  0x2c   :  { %535 = vmatprep.subr.bf16.mxu0 %v578_v0 }
  0x2f   :  { %536 = vmatpush3.bf16.msra.mxu0 %v572_v22 }
  0x30   :  { %537 = vmatprep.subr.bf16.mxu0 %v578_v0 }
  0x33   :  { %538 = vmatpush3.bf16.msra.mxu0 %v573_v23 }
  0x34   :  { %539 = vmatprep.subr.bf16.mxu0 %v578_v0 }
  0x37   :  { %540 = vmatpush3.bf16.msra.mxu0 %v574_v24 }
  0x38   :  { %541 = vmatprep.subr.bf16.mxu0 %v578_v0 }
  0x3b   :  { %542 = vmatpush3.bf16.msra.mxu0 %v575_v25 }
  0x3c   :  { %543 = vmatprep.subr.bf16.mxu0 %v578_v0 }
  0x3f   :  { %544 = vmatpush3.bf16.msra.mxu0 %v576_v26 }
  0x42   :  { %546 = vmatmul.mubr.bf16.vlgmr.msra.gmra.mrb[4].mxu0 %v577_v27 }
  0xf5   :  { %v156_v28 = vpop.f32.mrb[0].mxu0  ;;  %v251_v29 = vpop.f32.mrb[0].mxu1 }
  0xf6   :  { %v507_v31 = vpop.f32.mrb[1].mxu0  ;;  %v252_v32 = vadd.f32 %v251_v29, %v156_v28  ;;  %v527_v33 = vpop.f32.mrb[1].mxu1 }
  0xf7   :  { %v159_v34 = vpop.f32.mrb[2].mxu0  ;;  %v254_v35 = vpop.f32.mrb[2].mxu1 }
  0xf8   :  { %v508_v36 = vpop.f32.mrb[3].mxu0  ;;  %v265_v37 = vadd.f32 %v433_v30, %v252_v32  ;;  %v255_v38 = vadd.f32 %v254_v35, %v159_v34  ;;  %v528_v39 = vpop.f32.mrb[3].mxu1 }
  0xfa   :  { %v266_v40 = vadd.f32 %v433_v30, %v255_v38 }
  0xfc   :  { %v455_v41 = vpack.c.bf16 %v266_v40, %v265_v37 }
  0xfe   :  { %456 = vst [vmem:[%s760_s8] sm:$0xff] %v455_v41  }
 0x115   :  { %v380_v43 = vpop.f32.mrb[4].mxu0 }
 0x116   :  { %v547_v44 = vpop.f32.mrb[5].mxu0  ;;  %v381_v46 = vadd.f32 %v434_v42, %v380_v43 }
 0x117   :  { %v383_v45 = vpop.f32.mrb[6].mxu0 }
 0x118   :  { %v384_v47 = vadd.f32 %v434_v42, %v383_v45  ;;  %v548_v48 = vpop.f32.mrb[7].mxu0 }
 0x11a   :  { %v460_v49 = vpack.c.bf16 %v384_v47, %v381_v46 }
 0x11c   :  { %461 = vst [vmem:[%s762_s9] sm:$0xff] %v460_v49  }

// kernel: decoder_layer_forward.6
= control target key start
LH: loop header
LB: loop body
LE: loop exit
PB: predicated region body
PF: predicated region fallthrough
CT: control target
= control target key end

     0   :  { %v765_v0 = vmov 0.0   ;;  %vm766_vm0 = vmmov 0   ;;  %v767_v3 = vmov 0   ;;  %v527_v56 = vlaneseq  ;;  %s985_s3 = inlined_call_operand.vmem [shape: bf16[128,384], index: 3, kind: input, shape index: {}]   ;;  %s986_s1 = inlined_call_operand.vmem [shape: bf16[16,128], index: 1, kind: input, shape index: {}]   ;;  %s987_s2 = inlined_call_operand.vmem [shape: bf16[128,384], index: 2, kind: input, shape index: {}]   ;;  %s988_s0 = inlined_call_operand.vmem [shape: bf16[16,128], index: 0, kind: input, shape index: {}]   ;;  %s989_s4 = inlined_call_operand.vmem [shape: f32[1,384], index: 4, kind: input, shape index: {}]   ;;  %s990_s5 = inlined_call_operand.vmem [shape: bf16[16,384], index: 5, kind: output, shape index: {}]  }
   0x1   :  { %652 = vmatprep.subr.bf16.mxu1 %v765_v0  ;;  %v699_v1 = vld [vmem:[%s985_s3 + $0x4] ss:$12 sps:$4 sm:$0xff]   ;;  %668 = vmatprep.mubr.msk.bf16.mxu1 %vm766_vm0, %v765_v0  ;;  %v701_v2 = vld [vmem:[%s985_s3 + $0x8] ss:$12 sps:$4 sm:$0xff]   ;;  %v702_v4 = vld [vmem:[%s985_s3] ss:$12 sps:$4 sm:$0xff]  }
   0x2   :  { %255 = vmatprep.mubr.bf16.mxu0 %v767_v3  ;;  %223 = vmatprep.subr.bf16.mxu0 %v699_v1  ;;  %v703_v5 = vld [vmem:[%s985_s3 + $0x1c] ss:$12 sps:$4 sm:$0xff]   ;;  %v705_v6 = vld [vmem:[%s985_s3 + $0x20] ss:$12 sps:$4 sm:$0xff]   ;;  %v706_v7 = vld [vmem:[%s985_s3 + $0x18] ss:$12 sps:$4 sm:$0xff]  }
   0x3   :  { %653 = vmatpush3.bf16.msra.mxu1 %v701_v2  ;;  %224 = vmatpush1.bf16.msra.mxu0 %v702_v4  ;;  %v707_v8 = vld [vmem:[%s985_s3 + $0x34] ss:$12 sps:$4 sm:$0xff]   ;;  %v709_v9 = vld [vmem:[%s985_s3 + $0x38] ss:$12 sps:$4 sm:$0xff]   ;;  %v710_v10 = vld [vmem:[%s985_s3 + $0x30] ss:$12 sps:$4 sm:$0xff]  }
   0x4   :  { %654 = vmatprep.subr.bf16.mxu1 %v765_v0  ;;  %225 = vmatprep.subr.bf16.mxu0 %v703_v5  ;;  %v711_v11 = vld [vmem:[%s985_s3 + $0x4c] ss:$12 sps:$4 sm:$0xff]   ;;  %v713_v12 = vld [vmem:[%s985_s3 + $0x50] ss:$12 sps:$4 sm:$0xff]   ;;  %v714_v13 = vld [vmem:[%s985_s3 + $0x48] ss:$12 sps:$4 sm:$0xff]  }
   0x5   :  { %v715_v14 = vld [vmem:[%s985_s3 + $0x64] ss:$12 sps:$4 sm:$0xff]   ;;  %v717_v15 = vld [vmem:[%s985_s3 + $0x68] ss:$12 sps:$4 sm:$0xff]   ;;  %v718_v16 = vld [vmem:[%s985_s3 + $0x60] ss:$12 sps:$4 sm:$0xff]  }
   0x6   :  { %v719_v17 = vld [vmem:[%s985_s3 + $0x7c] ss:$12 sps:$4 sm:$0xff]   ;;  %v721_v18 = vld [vmem:[%s985_s3 + $0x80] ss:$12 sps:$4 sm:$0xff]   ;;  %v722_v19 = vld [vmem:[%s985_s3 + $0x78] ss:$12 sps:$4 sm:$0xff]  }
   0x7   :  { %655 = vmatpush3.bf16.msra.mxu1 %v705_v6  ;;  %226 = vmatpush1.bf16.msra.mxu0 %v706_v7  ;;  %v723_v20 = vld [vmem:[%s985_s3 + $0x94] ss:$12 sps:$4 sm:$0xff]   ;;  %v725_v21 = vld [vmem:[%s985_s3 + $0x98] ss:$12 sps:$4 sm:$0xff]   ;;  %v726_v22 = vld [vmem:[%s985_s3 + $0x90] ss:$12 sps:$4 sm:$0xff]  }
   0x8   :  { %656 = vmatprep.subr.bf16.mxu1 %v765_v0  ;;  %227 = vmatprep.subr.bf16.mxu0 %v707_v8  ;;  %v727_v23 = vld [vmem:[%s985_s3 + $0xac] ss:$12 sps:$4 sm:$0xff]   ;;  %v729_v24 = vld [vmem:[%s985_s3 + $0xb0] ss:$12 sps:$4 sm:$0xff]   ;;  %v730_v25 = vld [vmem:[%s985_s3 + $0xa8] ss:$12 sps:$4 sm:$0xff]  }
   0x9   :  { %v734_v26 = vld [vmem:[%s987_s2 + $0x4] ss:$12 sps:$4 sm:$0xff]   ;;  %v735_v28 = vld [vmem:[%s987_s2 + $0x8] ss:$12 sps:$4 sm:$0xff]   ;;  %v732_v29 = vld [vmem:[%s987_s2] ss:$12 sps:$4 sm:$0xff]  }
   0xa   :  { %v731_v27 = vld [vmem:[%s986_s1] sm:$0xff]   ;;  %v738_v30 = vld [vmem:[%s987_s2 + $0x1c] ss:$12 sps:$4 sm:$0xff]   ;;  %v746_v36 = vld [vmem:[%s987_s2 + $0x4c] ss:$12 sps:$4 sm:$0xff]   ;;  %v528_v57 = vshrl.u32 %v527_v56, 7 }
   0xb   :  { %657 = vmatpush3.bf16.msra.mxu1 %v709_v9  ;;  %228 = vmatpush1.bf16.msra.mxu0 %v710_v10  ;;  %v739_v31 = vld [vmem:[%s987_s2 + $0x20] ss:$12 sps:$4 sm:$0xff]   ;;  %v736_v32 = vld [vmem:[%s987_s2 + $0x18] ss:$12 sps:$4 sm:$0xff]   ;;  %v740_v35 = vld [vmem:[%s987_s2 + $0x30] ss:$12 sps:$4 sm:$0xff]  }
   0xc   :  { %658 = vmatprep.subr.bf16.mxu1 %v765_v0  ;;  %229 = vmatprep.subr.bf16.mxu0 %v711_v11  ;;  %v742_v33 = vld [vmem:[%s987_s2 + $0x34] ss:$12 sps:$4 sm:$0xff]   ;;  %v743_v34 = vld [vmem:[%s987_s2 + $0x38] ss:$12 sps:$4 sm:$0xff]   ;;  %v747_v37 = vld [vmem:[%s987_s2 + $0x50] ss:$12 sps:$4 sm:$0xff]  }
   0xd   :  { %v744_v38 = vld [vmem:[%s987_s2 + $0x48] ss:$12 sps:$4 sm:$0xff]   ;;  %v750_v39 = vld [vmem:[%s987_s2 + $0x64] ss:$12 sps:$4 sm:$0xff]   ;;  %v748_v41 = vld [vmem:[%s987_s2 + $0x60] ss:$12 sps:$4 sm:$0xff]  }
   0xe   :  { %v751_v40 = vld [vmem:[%s987_s2 + $0x68] ss:$12 sps:$4 sm:$0xff]   ;;  %v755_v43 = vld [vmem:[%s987_s2 + $0x80] ss:$12 sps:$4 sm:$0xff]   ;;  %v752_v44 = vld [vmem:[%s987_s2 + $0x78] ss:$12 sps:$4 sm:$0xff]  }
   0xf   :  { %659 = vmatpush3.bf16.msra.mxu1 %v713_v12  ;;  %230 = vmatpush1.bf16.msra.mxu0 %v714_v13  ;;  %v754_v42 = vld [vmem:[%s987_s2 + $0x7c] ss:$12 sps:$4 sm:$0xff]   ;;  %v758_v45 = vld [vmem:[%s987_s2 + $0x94] ss:$12 sps:$4 sm:$0xff]   ;;  %v759_v46 = vld [vmem:[%s987_s2 + $0x98] ss:$12 sps:$4 sm:$0xff]  }
  0x10   :  { %660 = vmatprep.subr.bf16.mxu1 %v765_v0  ;;  %231 = vmatprep.subr.bf16.mxu0 %v715_v14  ;;  %v756_v47 = vld [vmem:[%s987_s2 + $0x90] ss:$12 sps:$4 sm:$0xff]   ;;  %v762_v48 = vld [vmem:[%s987_s2 + $0xac] ss:$12 sps:$4 sm:$0xff]   ;;  %v760_v50 = vld [vmem:[%s987_s2 + $0xa8] ss:$12 sps:$4 sm:$0xff]  }
  0x11   :  { %v763_v49 = vld [vmem:[%s987_s2 + $0xb0] ss:$12 sps:$4 sm:$0xff]   ;;  %v764_v51 = vld [vmem:[%s988_s0] sm:$0xff]   ;;  %v529_v58 = vsub.s32 0, %v528_v57  ;;  %v537_v60 = vsub.s32 2, %v528_v57  ;;  %v533_v61 = vsub.s32 1, %v528_v57 }
  0x12   :  { %v525_v59 = vld [vmem:[%s989_s4] sm:$0x7] }
  0x13   :  { %661 = vmatpush3.bf16.msra.mxu1 %v717_v15  ;;  %232 = vmatpush1.bf16.msra.mxu0 %v718_v16  ;;  %v530_v62 = vrot.slane %v525_v59, %v529_v58  ;;  %v538_v63 = vrot.slane %v525_v59, %v537_v60 }
  0x14   :  { %662 = vmatprep.subr.bf16.mxu1 %v765_v0  ;;  %233 = vmatprep.subr.bf16.mxu0 %v719_v17 }
  0x17   :  { %663 = vmatpush3.bf16.msra.mxu1 %v721_v18  ;;  %234 = vmatpush1.bf16.msra.mxu0 %v722_v19 }
  0x18   :  { %664 = vmatprep.subr.bf16.mxu1 %v765_v0  ;;  %235 = vmatprep.subr.bf16.mxu0 %v723_v20 }
  0x1b   :  { %665 = vmatpush3.bf16.msra.mxu1 %v725_v21  ;;  %236 = vmatpush1.bf16.msra.mxu0 %v726_v22 }
  0x1c   :  { %666 = vmatprep.subr.bf16.mxu1 %v765_v0  ;;  %237 = vmatprep.subr.bf16.mxu0 %v727_v23 }
  0x1f   :  { %667 = vmatpush3.bf16.msra.mxu1 %v729_v24  ;;  %238 = vmatpush1.bf16.msra.mxu0 %v730_v25 }
  0x20   :  { %672 = vmatprep.subr.bf16.mxu1 %v765_v0  ;;  %441 = vmatprep.subr.bf16.mxu0 %v734_v26 }
  0x22   :  { %669 = vmatmul.mubr.bf16.vlgmr.msra.gmra.mrb[0].mxu1 %v731_v27  ;;  %256 = vmatmul.mubr.bf16.vlgmr.msra.gmra.mrb[0].mxu0 %v731_v27 }
  0x23   :  { %673 = vmatpush3.bf16.msra.mxu1 %v735_v28  ;;  %442 = vmatpush1.bf16.msra.mxu0 %v732_v29 }
  0x24   :  { %674 = vmatprep.subr.bf16.mxu1 %v765_v0  ;;  %443 = vmatprep.subr.bf16.mxu0 %v738_v30 }
  0x25   :  { %688 = vmatprep.mubr.msk.bf16.mxu1 %vm766_vm0, %v765_v0  ;;  %473 = vmatprep.mubr.bf16.mxu0 %v767_v3 }
  0x27   :  { %675 = vmatpush3.bf16.msra.mxu1 %v739_v31  ;;  %444 = vmatpush1.bf16.msra.mxu0 %v736_v32 }
  0x28   :  { %676 = vmatprep.subr.bf16.mxu1 %v765_v0  ;;  %445 = vmatprep.subr.bf16.mxu0 %v742_v33 }
  0x2b   :  { %677 = vmatpush3.bf16.msra.mxu1 %v743_v34  ;;  %446 = vmatpush1.bf16.msra.mxu0 %v740_v35 }
  0x2c   :  { %678 = vmatprep.subr.bf16.mxu1 %v765_v0  ;;  %447 = vmatprep.subr.bf16.mxu0 %v746_v36 }
  0x2f   :  { %679 = vmatpush3.bf16.msra.mxu1 %v747_v37  ;;  %448 = vmatpush1.bf16.msra.mxu0 %v744_v38 }
  0x30   :  { %680 = vmatprep.subr.bf16.mxu1 %v765_v0  ;;  %449 = vmatprep.subr.bf16.mxu0 %v750_v39 }
  0x33   :  { %681 = vmatpush3.bf16.msra.mxu1 %v751_v40  ;;  %450 = vmatpush1.bf16.msra.mxu0 %v748_v41 }
  0x34   :  { %682 = vmatprep.subr.bf16.mxu1 %v765_v0  ;;  %451 = vmatprep.subr.bf16.mxu0 %v754_v42 }
  0x37   :  { %683 = vmatpush3.bf16.msra.mxu1 %v755_v43  ;;  %452 = vmatpush1.bf16.msra.mxu0 %v752_v44 }
  0x38   :  { %684 = vmatprep.subr.bf16.mxu1 %v765_v0  ;;  %453 = vmatprep.subr.bf16.mxu0 %v758_v45 }
  0x3b   :  { %685 = vmatpush3.bf16.msra.mxu1 %v759_v46  ;;  %454 = vmatpush1.bf16.msra.mxu0 %v756_v47 }
  0x3c   :  { %686 = vmatprep.subr.bf16.mxu1 %v765_v0  ;;  %455 = vmatprep.subr.bf16.mxu0 %v762_v48  ;;  %v534_v0 = vrot.slane %v525_v59, %v533_v61 }
  0x3f   :  { %687 = vmatpush3.bf16.msra.mxu1 %v763_v49  ;;  %456 = vmatpush1.bf16.msra.mxu0 %v760_v50 }
  0x42   :  { %689 = vmatmul.mubr.bf16.vlgmr.msra.gmra.mrb[4].mxu1 %v764_v51  ;;  %474 = vmatmul.mubr.bf16.vlgmr.msra.gmra.mrb[0].mxu0 %v764_v51 }
  0xf5   :  { %v300_v52 = vpop.f32.mrb[0].mxu1 }
  0xf6   :  { %v670_v53 = vpop.f32.mrb[1].mxu1 }
  0xf7   :  { %v303_v54 = vpop.f32.mrb[2].mxu1 }
  0xf8   :  { %v671_v55 = vpop.f32.mrb[3].mxu1 }
 0x115   :  { %v518_v1 = vpop.f32.mrb[4].mxu1  ;;  %v475_v3 = vpop.f32.mrb[0].mxu0 }
 0x116   :  { %v519_v2 = vadd.f32 %v518_v1, %v300_v52  ;;  %v690_v4 = vpop.f32.mrb[5].mxu1  ;;  %v542_v5 = vadd.f32 %v530_v62, %v475_v3  ;;  %v477_v6 = vpop.f32.mrb[1].mxu0 }
 0x117   :  { %v521_v7 = vpop.f32.mrb[6].mxu1  ;;  %v543_v9 = vadd.f32 %v534_v0, %v477_v6  ;;  %v479_v11 = vpop.f32.mrb[2].mxu0 }
 0x118   :  { %v544_v8 = vadd.f32 %v538_v63, %v519_v2  ;;  %v522_v10 = vadd.f32 %v521_v7, %v303_v54  ;;  %v691_v12 = vpop.f32.mrb[7].mxu1  ;;  %v545_v13 = vadd.f32 %v530_v62, %v479_v11  ;;  %v481_v14 = vpop.f32.mrb[3].mxu0 }
 0x119   :  { %v630_v16 = vpack.c.bf16 %v543_v9, %v542_v5  ;;  %v546_v18 = vadd.f32 %v534_v0, %v481_v14 }
 0x11a   :  { %v631_v15 = vpack.c.bf16 %v544_v8, %v544_v8  ;;  %v547_v17 = vadd.f32 %v538_v63, %v522_v10 }
 0x11b   :  { %568 = vst [vmem:[%s990_s5] sm:$0xff] %v630_v16  ;;  %v632_v20 = vpack.c.bf16 %v546_v18, %v545_v13 }
 0x11c   :  { %569 = vst [vmem:[%s990_s5 + $0x8] sm:$0xf] %v631_v15  ;;  %v633_v19 = vpack.c.bf16 %v547_v17, %v547_v17 }
 0x11d   :  { %570 = vst [vmem:[%s990_s5 + $0xc] sm:$0xff] %v632_v20 }
 0x11e   :  { %571 = vst [vmem:[%s990_s5 + $0x14] sm:$0xf] %v633_v19 }

// kernel: decoder_layer_forward.9
= control target key start
LH: loop header
LB: loop body
LE: loop exit
PB: predicated region body
PF: predicated region fallthrough
CT: control target
= control target key end

     0   :  { %10 = vsyncpa [#allocation3], 0  ;;  %s1118_s0 = inlined_call_operand.vmem [shape: bf16[32,128], index: 0, kind: input, shape index: {}]   ;;  %s1119_s1 = inlined_call_operand.vmem [shape: bf16[32,128], index: 1, kind: input, shape index: {}]   ;;  %s1120_s2 = inlined_call_operand.vmem [shape: bf16[128,384], index: 2, kind: input, shape index: {}]   ;;  %s1121_s3 = inlined_call_operand.hbm [shape: bf16[128,384], index: 3, kind: input, shape index: {}]   ;;  %s1122_s4 = inlined_call_operand.hbm [shape: f32[1,384], index: 4, kind: input, shape index: {}]   ;;  %s1123_s5 = inlined_call_operand.vmem [shape: bf16[32,384], index: 5, kind: output, shape index: {}]  }
   0x1   :  { %11 = vsyncpa [#allocation5], 0  ;;  %s947_s18 = smov [#allocation2]   ;;  %s899_s22 = scalar_lea.hbm %s1121_s3, 3072 }
   0x2   :  { %s23_s19 = sshll.u32 %s947_s18, 4  ;;  %p900_p0 = scmp.ne.s32.totalorder %s1121_s3, %s899_s22  ;;  %s24_s19 = int_to_ptr.vmem [resolvable:$true] %s23_s19 }
   0x3   :  { %p903_p1 = scmp.lt.u32.totalorder %s899_s22, %s1121_s3 }
   0x5   :  { %p905_p2 = pnand %p903_p1, %p900_p0 }
   0x7   :  { %908 = shalt.err (!%p905_p2)
}
   0x8   :  { %s909_s27 = scalar_lea.vmem %s24_s19, 3072  ;;  %p914_p4 = scmp.lt.s32.totalorder %s24_s19, %s24_s19 }
   0x9   :  { %p910_p3 = scmp.ne.s32.totalorder %s24_s19, %s909_s27  ;;  %p915_p5 = scmp.lt.s32.totalorder %s909_s27, %s909_s27 }
   0xb   :  { %p916_p6 = por %p915_p5, %p914_p4 }
   0xd   :  { %p917_p7 = pnand %p916_p6, %p910_p3 }
   0xf   :  { %920 = shalt.err (!%p917_p7)
}
  0x10   :  { %s948_s28 = smov 192   ;;  %s949_s29 = smov 12  }
  0x11   :  { %29 = dma.hbm_to_vmem [thread:$0]  %s1121_s3, 3072, %s24_s19, [#allocation3], %s948_s28, %s948_s28, %s949_s29  }
  0x12   :  { %s950_s7 = smov [#allocation4]   ;;  %s921_s11 = scalar_lea.hbm %s1122_s4, 48 }
  0x13   :  { %s36_s8 = sshll.u32 %s950_s7, 4  ;;  %p922_p8 = scmp.ne.s32.totalorder %s1122_s4, %s921_s11  ;;  %s37_s8 = int_to_ptr.vmem [resolvable:$true] %s36_s8 }
  0x14   :  { %p925_p9 = scmp.lt.u32.totalorder %s921_s11, %s1122_s4 }
  0x16   :  { %p927_p10 = pnand %p925_p9, %p922_p8 }
  0x18   :  { %930 = shalt.err (!%p927_p10)
}
  0x19   :  { %s931_s16 = scalar_lea.vmem %s37_s8, 48  ;;  %s935_s3 = scalar_lea.vmem %s37_s8, 64 }
  0x1a   :  { %p932_p11 = scmp.ne.s32.totalorder %s37_s8, %s931_s16  ;;  %p936_p12 = scmp.lt.s32.totalorder %s37_s8, %s37_s8 }
  0x1b   :  { %p937_p13 = scmp.lt.s32.totalorder %s935_s3, %s931_s16 }
  0x1d   :  { %p938_p0 = por %p937_p13, %p936_p12 }
  0x1f   :  { %p939_p1 = pnand %p938_p0, %p932_p11 }
  0x21   :  { %942 = shalt.err (!%p939_p1)
}
  0x22   :  { %39 = dma.hbm_to_vmem [thread:$0]  %s1122_s4, 48, %s37_s8, [#allocation5]  }
  0x23   :  { %943 = dma.done.wait [#allocation3], 3072  }
  0x24   :  { %944 = vsyncadd [#allocation3], 4294964224 }
  0x25   :  { %945 = dma.done.wait [#allocation5], 48  }
  0x26   :  { %946 = vsyncadd [#allocation5], 4294967248  ;;  %v951_v0 = vmov 0   ;;  %v831_v1 = vld [vmem:[#allocation2 + $0x4] ss:$12 sps:$4 sm:$0xff]   ;;  %v868_v28 = vld [vmem:[%s1119_s1 + $0x8] sm:$0xff]   ;;  %v605_v53 = vlaneseq }
  0x27   :  { %291 = vmatprep.mubr.bf16.mxu0 %v951_v0  ;;  %v833_v2 = vld [vmem:[#allocation2 + $0x8] ss:$12 sps:$4 sm:$0xff]   ;;  %259 = vmatprep.subr.bf16.mxu0 %v831_v1  ;;  %v834_v3 = vld [vmem:[#allocation2] ss:$12 sps:$4 sm:$0xff]   ;;  %v838_v6 = vld [vmem:[#allocation2 + $0x18] ss:$12 sps:$4 sm:$0xff]  }
  0x28   :  { %774 = vmatprep.subr.bf16.mxu1 %v833_v2  ;;  %v835_v4 = vld [vmem:[#allocation2 + $0x1c] ss:$12 sps:$4 sm:$0xff]   ;;  %260 = vmatpush1.bf16.msra.mxu0 %v834_v3  ;;  %v837_v5 = vld [vmem:[#allocation2 + $0x20] ss:$12 sps:$4 sm:$0xff]   ;;  %v841_v8 = vld [vmem:[#allocation2 + $0x38] ss:$12 sps:$4 sm:$0xff]  }
  0x29   :  { %775 = vmatpush3.bf16.msra.mxu1 %v833_v2  ;;  %261 = vmatprep.subr.bf16.mxu0 %v835_v4  ;;  %v839_v7 = vld [vmem:[#allocation2 + $0x34] ss:$12 sps:$4 sm:$0xff]   ;;  %v842_v9 = vld [vmem:[#allocation2 + $0x30] ss:$12 sps:$4 sm:$0xff]   ;;  %v843_v10 = vld [vmem:[#allocation2 + $0x4c] ss:$12 sps:$4 sm:$0xff]  }
  0x2a   :  { %776 = vmatprep.subr.bf16.mxu1 %v837_v5  ;;  %v845_v11 = vld [vmem:[#allocation2 + $0x50] ss:$12 sps:$4 sm:$0xff]   ;;  %v846_v12 = vld [vmem:[#allocation2 + $0x48] ss:$12 sps:$4 sm:$0xff]   ;;  %v850_v15 = vld [vmem:[#allocation2 + $0x60] ss:$12 sps:$4 sm:$0xff]  }
  0x2b   :  { %v847_v13 = vld [vmem:[#allocation2 + $0x64] ss:$12 sps:$4 sm:$0xff]   ;;  %v849_v14 = vld [vmem:[#allocation2 + $0x68] ss:$12 sps:$4 sm:$0xff]   ;;  %v853_v17 = vld [vmem:[#allocation2 + $0x80] ss:$12 sps:$4 sm:$0xff]  }
  0x2c   :  { %262 = vmatpush1.bf16.msra.mxu0 %v838_v6  ;;  %v851_v16 = vld [vmem:[#allocation2 + $0x7c] ss:$12 sps:$4 sm:$0xff]   ;;  %v863_v18 = vld [vmem:[%s1119_s1] sm:$0xff]   ;;  %v859_v23 = vld [vmem:[#allocation2 + $0xac] ss:$12 sps:$4 sm:$0xff]   ;;  %v606_v54 = vshrl.u32 %v605_v53, 7 }
  0x2d   :  { %777 = vmatpush3.bf16.msra.mxu1 %v837_v5  ;;  %263 = vmatprep.subr.bf16.mxu0 %v839_v7  ;;  %v854_v19 = vld [vmem:[#allocation2 + $0x78] ss:$12 sps:$4 sm:$0xff]   ;;  %v855_v20 = vld [vmem:[#allocation2 + $0x94] ss:$12 sps:$4 sm:$0xff]   ;;  %v858_v22 = vld [vmem:[#allocation2 + $0x90] ss:$12 sps:$4 sm:$0xff]  }
  0x2e   :  { %778 = vmatprep.subr.bf16.mxu1 %v841_v8  ;;  %v857_v21 = vld [vmem:[#allocation2 + $0x98] ss:$12 sps:$4 sm:$0xff]   ;;  %790 = vmatprep.mubr.bf16.mxu1 %v863_v18  ;;  %v861_v24 = vld [vmem:[#allocation2 + $0xb0] ss:$12 sps:$4 sm:$0xff]   ;;  %v862_v25 = vld [vmem:[#allocation2 + $0xa8] ss:$12 sps:$4 sm:$0xff]  }
  0x2f   :  { %v866_v26 = vld [vmem:[%s1120_s2 + $0x4] ss:$12 sps:$4 sm:$0xff]   ;;  %v867_v27 = vld [vmem:[%s1120_s2 + $0x8] ss:$12 sps:$4 sm:$0xff]   ;;  %v864_v29 = vld [vmem:[%s1120_s2] ss:$12 sps:$4 sm:$0xff]  }
  0x30   :  { %264 = vmatpush1.bf16.msra.mxu0 %v842_v9  ;;  %v871_v30 = vld [vmem:[%s1120_s2 + $0x1c] ss:$12 sps:$4 sm:$0xff]   ;;  %v872_v31 = vld [vmem:[%s1120_s2 + $0x20] ss:$12 sps:$4 sm:$0xff]   ;;  %v869_v32 = vld [vmem:[%s1120_s2 + $0x18] ss:$12 sps:$4 sm:$0xff]  }
  0x31   :  { %779 = vmatpush3.bf16.msra.mxu1 %v841_v8  ;;  %265 = vmatprep.subr.bf16.mxu0 %v843_v10  ;;  %v875_v33 = vld [vmem:[%s1120_s2 + $0x34] ss:$12 sps:$4 sm:$0xff]   ;;  %v876_v34 = vld [vmem:[%s1120_s2 + $0x38] ss:$12 sps:$4 sm:$0xff]   ;;  %v873_v35 = vld [vmem:[%s1120_s2 + $0x30] ss:$12 sps:$4 sm:$0xff]  }
  0x32   :  { %780 = vmatprep.subr.bf16.mxu1 %v845_v11  ;;  %v897_v36 = vld [vmem:[%s1118_s0] sm:$0xff]   ;;  %v879_v37 = vld [vmem:[%s1120_s2 + $0x4c] ss:$12 sps:$4 sm:$0xff]   ;;  %v880_v38 = vld [vmem:[%s1120_s2 + $0x50] ss:$12 sps:$4 sm:$0xff]   ;;  %v607_v55 = vsub.s32 0, %v606_v54 }
  0x33   :  { %v877_v39 = vld [vmem:[%s1120_s2 + $0x48] ss:$12 sps:$4 sm:$0xff]   ;;  %v883_v40 = vld [vmem:[%s1120_s2 + $0x64] ss:$12 sps:$4 sm:$0xff]   ;;  %v881_v42 = vld [vmem:[%s1120_s2 + $0x60] ss:$12 sps:$4 sm:$0xff]  }
  0x34   :  { %266 = vmatpush1.bf16.msra.mxu0 %v846_v12  ;;  %v884_v41 = vld [vmem:[%s1120_s2 + $0x68] ss:$12 sps:$4 sm:$0xff]   ;;  %v888_v44 = vld [vmem:[%s1120_s2 + $0x80] ss:$12 sps:$4 sm:$0xff]   ;;  %v885_v45 = vld [vmem:[%s1120_s2 + $0x78] ss:$12 sps:$4 sm:$0xff]  }
  0x35   :  { %781 = vmatpush3.bf16.msra.mxu1 %v845_v11  ;;  %267 = vmatprep.subr.bf16.mxu0 %v847_v13  ;;  %v887_v43 = vld [vmem:[%s1120_s2 + $0x7c] ss:$12 sps:$4 sm:$0xff]   ;;  %v891_v46 = vld [vmem:[%s1120_s2 + $0x94] ss:$12 sps:$4 sm:$0xff]   ;;  %v892_v47 = vld [vmem:[%s1120_s2 + $0x98] ss:$12 sps:$4 sm:$0xff]  }
  0x36   :  { %782 = vmatprep.subr.bf16.mxu1 %v849_v14  ;;  %v889_v48 = vld [vmem:[%s1120_s2 + $0x90] ss:$12 sps:$4 sm:$0xff]   ;;  %v895_v49 = vld [vmem:[%s1120_s2 + $0xac] ss:$12 sps:$4 sm:$0xff]   ;;  %v893_v51 = vld [vmem:[%s1120_s2 + $0xa8] ss:$12 sps:$4 sm:$0xff]  }
  0x37   :  { %v896_v50 = vld [vmem:[%s1120_s2 + $0xb0] ss:$12 sps:$4 sm:$0xff]   ;;  %v898_v52 = vld [vmem:[%s1118_s0 + $0x8] sm:$0xff]   ;;  %v615_v56 = vsub.s32 2, %v606_v54  ;;  %v603_v57 = vld [vmem:[#allocation4] sm:$0x7] }
  0x38   :  { %268 = vmatpush1.bf16.msra.mxu0 %v850_v15  ;;  %v611_v58 = vsub.s32 1, %v606_v54  ;;  %v608_v59 = vrot.slane %v603_v57, %v607_v55 }
  0x39   :  { %783 = vmatpush3.bf16.msra.mxu1 %v849_v14  ;;  %269 = vmatprep.subr.bf16.mxu0 %v851_v16  ;;  %v616_v60 = vrot.slane %v603_v57, %v615_v56 }
  0x3a   :  { %784 = vmatprep.subr.bf16.mxu1 %v853_v17  ;;  %v612_v61 = vrot.slane %v603_v57, %v611_v58 }
  0x3c   :  { %270 = vmatpush1.bf16.msra.mxu0 %v854_v19 }
  0x3d   :  { %785 = vmatpush3.bf16.msra.mxu1 %v853_v17  ;;  %271 = vmatprep.subr.bf16.mxu0 %v855_v20 }
  0x3e   :  { %786 = vmatprep.subr.bf16.mxu1 %v857_v21 }
  0x40   :  { %272 = vmatpush1.bf16.msra.mxu0 %v858_v22 }
  0x41   :  { %787 = vmatpush3.bf16.msra.mxu1 %v857_v21  ;;  %273 = vmatprep.subr.bf16.mxu0 %v859_v23 }
  0x42   :  { %788 = vmatprep.subr.bf16.mxu1 %v861_v24 }
  0x44   :  { %274 = vmatpush1.bf16.msra.mxu0 %v862_v25 }
  0x45   :  { %789 = vmatpush3.bf16.msra.mxu1 %v861_v24  ;;  %501 = vmatprep.subr.bf16.mxu0 %v866_v26 }
  0x46   :  { %794 = vmatprep.subr.bf16.mxu1 %v867_v27 }
  0x47   :  { %292 = vmatmul.mubr.bf16.vlgmr.msra.gmra.mrb[0].mxu0 %v863_v18 }
  0x48   :  { %791 = vmatmul.mubr.bf16.vlgmr.msra.gmra.mrb[0].mxu1 %v868_v28  ;;  %502 = vmatpush1.bf16.msra.mxu0 %v864_v29 }
  0x49   :  { %795 = vmatpush3.bf16.msra.mxu1 %v867_v27  ;;  %503 = vmatprep.subr.bf16.mxu0 %v871_v30 }
  0x4a   :  { %796 = vmatprep.subr.bf16.mxu1 %v872_v31  ;;  %301 = vmatprep.mubr.bf16.mxu0 %v951_v0 }
  0x4b   :  { %810 = vmatprep.mubr.bf16.mxu1 %v897_v36 }
  0x4c   :  { %504 = vmatpush1.bf16.msra.mxu0 %v869_v32 }
  0x4d   :  { %797 = vmatpush3.bf16.msra.mxu1 %v872_v31  ;;  %505 = vmatprep.subr.bf16.mxu0 %v875_v33 }
  0x4e   :  { %798 = vmatprep.subr.bf16.mxu1 %v876_v34 }
  0x4f   :  { %302 = vmatmul.mubr.bf16.gmra.mrb[4].mxu0 %v868_v28 }
  0x50   :  { %506 = vmatpush1.bf16.msra.mxu0 %v873_v35  ;;  %533 = vmatprep.mubr.bf16.mxu0 %v951_v0 }
  0x51   :  { %799 = vmatpush3.bf16.msra.mxu1 %v876_v34  ;;  %507 = vmatprep.subr.bf16.mxu0 %v879_v37 }
  0x52   :  { %800 = vmatprep.subr.bf16.mxu1 %v880_v38 }
  0x54   :  { %508 = vmatpush1.bf16.msra.mxu0 %v877_v39 }
  0x55   :  { %801 = vmatpush3.bf16.msra.mxu1 %v880_v38  ;;  %509 = vmatprep.subr.bf16.mxu0 %v883_v40 }
  0x56   :  { %802 = vmatprep.subr.bf16.mxu1 %v884_v41 }
  0x58   :  { %510 = vmatpush1.bf16.msra.mxu0 %v881_v42 }
  0x59   :  { %803 = vmatpush3.bf16.msra.mxu1 %v884_v41  ;;  %511 = vmatprep.subr.bf16.mxu0 %v887_v43 }
  0x5a   :  { %804 = vmatprep.subr.bf16.mxu1 %v888_v44 }
  0x5c   :  { %512 = vmatpush1.bf16.msra.mxu0 %v885_v45 }
  0x5d   :  { %805 = vmatpush3.bf16.msra.mxu1 %v888_v44  ;;  %513 = vmatprep.subr.bf16.mxu0 %v891_v46 }
  0x5e   :  { %806 = vmatprep.subr.bf16.mxu1 %v892_v47 }
  0x60   :  { %514 = vmatpush1.bf16.msra.mxu0 %v889_v48 }
  0x61   :  { %807 = vmatpush3.bf16.msra.mxu1 %v892_v47  ;;  %515 = vmatprep.subr.bf16.mxu0 %v895_v49 }
  0x62   :  { %808 = vmatprep.subr.bf16.mxu1 %v896_v50 }
  0x64   :  { %516 = vmatpush1.bf16.msra.mxu0 %v893_v51 }
  0x65   :  { %809 = vmatpush3.bf16.msra.mxu1 %v896_v50 }
  0x67   :  { %534 = vmatmul.mubr.bf16.vlgmr.msra.gmra.mrb[0].mxu0 %v897_v36 }
  0x68   :  { %811 = vmatmul.mubr.bf16.vlgmr.msra.gmra.mrb[0].mxu1 %v898_v52  ;;  %543 = vmatprep.mubr.bf16.mxu0 %v951_v0 }
  0x6f   :  { %544 = vmatmul.mubr.bf16.gmra.mrb[4].mxu0 %v898_v52 }
 0x13a   :  { %v535_v62 = vpop.f32.mrb[0].mxu0 }
 0x13b   :  { %v812_v63 = vpop.f32.mrb[0].mxu1  ;;  %v620_v1 = vadd.f32 %v608_v59, %v535_v62  ;;  %v537_v3 = vpop.f32.mrb[1].mxu0 }
 0x13c   :  { %v628_v2 = vadd.f32 %v812_v63, %v616_v60  ;;  %v588_v4 = vpop.f32.mrb[1].mxu1  ;;  %v621_v5 = vadd.f32 %v612_v61, %v537_v3  ;;  %v539_v7 = vpop.f32.mrb[2].mxu0 }
 0x13d   :  { %v622_v6 = vadd.f32 %v616_v60, %v588_v4  ;;  %v813_v0 = vpop.f32.mrb[2].mxu1  ;;  %v623_v9 = vadd.f32 %v608_v59, %v539_v7  ;;  %v541_v11 = vpop.f32.mrb[3].mxu0 }
 0x13e   :  { %v751_v8 = vpack.c.bf16 %v628_v2, %v628_v2  ;;  %v631_v10 = vadd.f32 %v813_v0, %v616_v60  ;;  %v591_v12 = vpop.f32.mrb[3].mxu1  ;;  %v746_v13 = vpack.c.bf16 %v621_v5, %v620_v1  ;;  %v624_v15 = vadd.f32 %v612_v61, %v541_v11 }
 0x13f   :  { %v747_v14 = vpack.c.bf16 %v622_v6, %v622_v6  ;;  %v625_v16 = vadd.f32 %v616_v60, %v591_v12 }
 0x140   :  { %677 = vst [vmem:[%s1123_s5 + $0x20] sm:$0xf] %v751_v8  ;;  %v753_v17 = vpack.c.bf16 %v631_v10, %v631_v10  ;;  %672 = vst [vmem:[%s1123_s5] sm:$0xff] %v746_v13  ;;  %v748_v18 = vpack.c.bf16 %v624_v15, %v623_v9 }
 0x141   :  { %673 = vst [vmem:[%s1123_s5 + $0x8] sm:$0xf] %v747_v14  ;;  %v749_v19 = vpack.c.bf16 %v625_v16, %v625_v16 }
 0x142   :  { %679 = vst [vmem:[%s1123_s5 + $0x2c] sm:$0xf] %v753_v17  ;;  %674 = vst [vmem:[%s1123_s5 + $0xc] sm:$0xff] %v748_v18  ;;  %v545_v20 = vpop.f32.mrb[4].mxu0 }
 0x143   :  { %675 = vst [vmem:[%s1123_s5 + $0x14] sm:$0xf] %v749_v19  ;;  %v626_v21 = vadd.f32 %v608_v59, %v545_v20  ;;  %v547_v22 = vpop.f32.mrb[5].mxu0 }
 0x144   :  { %v627_v23 = vadd.f32 %v612_v61, %v547_v22  ;;  %v549_v24 = vpop.f32.mrb[6].mxu0 }
 0x145   :  { %v629_v25 = vadd.f32 %v608_v59, %v549_v24  ;;  %v551_v26 = vpop.f32.mrb[7].mxu0 }
 0x146   :  { %v750_v27 = vpack.c.bf16 %v627_v23, %v626_v21  ;;  %v630_v28 = vadd.f32 %v612_v61, %v551_v26 }
 0x148   :  { %676 = vst [vmem:[%s1123_s5 + $0x18] sm:$0xff] %v750_v27  ;;  %v752_v29 = vpack.c.bf16 %v630_v28, %v629_v25 }
 0x14a   :  { %678 = vst [vmem:[%s1123_s5 + $0x24] sm:$0xff] %v752_v29 }
 0x14b   :  { %684 = vsyncpa [#allocation3], 1 }
 0x14c   :  { %685 = vsyncpa [#allocation5], 1 }

// kernel: decoder_layer_forward.7
= control target key start
LH: loop header
LB: loop body
LE: loop exit
PB: predicated region body
PF: predicated region fallthrough
CT: control target
= control target key end

     0   :  { %s1557_s27 = smov 0   ;;  %s1559_s28 = smov 0   ;;  %s1733_s0 = inlined_call_operand.vmem [shape: bf16[2,8,384], index: 0, kind: input, shape index: {}, may-alias: {0,1,2}]   ;;  %s1734_s1 = inlined_call_operand.vmem [shape: bf16[2,8,384], index: 1, kind: input, shape index: {}, may-alias: {0,1,2}]   ;;  %s1735_s2 = inlined_call_operand.vmem [shape: bf16[2,8,384], index: 2, kind: input, shape index: {}, may-alias: {0,1,2}]   ;;  %s1736_s3 = inlined_call_operand.vmem [shape: bf16[2,8,128], index: 3, kind: input, shape index: {}]   ;;  %s1737_s4 = inlined_call_operand.vmem [shape: bf16[128,128], index: 4, kind: input, shape index: {}]   ;;  %s1738_s5 = inlined_call_operand.vmem [shape: f32[1,128], index: 5, kind: input, shape index: {}]   ;;  %s1739_s6 = inlined_call_operand.vmem [shape: f32[1,128], index: 6, kind: input, shape index: {}]   ;;  %s1740_s7 = inlined_call_operand.vmem [shape: f32[1,128], index: 7, kind: input, shape index: {}]   ;;  %s1741_s8 = inlined_call_operand.vmem [shape: bf16[2,8,128], index: 8, kind: output, shape index: {}]  }
   0x1   :  { %s1561_s29 = smov 0  }
   0x2 LB: > { %s30_s30 = sadd.s32 1, %s1501_s28  ;;  %p1280_p0 = scmp.ge.s32.totalorder %s1505_s29, 1  ;;  %s1505_s29 = sphi %s1561_s29, %s18_s29   ;;  %s1501_s28 = sphi %s1559_s28, %s1743_s28   ;;  %s1497_s27 = sphi %s1557_s27, %s1742_s27  }
   0x3   : > { %p32_p1 = scmp.ge.s32.totalorder %s30_s30, 2  ;;  %p318_p2 = scmp.lt.s32.totalorder %s1505_s29, 3 }
   0x5   : > { %s1745_s30 = smov (%p32_p1, %s30_s30), 0  ;;  %p319_p3 = pnand %p1280_p0, %p318_p2 }
   0x6   : > { %p377_p4 = scmp.lt.s32.totalorder (!%p319_p3), %s1497_s27, 1  ;;  %v1507_v0 = vmov (!%p319_p3), 0.0   ;;  %vm1508_vm0 = vmmov (!%p319_p3), 0   ;;  %vm416_vm1 = vcmask (!%p319_p3), 261120   ;;  %vm463_vm2 = vcmask (!%p319_p3), 64512   ;;  %s1509_s16 = smov (!%p319_p3), 96  }
   0x7   : > { %322 = sbr.rel (%p319_p3) target bundleno = 3123 (0xc33), region = 52  ;;  %1344 = vmatprep.subr.bf16.mxu0 (!%p319_p3), %v1507_v0  ;;  %1346 = vmatprep.mubr.msk.bf16.mxu0 (!%p319_p3), %vm1508_vm0, %v1507_v0  ;;  %vm479_vm3 = vcmask (!%p319_p3), 1043456   ;;  %v1459_v42 = vld [vmem:[%s1737_s4 + $0x10] sm:$0xff] (!%p319_p3)   ;;  %s1510_s22 = smov (!%p319_p3), 64   ;;  %v1460_v43 = vld [vmem:[%s1737_s4 + $0x18] sm:$0xff] (!%p319_p3)   ;;  %v1457_v47 = vld [vmem:[%s1737_s4] sm:$0xff] (!%p319_p3)  }
   0x8   : > { %1350 = vmatprep.subr.bf16.mxu1 (!%p319_p3), %v1507_v0  ;;  %1352 = vmatprep.mubr.msk.bf16.mxu1 (!%p319_p3), %vm1508_vm0, %v1507_v0  ;;  %v1458_v49 = vld [vmem:[%s1737_s4 + $0x8] sm:$0xff] (!%p319_p3)   ;;  %s1511_s11 = smov (!%p319_p3), 32  }
   0xe   : > { %s1747_s27 = smov (!%p377_p4, %s1497_s27), 1 }
   0xf   : > { %s1584_s9 = smul.u32 12, %s1747_s27  ;;  %s1284_s20 = sshll.u32 %s1747_s27, 2 }
  0x10   : > { %s404_s23 = scalar_lea.vmem %s1736_s3, %s1284_s20  ;;  %s411_s13 = scalar_lea.vmem %s1741_s8, %s1284_s20 }
  0x11   : > { %s1212_s12 = scalar_lea.vmem %s1734_s1, %s1584_s9  ;;  %s385_s15 = scalar_lea.vmem %s1733_s0, %s1584_s9 }
  0x12   : > { %v1286_v1 = vld [vmem:[%s1212_s12 + $0x4] sm:$0xf]  ;;  %v413_v3 = vld [vmem:[%s385_s15] sm:$0xf]  ;;  %s1216_s19 = scalar_lea.vmem %s1735_s2, %s1584_s9 }
  0x13   : > { %v421_v2 = vsel %vm416_vm1, %v1286_v1, 0  ;;  %v1600_v9 = vcombine.low %v1286_v1, %v1286_v1  ;;  %v1604_v10 = vcombine.low %v413_v3, %v413_v3  ;;  %v1287_v16 = vld [vmem:[%s1216_s19 + $0x8] sm:$0xf] }
  0x14   : > { %1345 = vmatpush3.bf16.xpose.msra.mxu0 %v421_v2  ;;  %v481_v17 = vsel %vm479_vm3, %v1287_v16, 0  ;;  %v1624_v34 = vcombine.low %v1287_v16, %v1287_v16 }
  0x15   : > { %1362 = vmatprep.subr.bf16.mxu0 %v1507_v0  ;;  %536 = vrot.lane.b32.xlu1 %v1600_v9, %s1509_s16 }
  0x16   : > { %1351 = vmatpush3.bf16.msra.mxu1 %v481_v17 }
  0x17   : > { %1356 = vmatprep.subr.bf16.mxu1 %v1507_v0 }
  0x19   : > { %531 = vrot.lane.b32.xlu1 %v1604_v10, %s1509_s16 }
  0x1b   : > { %1347 = vmatmul.mubr.msk.bf16.vlgmr.msra.gmra.mrb[0].mxu0 %vm416_vm1, %v413_v3 }
  0x1c   : > { %1364 = vmatprep.mubr.msk.bf16.mxu0 %vm1508_vm0, %v1507_v0 }
  0x87   : > { %v537_v20 = vpop.permute.xlu1 %536 }
  0x88   : > { %v542_v22 = vsel %vm416_vm1, %v537_v20, 0 }
  0x8b   : > { %v532_v24 = vpop.permute.xlu1 %531 }
  0xee   : > { %v457_v4 = vpop.f32.mrb[0].mxu0 }
  0xef   : > { %v1348_v5 = vpop.f32.mrb[1].mxu0  ;;  %v464_v6 = vsel %vm463_vm2, %v457_v4, -inf }
  0xf0   : > { %465 = vmax.xlane.f32.xlu0 %v464_v6  ;;  %v460_v7 = vpop.f32.mrb[2].mxu0 }
  0xf1   : > { %v1349_v8 = vpop.f32.mrb[3].mxu0 }
 0x17d   : > { %v466_v11 = vpop.xlane.xlu0 %465 }
 0x17e   : > { %v467_v12 = vsub.f32 %v457_v4, %v466_v11 }
 0x180   : > { %v468_v13 = vmul.f32 1.442695, %v467_v12 }
 0x182   : > { %1465 = vpow2.f32 %v468_v13 }
 0x18c   : > { %v1466_v14 = vpop.eup %1465 }
 0x18d   : > { %v470_v15 = vsel %vm463_vm2, %v1466_v14, 0.0 }
 0x18e   : > { %471 = vadd.xlane.f32.xlu0 %v470_v15 }
 0x21b   : > { %v472_v18 = vpop.xlane.xlu0 %471 }
 0x21c   : > { %1467 = vrcp.f32 %v472_v18 }
 0x226   : > { %v1468_v19 = vpop.eup %1467 }
 0x227   : > { %v474_v21 = vmul.f32 %v1468_v19, %v1466_v14  ;;  %v1461_v19 = vld [vmem:[%s1737_s4 + $0x20] sm:$0xff]  }
 0x229   : > { %v475_v23 = vpack.c.bf16 %v474_v21, %v474_v21 }
 0x22b   : > { %1353 = vmatmul.mubr.msk.bf16.vlgmr.msra.gmra.mrb[0].mxu1 %vm463_vm2, %v475_v23 }
 0x22c   : > { %1357 = vmatpush3.bf16.xpose.msra.mxu1 %v542_v22  ;;  %1358 = vmatprep.mubr.msk.bf16.mxu1 %vm1508_vm0, %v1507_v0 }
 0x22d   : > { %1368 = vmatprep.subr.bf16.mxu1 %v1507_v0 }
 0x233   : > { %1359 = vmatmul.mubr.msk.bf16.vlgmr.msra.gmra.mrb[4].mxu1 %vm416_vm1, %v532_v24 }
 0x234   : > { %1372 = vmatprep.mubr.msk.bf16.mxu1 %vm1508_vm0, %v1507_v0  ;;  %1369 = vmatpush3.bf16.msra.mxu1 %v1459_v42 }
 0x235   : > { %1370 = vmatprep.subr.bf16.mxu1 %v1507_v0 }
 0x238   : > { %1371 = vmatpush3.bf16.msra.mxu1 %v1460_v43 }
 0x239   : > { %1384 = vmatprep.subr.bf16.mxu1 %v1507_v0 }
 0x2fe   : > { %v517_v25 = vpop.f32.mrb[0].mxu1 }
 0x2ff   : > { %v1354_v26 = vpop.f32.mrb[1].mxu1  ;;  %v523_v50 = vpack.c.bf16 %v517_v25, %v517_v25 }
 0x300   : > { %v520_v27 = vpop.f32.mrb[2].mxu1 }
 0x301   : > { %v1355_v28 = vpop.f32.mrb[3].mxu1 }
 0x306   : > { %v578_v29 = vpop.f32.mrb[4].mxu1 }
 0x307   : > { %v1360_v30 = vpop.f32.mrb[5].mxu1  ;;  %v584_v31 = vsel %vm463_vm2, %v578_v29, -inf }
 0x308   : > { %585 = vmax.xlane.f32.xlu0 %v584_v31  ;;  %v581_v32 = vpop.f32.mrb[6].mxu1 }
 0x309   : > { %v1361_v33 = vpop.f32.mrb[7].mxu1 }
 0x31e   : > { %599 = vrot.lane.b32.xlu0 %v1624_v34, %s1509_s16 }
 0x322   : > { %764 = vrot.lane.b32.xlu0 %v1600_v9, %s1510_s22 }
 0x326   : > { %762 = vrot.lane.b32.xlu0 %v1604_v10, %s1510_s22 }
 0x395   : > { %v586_v35 = vpop.xlane.xlu0 %585 }
 0x396   : > { %v587_v36 = vsub.f32 %v578_v29, %v586_v35 }
 0x398   : > { %v588_v37 = vmul.f32 1.442695, %v587_v36 }
 0x399   : > { %v600_v40 = vpop.permute.xlu0 %599 }
 0x39a   : > { %1469 = vpow2.f32 %v588_v37  ;;  %v605_v41 = vsel %vm479_vm3, %v600_v40, 0 }
 0x39b   : > { %1363 = vmatpush3.bf16.msra.mxu0 %v605_v41 }
 0x39c   : > { %1376 = vmatprep.subr.bf16.mxu0 %v1507_v0 }
 0x39d   : > { %v765_v51 = vpop.permute.xlu0 %764 }
 0x39e   : > { %v770_v54 = vsel %vm416_vm1, %v765_v51, 0 }
 0x3a1   : > { %v763_v59 = vpop.permute.xlu0 %762 }
 0x3a4   : > { %v1470_v38 = vpop.eup %1469 }
 0x3a5   : > { %v590_v39 = vsel %vm463_vm2, %v1470_v38, 0.0 }
 0x3a6   : > { %591 = vadd.xlane.f32.xlu1 %v590_v39 }
 0x3b7   : > { %824 = vrot.lane.b32.xlu1 %v1624_v34, %s1510_s22 }
 0x433   : > { %v592_v44 = vpop.xlane.xlu1 %591 }
 0x434   : > { %1471 = vrcp.f32 %v592_v44  ;;  %v1463_v44 = vld [vmem:[%s1737_s4 + $0x30] sm:$0xff]  }
 0x437   : > { %v825_v12 = vpop.permute.xlu1 %824 }
 0x438   : > { %v830_v13 = vsel %vm479_vm3, %v825_v12, 0 }
 0x43e   : > { %v1472_v45 = vpop.eup %1471 }
 0x43f   : > { %v594_v46 = vmul.f32 %v1472_v45, %v1470_v38 }
 0x441   : > { %v595_v48 = vpack.c.bf16 %v594_v46, %v594_v46 }
 0x443   : > { %1365 = vmatmul.mubr.msk.bf16.vlgmr.msra.gmra.mrb[4].mxu0 %vm463_vm2, %v595_v48 }
 0x444   : > { %1377 = vmatpush3.bf16.msra.mxu0 %v1457_v47  ;;  %1380 = vmatprep.mubr.msk.bf16.mxu0 %vm1508_vm0, %v1507_v0 }
 0x445   : > { %1378 = vmatprep.subr.bf16.mxu0 %v1507_v0 }
 0x448   : > { %1379 = vmatpush3.bf16.msra.mxu0 %v1458_v49 }
 0x449   : > { %1390 = vmatprep.subr.bf16.mxu0 %v1507_v0 }
 0x44b   : > { %1381 = vmatmul.mubr.msk.bf16.vlgmr.msra.gmra.mrb[8].mxu0 %vm416_vm1, %v523_v50 }
 0x44c   : > { %1392 = vmatprep.mubr.msk.bf16.mxu0 %vm1508_vm0, %v1507_v0  ;;  %1391 = vmatpush3.bf16.msra.mxu0 %v830_v13 }
 0x44d   : > { %1404 = vmatprep.subr.bf16.mxu0 %v1507_v0 }
 0x516   : > { %v641_v52 = vpop.f32.mrb[4].mxu0 }
 0x517   : > { %v647_v53 = vpack.c.bf16 %v641_v52, %v641_v52  ;;  %v1366_v55 = vpop.f32.mrb[5].mxu0 }
 0x518   : > { %v644_v56 = vpop.f32.mrb[6].mxu0 }
 0x519   : > { %v1367_v57 = vpop.f32.mrb[7].mxu0  ;;  %1373 = vmatmul.mubr.msk.bf16.vlgmr.msra.gmra.mrb[8].mxu1 %vm416_vm1, %v647_v53 }
 0x51a   : > { %1385 = vmatpush3.bf16.xpose.msra.mxu1 %v770_v54  ;;  %1386 = vmatprep.mubr.msk.bf16.mxu1 %vm1508_vm0, %v1507_v0 }
 0x51b   : > { %1396 = vmatprep.subr.bf16.mxu1 %v1507_v0 }
 0x51e   : > { %v756_v58 = vpop.f32.mrb[8].mxu0 }
 0x51f   : > { %v1382_v60 = vpop.f32.mrb[9].mxu0 }
 0x520   : > { %v759_v61 = vpop.f32.mrb[10].mxu0  ;;  %v1311_v60 = vld [vmem:[%s1738_s5] ss:$0 sm:$0xff] }
 0x521   : > { %v1383_v62 = vpop.f32.mrb[11].mxu0  ;;  %1387 = vmatmul.mubr.msk.bf16.vlgmr.msra.gmra.mrb[12].mxu1 %vm416_vm1, %v763_v59 }
 0x522   : > { %1400 = vmatprep.mubr.msk.bf16.mxu1 %vm1508_vm0, %v1507_v0  ;;  %1397 = vmatpush3.bf16.msra.mxu1 %v1461_v19 }
 0x523   : > { %1398 = vmatprep.subr.bf16.mxu1 %v1507_v0 }
 0x5ec   : > { %v701_v63 = vpop.f32.mrb[8].mxu1 }
 0x5ed   : > { %v1664_v1 = vadd.f32 %v756_v58, %v701_v63  ;;  %v1374_v2 = vpop.f32.mrb[9].mxu1  ;;  %v1112_v58 = vld [vmem:[%s404_s23] sm:$0xf] }
 0x5ee   : > { %v704_v3 = vpop.f32.mrb[10].mxu1  ;;  %v1113_v63 = vunpack.c.l.bf16 %v1112_v58 }
 0x5ef   : > { %v1375_v4 = vpop.f32.mrb[11].mxu1 }
 0x5f4   : > { %v806_v5 = vpop.f32.mrb[12].mxu1 }
 0x5f5   : > { %v1388_v6 = vpop.f32.mrb[13].mxu1  ;;  %v812_v7 = vsel %vm463_vm2, %v806_v5, -inf }
 0x5f6   : > { %813 = vmax.xlane.f32.xlu0 %v812_v7  ;;  %v809_v8 = vpop.f32.mrb[14].mxu1 }
 0x5f7   : > { %v1389_v11 = vpop.f32.mrb[15].mxu1 }
 0x683   : > { %v814_v14 = vpop.xlane.xlu0 %813 }
 0x684   : > { %v815_v15 = vsub.f32 %v806_v5, %v814_v14 }
 0x686   : > { %v816_v16 = vmul.f32 1.442695, %v815_v15  ;;  %v1312_v15 = vld [vmem:[%s1739_s6] ss:$0 sm:$0xff] }
 0x688   : > { %1473 = vpow2.f32 %v816_v16 }
 0x692   : > { %v1474_v17 = vpop.eup %1473 }
 0x693   : > { %v818_v18 = vsel %vm463_vm2, %v1474_v17, 0.0 }
 0x694   : > { %819 = vadd.xlane.f32.xlu1 %v818_v18 }
 0x6a5   : > { %935 = vrot.lane.b32.xlu1 %v1600_v9, %s1511_s11 }
 0x6a9   : > { %933 = vrot.lane.b32.xlu1 %v1604_v10, %s1511_s11  ;;  %v1462_v10 = vld [vmem:[%s1737_s4 + $0x28] sm:$0xff]  }
 0x6aa   : > { %1399 = vmatpush3.bf16.msra.mxu1 %v1462_v10 }
 0x6ab   : > { %1410 = vmatprep.subr.bf16.mxu1 %v1507_v0 }
 0x721   : > { %v820_v20 = vpop.xlane.xlu1 %819 }
 0x722   : > { %1475 = vrcp.f32 %v820_v20 }
 0x725   : > { %v936_v22 = vpop.permute.xlu1 %935 }
 0x726   : > { %v941_v24 = vsel %vm416_vm1, %v936_v22, 0 }
 0x729   : > { %v934_v9 = vpop.permute.xlu1 %933 }
 0x72c   : > { %v1476_v21 = vpop.eup %1475 }
 0x72d   : > { %v822_v23 = vmul.f32 %v1476_v21, %v1474_v17  ;;  %v1313_v17 = vld [vmem:[%s1740_s7] ss:$0 sm:$0xff] }
 0x72f   : > { %v823_v25 = vpack.c.bf16 %v822_v23, %v822_v23 }
 0x731   : > { %1393 = vmatmul.mubr.msk.bf16.vlgmr.msra.gmra.mrb[12].mxu0 %vm463_vm2, %v823_v25 }
 0x732   : > { %1405 = vmatpush3.bf16.xpose.msra.mxu0 %v941_v24  ;;  %1406 = vmatprep.mubr.msk.bf16.mxu0 %vm1508_vm0, %v1507_v0 }
 0x733   : > { %1416 = vmatprep.subr.bf16.mxu0 %v1507_v0 }
 0x739   : > { %1407 = vmatmul.mubr.msk.bf16.vlgmr.msra.gmra.mrb[16].mxu0 %vm416_vm1, %v934_v9 }
 0x73a   : > { %1420 = vmatprep.mubr.msk.bf16.mxu0 %vm1508_vm0, %v1507_v0  ;;  %1417 = vmatpush3.bf16.msra.mxu0 %v1463_v44 }
 0x73b   : > { %1418 = vmatprep.subr.bf16.mxu0 %v1507_v0 }
 0x804   : > { %v866_v26 = vpop.f32.mrb[12].mxu0 }
 0x805   : > { %v872_v27 = vpack.c.bf16 %v866_v26, %v866_v26  ;;  %v1394_v28 = vpop.f32.mrb[13].mxu0 }
 0x806   : > { %v869_v29 = vpop.f32.mrb[14].mxu0 }
 0x807   : > { %v1395_v30 = vpop.f32.mrb[15].mxu0  ;;  %1401 = vmatmul.mubr.msk.bf16.vlgmr.msra.gmra.mrb[16].mxu1 %vm416_vm1, %v872_v27 }
 0x808   : > { %1412 = vmatprep.mubr.msk.bf16.mxu1 %vm1508_vm0, %v1507_v0 }
 0x80c   : > { %v977_v31 = vpop.f32.mrb[16].mxu0 }
 0x80d   : > { %v1408_v32 = vpop.f32.mrb[17].mxu0  ;;  %v983_v33 = vsel %vm463_vm2, %v977_v31, -inf }
 0x80e   : > { %984 = vmax.xlane.f32.xlu0 %v983_v33  ;;  %v980_v35 = vpop.f32.mrb[18].mxu0 }
 0x80f   : > { %v1409_v36 = vpop.f32.mrb[19].mxu0 }
 0x824   : > { %995 = vrot.lane.b32.xlu0 %v1624_v34, %s1511_s11  ;;  %v1464_v34 = vld [vmem:[%s1737_s4 + $0x38] sm:$0xff]  }
 0x825   : > { %1419 = vmatpush3.bf16.msra.mxu0 %v1464_v34 }
 0x89b   : > { %v985_v37 = vpop.xlane.xlu0 %984 }
 0x89c   : > { %v986_v38 = vsub.f32 %v977_v31, %v985_v37 }
 0x89e   : > { %v987_v39 = vmul.f32 1.442695, %v986_v38 }
 0x89f   : > { %v996_v42 = vpop.permute.xlu0 %995 }
 0x8a0   : > { %1477 = vpow2.f32 %v987_v39  ;;  %v1001_v43 = vsel %vm479_vm3, %v996_v42, 0 }
 0x8a1   : > { %1411 = vmatpush3.bf16.msra.mxu1 %v1001_v43 }
 0x8aa   : > { %v1478_v40 = vpop.eup %1477 }
 0x8ab   : > { %v989_v41 = vsel %vm463_vm2, %v1478_v40, 0.0 }
 0x8ac   : > { %990 = vadd.xlane.f32.xlu1 %v989_v41 }
 0x8da   : > { %v926_v45 = vpop.f32.mrb[16].mxu1 }
 0x8db   : > { %v932_v46 = vadd.f32 %v926_v45, %v1664_v1  ;;  %v1402_v47 = vpop.f32.mrb[17].mxu1 }
 0x8dc   : > { %v929_v48 = vpop.f32.mrb[18].mxu1 }
 0x8dd   : > { %v1403_v49 = vpop.f32.mrb[19].mxu1 }
 0x939   : > { %v991_v50 = vpop.xlane.xlu1 %990 }
 0x93a   : > { %1479 = vrcp.f32 %v991_v50 }
 0x944   : > { %v1480_v51 = vpop.eup %1479 }
 0x945   : > { %v993_v52 = vmul.f32 %v1480_v51, %v1478_v40 }
 0x947   : > { %v994_v53 = vpack.c.bf16 %v993_v52, %v993_v52 }
 0x949   : > { %1413 = vmatmul.mubr.msk.bf16.vlgmr.msra.gmra.mrb[20].mxu1 %vm463_vm2, %v994_v53 }
 0xa1c   : > { %v1037_v54 = vpop.f32.mrb[20].mxu1 }
 0xa1d   : > { %v1043_v55 = vpack.c.bf16 %v1037_v54, %v1037_v54  ;;  %v1414_v56 = vpop.f32.mrb[21].mxu1 }
 0xa1e   : > { %v1040_v57 = vpop.f32.mrb[22].mxu1 }
 0xa1f   : > { %v1415_v0 = vpop.f32.mrb[23].mxu1  ;;  %1421 = vmatmul.mubr.msk.bf16.vlgmr.msra.gmra.mrb[20].mxu0 %vm416_vm1, %v1043_v55 }
 0xaf2   : > { %v1097_v59 = vpop.f32.mrb[20].mxu0 }
 0xaf3   : > { %v1103_v61 = vadd.f32 %v1097_v59, %v932_v46  ;;  %v1422_v62 = vpop.f32.mrb[21].mxu0 }
 0xaf4   : > { %v1100_v1 = vpop.f32.mrb[22].mxu0 }
 0xaf5   : > { %v1111_v2 = vadd.f32 %v1311_v60, %v1103_v61  ;;  %v1423_v3 = vpop.f32.mrb[23].mxu0 }
 0xaf7   : > { %v1114_v4 = vadd.f32 %v1113_v63, %v1111_v2 }
 0xaf9   : > { %1115 = vadd.xlane.f32.xlu0 %v1114_v4 }
 0xb86   : > { %v1116_v5 = vpop.xlane.xlu0 %1115 }
 0xb87   : > { %v1118_v6 = vmul.f32 0.0078125, %v1116_v5 }
 0xb89   : > { %v1119_v7 = vsub.f32 %v1114_v4, %v1118_v6 }
 0xb8b   : > { %v1120_v8 = vmul.f32 %v1119_v7, %v1119_v7 }
 0xb8d   : > { %1121 = vadd.xlane.f32.xlu1 %v1120_v8 }
 0xc1a   : > { %v1122_v11 = vpop.xlane.xlu1 %1121 }
 0xc1b   : > { %v1123_v12 = vmul.f32 0.0078125, %v1122_v11 }
 0xc1d   : > { %v1124_v13 = vadd.f32 1e-05, %v1123_v12 }
 0xc1f   : > { %1481 = vrsqrt.f32 %v1124_v13 }
 0xc29   : > { %v1482_v14 = vpop.eup %1481 }
 0xc2a   : > { %v1126_v16 = vmul.f32 %v1482_v14, %v1119_v7 }
 0xc2c   : > { %v1134_v18 = vmul.f32 %v1312_v15, %v1126_v16 }
 0xc2e   : > { %v1142_v19 = vadd.f32 %v1313_v17, %v1134_v18 }
 0xc30   : > { %v1143_v20 = vpack.c.bf16 %v1142_v19, %v1142_v19 }
 0xc32   : > { %1144 = vst [vmem:[%s411_s13] sm:$0xf] %v1143_v20 }
 0xc33 PF: > { %s18_s29 = sadd.s32 1, %s1505_s29   ;;  %s1742_s27 = smov %s1501_s28 }
 0xc34   : > { %p15_p5 = scmp.ge.s32.totalorder %s18_s29, 4   ;;  %s1743_s28 = smov %s1745_s30 }
 0xc36   :  { %17 = sbr.rel (!%p15_p5) target bundleno = 2 (0x2), region = 91 }

// kernel: decoder_layer_forward.11
= control target key start
LH: loop header
LB: loop body
LE: loop exit
PB: predicated region body
PF: predicated region fallthrough
CT: control target
= control target key end

     0   :  { %v541_v1 = vmov 0   ;;  %v47_v34 = vlaneseq  ;;  %s696_s1 = inlined_call_operand.vmem [shape: bf16[128,256], index: 1, kind: input, shape index: {}]   ;;  %s697_s3 = inlined_call_operand.vmem [shape: bf16[256,128], index: 3, kind: input, shape index: {}]   ;;  %s698_s0 = inlined_call_operand.vmem [shape: bf16[16,128], index: 0, kind: input, shape index: {}]   ;;  %s699_s2 = inlined_call_operand.vmem [shape: f32[1,256], index: 2, kind: input, shape index: {}]   ;;  %s700_s4 = inlined_call_operand.vmem [shape: f32[1,128], index: 4, kind: input, shape index: {}]   ;;  %s701_s5 = inlined_call_operand.vmem [shape: f32[1,128], index: 5, kind: input, shape index: {}]   ;;  %s702_s6 = inlined_call_operand.vmem [shape: f32[1,128], index: 6, kind: input, shape index: {}]   ;;  %s703_s7 = inlined_call_operand.vmem [shape: bf16[16,128], index: 7, kind: output, shape index: {}]  }
   0x1   :  { %v495_v0 = vld [vmem:[%s696_s1 + $0x4] ss:$8 sps:$4 sm:$0xff]   ;;  %175 = vmatprep.mubr.bf16.mxu0 %v541_v1  ;;  %v497_v2 = vld [vmem:[%s696_s1] ss:$8 sps:$4 sm:$0xff]   ;;  %v498_v3 = vld [vmem:[%s696_s1 + $0x14] ss:$8 sps:$4 sm:$0xff]  }
   0x2   :  { %143 = vmatprep.subr.bf16.mxu0 %v495_v0  ;;  %v500_v4 = vld [vmem:[%s696_s1 + $0x10] ss:$8 sps:$4 sm:$0xff]   ;;  %v501_v5 = vld [vmem:[%s696_s1 + $0x24] ss:$8 sps:$4 sm:$0xff]   ;;  %v503_v6 = vld [vmem:[%s696_s1 + $0x20] ss:$8 sps:$4 sm:$0xff]  }
   0x3   :  { %144 = vmatpush1.bf16.msra.mxu0 %v497_v2  ;;  %v504_v7 = vld [vmem:[%s696_s1 + $0x34] ss:$8 sps:$4 sm:$0xff]   ;;  %v506_v8 = vld [vmem:[%s696_s1 + $0x30] ss:$8 sps:$4 sm:$0xff]   ;;  %v507_v9 = vld [vmem:[%s696_s1 + $0x44] ss:$8 sps:$4 sm:$0xff]  }
   0x4   :  { %145 = vmatprep.subr.bf16.mxu0 %v498_v3  ;;  %v520_v10 = vld [vmem:[%s697_s3 + $0x40] sm:$0xff]   ;;  %v522_v13 = vld [vmem:[%s697_s3 + $0x48] sm:$0xff]   ;;  %v524_v15 = vld [vmem:[%s697_s3 + $0x50] sm:$0xff]   ;;  %v48_v35 = vshrl.u32 %v47_v34, 7 }
   0x5   :  { %v521_v11 = vld [vmem:[%s697_s3] sm:$0xff]   ;;  %472 = vmatprep.subr.bf16.mxu1 %v520_v10  ;;  %v523_v14 = vld [vmem:[%s697_s3 + $0x8] sm:$0xff]   ;;  %v510_v16 = vld [vmem:[%s696_s1 + $0x54] ss:$8 sps:$4 sm:$0xff]  }
   0x6   :  { %v509_v12 = vld [vmem:[%s696_s1 + $0x40] ss:$8 sps:$4 sm:$0xff]   ;;  %473 = vmatpush3.bf16.msra.mxu1 %v521_v11  ;;  %v512_v17 = vld [vmem:[%s696_s1 + $0x50] ss:$8 sps:$4 sm:$0xff]   ;;  %v513_v20 = vld [vmem:[%s696_s1 + $0x64] ss:$8 sps:$4 sm:$0xff]  }
   0x7   :  { %146 = vmatpush1.bf16.msra.mxu0 %v500_v4  ;;  %474 = vmatprep.subr.bf16.mxu1 %v522_v13  ;;  %v525_v18 = vld [vmem:[%s697_s3 + $0x10] sm:$0xff]   ;;  %v526_v19 = vld [vmem:[%s697_s3 + $0x58] sm:$0xff]   ;;  %v515_v21 = vld [vmem:[%s696_s1 + $0x60] ss:$8 sps:$4 sm:$0xff]   ;;  %v49_v36 = vsub.s32 0, %v48_v35  ;;  %v53_v38 = vsub.s32 1, %v48_v35 }
   0x8   :  { %147 = vmatprep.subr.bf16.mxu0 %v501_v5  ;;  %v527_v22 = vld [vmem:[%s697_s3 + $0x18] sm:$0xff]   ;;  %v528_v24 = vld [vmem:[%s697_s3 + $0x60] sm:$0xff]   ;;  %v530_v28 = vld [vmem:[%s697_s3 + $0x68] sm:$0xff]  }
   0x9   :  { %v516_v23 = vld [vmem:[%s696_s1 + $0x74] ss:$8 sps:$4 sm:$0xff]   ;;  %v529_v25 = vld [vmem:[%s697_s3 + $0x20] sm:$0xff]   ;;  %v518_v26 = vld [vmem:[%s696_s1 + $0x70] ss:$8 sps:$4 sm:$0xff]  }
   0xa   :  { %475 = vmatpush3.bf16.msra.mxu1 %v523_v14  ;;  %v27_v27 = vld [vmem:[%s698_s0] sm:$0xff]   ;;  %v531_v29 = vld [vmem:[%s697_s3 + $0x28] sm:$0xff]   ;;  %v532_v30 = vld [vmem:[%s697_s3 + $0x70] sm:$0xff]  }
   0xb   :  { %148 = vmatpush1.bf16.msra.mxu0 %v503_v6  ;;  %476 = vmatprep.subr.bf16.mxu1 %v524_v15  ;;  %v533_v31 = vld [vmem:[%s697_s3 + $0x30] sm:$0xff]   ;;  %v534_v32 = vld [vmem:[%s697_s3 + $0x78] sm:$0xff]   ;;  %v45_v37 = vld [vmem:[%s699_s2] sm:$0x3]  ;;  %v368_v60 = vunpack.c.l.bf16 %v27_v27  ;;  %v369_v2 = vunpack.c.h.bf16 %v27_v27 }
   0xc   :  { %149 = vmatprep.subr.bf16.mxu0 %v504_v7  ;;  %v535_v33 = vld [vmem:[%s697_s3 + $0x38] sm:$0xff]   ;;  %v50_v39 = vrot.slane %v45_v37, %v49_v36  ;;  %v54_v40 = vrot.slane %v45_v37, %v53_v38  ;;  %v444_v56 = vld [vmem:[%s700_s4] ss:$0 sm:$0xff] }
   0xe   :  { %477 = vmatpush3.bf16.msra.mxu1 %v525_v18 }
   0xf   :  { %150 = vmatpush1.bf16.msra.mxu0 %v506_v8  ;;  %478 = vmatprep.subr.bf16.mxu1 %v526_v19 }
  0x10   :  { %151 = vmatprep.subr.bf16.mxu0 %v507_v9 }
  0x12   :  { %479 = vmatpush3.bf16.msra.mxu1 %v527_v22 }
  0x13   :  { %152 = vmatpush1.bf16.msra.mxu0 %v509_v12  ;;  %480 = vmatprep.subr.bf16.mxu1 %v528_v24  ;;  %v462_v24 = vld [vmem:[%s702_s6] ss:$0 sm:$0xff] }
  0x14   :  { %153 = vmatprep.subr.bf16.mxu0 %v510_v16 }
  0x16   :  { %481 = vmatpush3.bf16.msra.mxu1 %v529_v25 }
  0x17   :  { %154 = vmatpush1.bf16.msra.mxu0 %v512_v17  ;;  %482 = vmatprep.subr.bf16.mxu1 %v530_v28 }
  0x18   :  { %155 = vmatprep.subr.bf16.mxu0 %v513_v20  ;;  %v461_v20 = vld [vmem:[%s701_s5] ss:$0 sm:$0xff] }
  0x1a   :  { %483 = vmatpush3.bf16.msra.mxu1 %v531_v29 }
  0x1b   :  { %156 = vmatpush1.bf16.msra.mxu0 %v515_v21  ;;  %484 = vmatprep.subr.bf16.mxu1 %v532_v30 }
  0x1c   :  { %157 = vmatprep.subr.bf16.mxu0 %v516_v23 }
  0x1e   :  { %485 = vmatpush3.bf16.msra.mxu1 %v533_v31 }
  0x1f   :  { %158 = vmatpush1.bf16.msra.mxu0 %v518_v26  ;;  %486 = vmatprep.subr.bf16.mxu1 %v534_v32 }
  0x22   :  { %176 = vmatmul.mubr.bf16.vlgmr.msra.gmra.mrb[0].mxu0 %v27_v27  ;;  %487 = vmatpush3.bf16.msra.mxu1 %v535_v33 }
  0xf5   :  { %v177_v41 = vpop.f32.mrb[0].mxu0 }
  0xf6   :  { %v178_v42 = vadd.f32 %v177_v41, %v50_v39  ;;  %v179_v43 = vpop.f32.mrb[1].mxu0 }
  0xf7   :  { %v180_v44 = vadd.f32 %v179_v43, %v54_v40  ;;  %v181_v45 = vpop.f32.mrb[2].mxu0 }
  0xf8   :  { %v182_v46 = vadd.f32 %v181_v45, %v50_v39  ;;  %v183_v47 = vpop.f32.mrb[3].mxu0  ;;  %v186_v49 = vmax.f32 %v178_v42, 0.0 }
  0xf9   :  { %v184_v48 = vadd.f32 %v183_v47, %v54_v40  ;;  %v187_v51 = vmax.f32 %v180_v44, 0.0 }
  0xfa   :  { %v188_v50 = vmax.f32 %v182_v46, 0.0 }
  0xfb   :  { %v189_v52 = vmax.f32 %v184_v48, 0.0 }
  0xfc   :  { %v190_v53 = vpack.c.bf16 %v188_v50, %v186_v49 }
  0xfd   :  { %v191_v54 = vpack.c.bf16 %v189_v52, %v187_v51 }
  0xff   :  { %359 = vmatprep.mubr.bf16.mxu1 %v191_v54 }
 0x100   :  { %360 = vmatmul.mubr.bf16.vlgmr.msra.gmra.mrb[0].mxu1 %v190_v53 }
 0x1d3   :  { %v488_v55 = vpop.f32.mrb[0].mxu1 }
 0x1d4   :  { %v489_v57 = vpop.f32.mrb[1].mxu1 }
 0x1d5   :  { %v490_v58 = vadd.f32 %v489_v57, %v488_v55  ;;  %v491_v59 = vpop.f32.mrb[2].mxu1 }
 0x1d6   :  { %v492_v61 = vpop.f32.mrb[3].mxu1 }
 0x1d7   :  { %v362_v62 = vadd.f32 %v490_v58, %v444_v56  ;;  %v493_v63 = vadd.f32 %v492_v61, %v491_v59 }
 0x1d9   :  { %v365_v0 = vadd.f32 %v493_v63, %v444_v56  ;;  %v370_v1 = vadd.f32 %v368_v60, %v362_v62 }
 0x1db   :  { %372 = vadd.xlane.f32.xlu0 %v370_v1  ;;  %v371_v3 = vadd.f32 %v369_v2, %v365_v0 }
 0x1df   :  { %374 = vadd.xlane.f32.xlu0 %v371_v3 }
 0x268   :  { %v373_v4 = vpop.xlane.xlu0 %372 }
 0x269   :  { %v377_v5 = vmul.f32 0.0078125, %v373_v4 }
 0x26b   :  { %v379_v6 = vsub.f32 %v370_v1, %v377_v5 }
 0x26c   :  { %v375_v7 = vpop.xlane.xlu0 %374 }
 0x26d   :  { %v378_v8 = vmul.f32 0.0078125, %v375_v7  ;;  %v381_v9 = vmul.f32 %v379_v6, %v379_v6 }
 0x26f   :  { %v380_v10 = vsub.f32 %v371_v3, %v378_v8  ;;  %383 = vadd.xlane.f32.xlu1 %v381_v9 }
 0x271   :  { %v382_v11 = vmul.f32 %v380_v10, %v380_v10 }
 0x273   :  { %385 = vadd.xlane.f32.xlu1 %v382_v11 }
 0x2fc   :  { %v384_v12 = vpop.xlane.xlu1 %383 }
 0x2fd   :  { %v387_v13 = vmul.f32 0.0078125, %v384_v12 }
 0x2ff   :  { %v389_v14 = vadd.f32 1e-05, %v387_v13 }
 0x300   :  { %v386_v15 = vpop.xlane.xlu1 %385 }
 0x301   :  { %537 = vrsqrt.f32 %v389_v14  ;;  %v388_v16 = vmul.f32 0.0078125, %v386_v15 }
 0x303   :  { %v390_v17 = vadd.f32 1e-05, %v388_v16 }
 0x305   :  { %539 = vrsqrt.f32 %v390_v17 }
 0x30b   :  { %v538_v18 = vpop.eup %537 }
 0x30c   :  { %v393_v19 = vmul.f32 %v538_v18, %v379_v6 }
 0x30e   :  { %v402_v22 = vmul.f32 %v461_v20, %v393_v19 }
 0x30f   :  { %v540_v21 = vpop.eup %539 }
 0x310   :  { %v394_v23 = vmul.f32 %v540_v21, %v380_v10  ;;  %v411_v26 = vadd.f32 %v462_v24, %v402_v22 }
 0x312   :  { %v403_v25 = vmul.f32 %v461_v20, %v394_v23 }
 0x314   :  { %v412_v27 = vadd.f32 %v462_v24, %v403_v25 }
 0x316   :  { %v470_v28 = vpack.c.bf16 %v412_v27, %v411_v26 }
 0x318   :  { %471 = vst [vmem:[%s703_s7] sm:$0xff] %v470_v28  }

// kernel: decoder_layer_forward.10
= control target key start
LH: loop header
LB: loop body
LE: loop exit
PB: predicated region body
PF: predicated region fallthrough
CT: control target
= control target key end

     0   :  { %s2130_s13 = smov 0   ;;  %s2132_s14 = smov 0   ;;  %s2399_s0 = inlined_call_operand.vmem [shape: bf16[2,8,128], index: 0, kind: input, shape index: {}]   ;;  %s2400_s1 = inlined_call_operand.vmem [shape: bf16[2,8,128], index: 1, kind: input, shape index: {}]   ;;  %s2401_s2 = inlined_call_operand.vmem [shape: bf16[2,16,384], index: 2, kind: input, shape index: {}, may-alias: {2,3,4}]   ;;  %s2402_s3 = inlined_call_operand.vmem [shape: bf16[2,16,384], index: 3, kind: input, shape index: {}, may-alias: {2,3,4}]   ;;  %s2403_s4 = inlined_call_operand.vmem [shape: bf16[2,16,384], index: 4, kind: input, shape index: {}, may-alias: {2,3,4}]   ;;  %s2404_s5 = inlined_call_operand.vmem [shape: bf16[2,8,128], index: 5, kind: input, shape index: {}]   ;;  %s2405_s6 = inlined_call_operand.vmem [shape: bf16[128,128], index: 6, kind: input, shape index: {}]   ;;  %s2406_s7 = inlined_call_operand.vmem [shape: f32[1,128], index: 7, kind: input, shape index: {}]   ;;  %s2407_s8 = inlined_call_operand.vmem [shape: f32[1,128], index: 8, kind: input, shape index: {}]   ;;  %s2408_s9 = inlined_call_operand.vmem [shape: f32[1,128], index: 9, kind: input, shape index: {}]   ;;  %s2409_s10 = inlined_call_operand.vmem [shape: bf16[2,8,128], index: 10, kind: output, shape index: {}]  }
   0x1   :  { %s2134_s15 = smov 0   ;;  %s2136_s16 = smov 0  }
   0x2   :  { %s2138_s17 = smov 0  }
   0x3 LB: > { %s32_s18 = sadd.s32 1, %s2064_s16  ;;  %p102_p1 = scmp.ne.s32.totalorder %s2056_s14, %s2052_s13  ;;  %s2068_s17 = sphi %s2138_s17, %s20_s17   ;;  %s2064_s16 = sphi %s2136_s16, %s2414_s16   ;;  %s2060_s15 = sphi %s2134_s15, %s2413_s15   ;;  %s2056_s14 = sphi %s2132_s14, %s2412_s14   ;;  %s2052_s13 = sphi %s2130_s13, %s2411_s13  }
   0x4   : > { %p34_p0 = scmp.ge.s32.totalorder %s32_s18, 2  ;;  %p103_p2 = scmp.eq.s32.totalorder %s2068_s17, 0 }
   0x5   : > { %s95_s21 = sadd.s32 1, %s2056_s14  ;;  %p1744_p5 = scmp.ge.s32.totalorder %s2068_s17, 2 }
   0x6   : > { %s2416_s18 = smov (%p34_p0, %s32_s18), 0  ;;  %p2161_p3 = por %p103_p2, %p102_p1 }
   0x7   : > { %s92_s20 = ssub.s32 %s2064_s16, %s2416_s18  ;;  %332 = sbr.rel (%p1744_p5) target bundleno = 35 (0x23), region = 32 }
   0x8   : > { %p93_p4 = scmp.eq.s32.totalorder %s92_s20, 0 }
   0xa   : > { %s2169_s22 = scalar_select %p93_p4, %s2056_s14, %s95_s21  }
   0xe   : > { %355 = sbr.rel (!%p2161_p3) target bundleno = 21 (0x15), region = 44  ;;  %s357_s23 = sand.u32 (%p2161_p3), 1, %s2056_s14  }
   0xf   : > { %s1953_s24 = smul.u32 (%p2161_p3), 24, %s2064_s16  ;;  %s1745_s25 = sshll.u32 (%p2161_p3), %s357_s23, 3 }
  0x10   : > { %s359_s29 = scalar_lea.vmem (%p2161_p3), [#allocation2], %s1745_s25 }
  0x11   : > { %s362_s28 = scalar_lea.vmem (%p2161_p3), %s2401_s2, %s1953_s24 }
  0x12   : > { %v378_v0 = vld [vmem:[%s362_s28] sm:$0xf] (%p2161_p3)  ;;  %v380_v1 = vld [vmem:[%s362_s28 + $0xc] sm:$0xf] (%p2161_p3) }
  0x13   : > { %379 = vst [vmem:[%s359_s29] sm:$0xf] (%p2161_p3), %v378_v0  ;;  %381 = vst [vmem:[%s359_s29 + $0x4] sm:$0xf] (%p2161_p3), %v380_v1 }
  0x15 PF: > { %408 = sbr.rel (!%p2161_p3) target bundleno = 28 (0x1c), region = 85  ;;  %s410_s30 = sand.u32 (%p2161_p3), 1, %s2056_s14  }
  0x16   : > { %s1748_s11 = smul.u32 (%p2161_p3), 24, %s2064_s16  ;;  %s1747_s12 = sshll.u32 (%p2161_p3), %s410_s30, 3 }
  0x17   : > { %s412_s24 = scalar_lea.vmem (%p2161_p3), [#allocation3], %s1747_s12 }
  0x18   : > { %s1618_s23 = scalar_lea.vmem (%p2161_p3), %s2402_s3, %s1748_s11 }
  0x19   : > { %v1749_v2 = vld [vmem:[%s1618_s23 + $0x4] sm:$0xf] (%p2161_p3)  ;;  %v1750_v3 = vld [vmem:[%s1618_s23 + $0x10] sm:$0xf] (%p2161_p3) }
  0x1a   : > { %433 = vst [vmem:[%s412_s24] sm:$0xf] (%p2161_p3), %v1749_v2  ;;  %435 = vst [vmem:[%s412_s24 + $0x4] sm:$0xf] (%p2161_p3), %v1750_v3 }
  0x1c PF: > { %462 = sbr.rel (!%p2161_p3) target bundleno = 35 (0x23), region = 126  ;;  %s464_s25 = sand.u32 (%p2161_p3), 1, %s2056_s14  }
  0x1d   : > { %s1752_s26 = smul.u32 (%p2161_p3), 24, %s2064_s16  ;;  %s1751_s27 = sshll.u32 (%p2161_p3), %s464_s25, 3 }
  0x1e   : > { %s466_s11 = scalar_lea.vmem (%p2161_p3), [#allocation4], %s1751_s27 }
  0x1f   : > { %s1624_s30 = scalar_lea.vmem (%p2161_p3), %s2403_s4, %s1752_s26 }
  0x20   : > { %v1753_v4 = vld [vmem:[%s1624_s30 + $0x8] sm:$0xf] (%p2161_p3)  ;;  %v1754_v5 = vld [vmem:[%s1624_s30 + $0x14] sm:$0xf] (%p2161_p3) }
  0x21   : > { %487 = vst [vmem:[%s466_s11] sm:$0xf] (%p2161_p3), %v1753_v4  ;;  %489 = vst [vmem:[%s466_s11 + $0x4] sm:$0xf] (%p2161_p3), %v1754_v5 }
  0x23 PF: > { %p1755_p6 = scmp.ge.s32.totalorder %s2068_s17, 1  ;;  %p525_p7 = scmp.lt.s32.totalorder %s2068_s17, 3 }
  0x25   : > { %p526_p8 = pnand %p1755_p6, %p525_p7 }
  0x26   : > { %s532_s19 = sand.u32 (!%p526_p8), 1, %s2052_s13   ;;  %p614_p9 = scmp.lt.s32.totalorder (!%p526_p8), %s2060_s15, 1  ;;  %v2070_v6 = vmov (!%p526_p8), 0.0   ;;  %vm656_vm0 = vcmask (!%p526_p8), 261120   ;;  %vm2071_vm1 = vmmov (!%p526_p8), 0   ;;  %vm754_vm2 = vcmask (!%p526_p8), 130048  }
  0x27   : > { %529 = sbr.rel (%p526_p8) target bundleno = 2868 (0xb34), region = 171  ;;  %1833 = vmatprep.subr.bf16.mxu0 (!%p526_p8), %v2070_v6  ;;  %s2198_s12 = sshll.u32 (!%p526_p8), %s532_s19, 3  ;;  %1835 = vmatprep.mubr.msk.bf16.mxu0 (!%p526_p8), %vm2071_vm1, %v2070_v6  ;;  %v2006_v51 = vld [vmem:[%s2405_s6 + $0x10] sm:$0xff] (!%p526_p8)   ;;  %v2007_v52 = vld [vmem:[%s2405_s6 + $0x18] sm:$0xff] (!%p526_p8)   ;;  %v2004_v56 = vld [vmem:[%s2405_s6] sm:$0xff] (!%p526_p8)  }
  0x28   : > { %1845 = vmatprep.subr.bf16.mxu1 (!%p526_p8), %v2070_v6  ;;  %1847 = vmatprep.mubr.msk.bf16.mxu1 (!%p526_p8), %vm2071_vm1, %v2070_v6  ;;  %s541_s20 = scalar_lea.vmem (!%p526_p8), [#allocation3], %s2198_s12  ;;  %s534_s13 = scalar_lea.vmem (!%p526_p8), [#allocation2], %s2198_s12  ;;  %v2005_v58 = vld [vmem:[%s2405_s6 + $0x8] sm:$0xff] (!%p526_p8)  }
  0x29   : > { %v2206_v7 = vld [vmem:[%s541_s20] sm:$0xff] (!%p526_p8)   ;;  %v2219_v9 = vld [vmem:[%s534_s13] sm:$0xff] (!%p526_p8)   ;;  %s2072_s28 = smov (!%p526_p8), 96   ;;  %s548_s29 = scalar_lea.vmem (!%p526_p8), [#allocation4], %s2198_s12 }
  0x2a   : > { %v661_v8 = vsel (!%p526_p8), %vm656_vm0, %v2206_v7, 0  ;;  %v712_v11 = vsel (!%p526_p8), %vm656_vm0, %v2219_v9, 0  ;;  %826 = vrot.lane.b32.xlu1 (!%p526_p8), %v2206_v7, %s2072_s28  ;;  %v2247_v25 = vld [vmem:[%s548_s29] sm:$0xff] (!%p526_p8)   ;;  %s2073_s19 = smov (!%p526_p8), 64  }
  0x2b   : > { %1834 = vmatpush3.bf16.xpose.msra.mxu0 (!%p526_p8), %v661_v8  ;;  %1846 = vmatpush3.bf16.msra.mxu1 (!%p526_p8), %v2247_v25 }
  0x2c   : > { %1839 = vmatprep.subr.bf16.mxu0 (!%p526_p8), %v2070_v6  ;;  %1851 = vmatprep.subr.bf16.mxu1 (!%p526_p8), %v2070_v6 }
  0x2e   : > { %s2418_s15 = smov (!%p614_p9, %s2060_s15), 1 }
  0x2f   : > { %s2212_s21 = sshll.u32 %s2418_s15, 2  ;;  %s2074_s15 = smov 32  }
  0x30   : > { %s627_s25 = scalar_lea.vmem %s2400_s1, %s2212_s21  ;;  %s620_s27 = scalar_lea.vmem %s2399_s0, %s2212_s21 }
  0x31   : > { %v644_v10 = vld [vmem:[%s627_s25] sm:$0xf]  ;;  %s634_s23 = scalar_lea.vmem %s2404_s5, %s2212_s21  ;;  %s641_s11 = scalar_lea.vmem %s2409_s10, %s2212_s21 }
  0x32   : > { %1836 = vmatmul.mubr.msk.bf16.vlgmr.msra.gmra.mrb[0].mxu0 %vm656_vm0, %v644_v10  ;;  %v643_v12 = vld [vmem:[%s620_s27] sm:$0xf]  ;;  %v2237_v18 = vcombine.low %v644_v10, %v644_v10 }
  0x33   : > { %1840 = vmatpush3.bf16.xpose.msra.mxu0 %v712_v11  ;;  %1841 = vmatprep.mubr.msk.bf16.mxu0 %vm2071_vm1, %v2070_v6  ;;  %v2241_v19 = vcombine.low %v643_v12, %v643_v12 }
  0x34   : > { %1863 = vmatprep.subr.bf16.mxu0 %v2070_v6  ;;  %824 = vrot.lane.b32.xlu1 %v2237_v18, %s2072_s28 }
  0x38   : > { %877 = vrot.lane.b32.xlu1 %v2241_v19, %s2072_s28 }
  0x3e   : > { %1842 = vmatmul.mubr.msk.bf16.vlgmr.msra.gmra.mrb[0].mxu0 %vm656_vm0, %v643_v12 }
  0x3f   : > { %1865 = vmatprep.mubr.msk.bf16.mxu0 %vm2071_vm1, %v2070_v6 }
  0x9c   : > { %v827_v28 = vpop.permute.xlu1 %826 }
  0x9d   : > { %v832_v30 = vsel %vm656_vm0, %v827_v28, 0 }
  0xa6   : > { %v825_v33 = vpop.permute.xlu1 %824 }
  0xaa   : > { %v878_v35 = vpop.permute.xlu1 %877 }
 0x111   : > { %v748_v13 = vpop.f32.mrb[0].mxu0 }
 0x112   : > { %v1843_v14 = vpop.f32.mrb[1].mxu0  ;;  %v755_v15 = vsel %vm754_vm2, %v748_v13, -inf }
 0x113   : > { %756 = vmax.xlane.f32.xlu0 %v755_v15  ;;  %v751_v16 = vpop.f32.mrb[2].mxu0 }
 0x114   : > { %v1844_v17 = vpop.f32.mrb[3].mxu0 }
 0x1a0   : > { %v757_v20 = vpop.xlane.xlu0 %756 }
 0x1a1   : > { %v758_v21 = vsub.f32 %v748_v13, %v757_v20 }
 0x1a3   : > { %v759_v22 = vmul.f32 1.442695, %v758_v21 }
 0x1a5   : > { %2012 = vpow2.f32 %v759_v22 }
 0x1af   : > { %v2013_v23 = vpop.eup %2012 }
 0x1b0   : > { %v761_v24 = vsel %vm754_vm2, %v2013_v23, 0.0 }
 0x1b1   : > { %762 = vadd.xlane.f32.xlu0 %v761_v24 }
 0x1c7   : > { %879 = vrot.lane.b32.xlu0 %v2219_v9, %s2072_s28 }
 0x23e   : > { %v763_v26 = vpop.xlane.xlu0 %762 }
 0x23f   : > { %2014 = vrcp.f32 %v763_v26 }
 0x242   : > { %v880_v32 = vpop.permute.xlu0 %879 }
 0x243   : > { %v885_v34 = vsel %vm656_vm0, %v880_v32, 0 }
 0x249   : > { %v2015_v27 = vpop.eup %2014 }
 0x24a   : > { %v765_v29 = vmul.f32 %v2015_v27, %v2013_v23 }
 0x24c   : > { %v766_v31 = vpack.c.bf16 %v765_v29, %v765_v29 }
 0x24e   : > { %1848 = vmatmul.mubr.msk.bf16.vlgmr.msra.gmra.mrb[0].mxu1 %vm754_vm2, %v766_v31 }
 0x24f   : > { %1852 = vmatpush3.bf16.xpose.msra.mxu1 %v832_v30  ;;  %1853 = vmatprep.mubr.msk.bf16.mxu1 %vm2071_vm1, %v2070_v6 }
 0x250   : > { %1857 = vmatprep.subr.bf16.mxu1 %v2070_v6 }
 0x256   : > { %1854 = vmatmul.mubr.msk.bf16.vlgmr.msra.gmra.mrb[4].mxu1 %vm656_vm0, %v825_v33 }
 0x257   : > { %1858 = vmatpush3.bf16.xpose.msra.mxu1 %v885_v34  ;;  %1859 = vmatprep.mubr.msk.bf16.mxu1 %vm2071_vm1, %v2070_v6 }
 0x258   : > { %1869 = vmatprep.subr.bf16.mxu1 %v2070_v6 }
 0x262   : > { %1860 = vmatmul.mubr.msk.bf16.vlgmr.msra.gmra.mrb[4].mxu1 %vm656_vm0, %v878_v35 }
 0x263   : > { %1873 = vmatprep.mubr.msk.bf16.mxu1 %vm2071_vm1, %v2070_v6  ;;  %1870 = vmatpush3.bf16.msra.mxu1 %v2006_v51 }
 0x264   : > { %1871 = vmatprep.subr.bf16.mxu1 %v2070_v6 }
 0x267   : > { %1872 = vmatpush3.bf16.msra.mxu1 %v2007_v52 }
 0x268   : > { %1885 = vmatprep.subr.bf16.mxu1 %v2070_v6 }
 0x321   : > { %v810_v36 = vpop.f32.mrb[0].mxu1 }
 0x322   : > { %v1849_v37 = vpop.f32.mrb[1].mxu1  ;;  %v816_v59 = vpack.c.bf16 %v810_v36, %v810_v36 }
 0x323   : > { %v813_v38 = vpop.f32.mrb[2].mxu1 }
 0x324   : > { %v1850_v39 = vpop.f32.mrb[3].mxu1 }
 0x335   : > { %v921_v40 = vpop.f32.mrb[4].mxu1 }
 0x336   : > { %v1861_v41 = vpop.f32.mrb[5].mxu1  ;;  %v927_v42 = vsel %vm754_vm2, %v921_v40, -inf }
 0x337   : > { %928 = vmax.xlane.f32.xlu1 %v927_v42  ;;  %v924_v43 = vpop.f32.mrb[6].mxu1 }
 0x338   : > { %v1862_v44 = vpop.f32.mrb[7].mxu1 }
 0x348   : > { %939 = vrot.lane.b32.xlu1 %v2247_v25, %s2072_s28 }
 0x34c   : > { %1100 = vrot.lane.b32.xlu1 %v2237_v18, %s2073_s19 }
 0x350   : > { %1152 = vrot.lane.b32.xlu1 %v2219_v9, %s2073_s19 }
 0x354   : > { %1150 = vrot.lane.b32.xlu1 %v2241_v19, %s2073_s19 }
 0x358   : > { %1321 = vrot.lane.b32.xlu1 %v2206_v7, %s2074_s15 }
 0x35c   : > { %1319 = vrot.lane.b32.xlu1 %v2237_v18, %s2074_s15 }
 0x360   : > { %1369 = vrot.lane.b32.xlu1 %v2241_v19, %s2074_s15 }
 0x3c4   : > { %v929_v45 = vpop.xlane.xlu1 %928 }
 0x3c5   : > { %v930_v46 = vsub.f32 %v921_v40, %v929_v45 }
 0x3c7   : > { %v931_v47 = vmul.f32 1.442695, %v930_v46 }
 0x3c8   : > { %v940_v50 = vpop.permute.xlu1 %939 }
 0x3c9   : > { %2016 = vpow2.f32 %v931_v47  ;;  %1864 = vmatpush3.bf16.msra.mxu0 %v940_v50  ;;  %v2009_v50 = vld [vmem:[%s2405_s6 + $0x28] sm:$0xff]  }
 0x3ca   : > { %1877 = vmatprep.subr.bf16.mxu0 %v2070_v6 }
 0x3cc   : > { %v1101_v62 = vpop.permute.xlu1 %1100 }
 0x3d0   : > { %v1153_v4 = vpop.permute.xlu1 %1152 }
 0x3d1   : > { %v1158_v8 = vsel %vm656_vm0, %v1153_v4, 0 }
 0x3d3   : > { %v2017_v48 = vpop.eup %2016 }
 0x3d4   : > { %v933_v49 = vsel %vm754_vm2, %v2017_v48, 0.0  ;;  %v1151_v11 = vpop.permute.xlu1 %1150 }
 0x3d5   : > { %934 = vadd.xlane.f32.xlu0 %v933_v49  ;;  %v2008_v49 = vld [vmem:[%s2405_s6 + $0x20] sm:$0xff]  }
 0x3d8   : > { %v1322_v12 = vpop.permute.xlu1 %1321 }
 0x3d9   : > { %v1327_v13 = vsel %vm656_vm0, %v1322_v12, 0 }
 0x3dc   : > { %v1320_v15 = vpop.permute.xlu1 %1319 }
 0x3e0   : > { %v1370_v17 = vpop.permute.xlu1 %1369 }
 0x3eb   : > { %1102 = vrot.lane.b32.xlu0 %v2206_v7, %s2073_s19 }
 0x3ef   : > { %1371 = vrot.lane.b32.xlu0 %v2219_v9, %s2074_s15 }
 0x462   : > { %v935_v53 = vpop.xlane.xlu0 %934 }
 0x463   : > { %2018 = vrcp.f32 %v935_v53 }
 0x466   : > { %v1103_v60 = vpop.permute.xlu0 %1102 }
 0x467   : > { %v1108_v1 = vsel %vm656_vm0, %v1103_v60, 0  ;;  %v2010_v60 = vld [vmem:[%s2405_s6 + $0x30] sm:$0xff]  }
 0x46a   : > { %v1372_v14 = vpop.permute.xlu0 %1371 }
 0x46b   : > { %v1377_v16 = vsel %vm656_vm0, %v1372_v14, 0 }
 0x46d   : > { %v2019_v54 = vpop.eup %2018 }
 0x46e   : > { %v937_v55 = vmul.f32 %v2019_v54, %v2017_v48 }
 0x470   : > { %v938_v57 = vpack.c.bf16 %v937_v55, %v937_v55 }
 0x472   : > { %1866 = vmatmul.mubr.msk.bf16.vlgmr.msra.gmra.mrb[4].mxu0 %vm754_vm2, %v938_v57 }
 0x473   : > { %1878 = vmatpush3.bf16.msra.mxu0 %v2004_v56  ;;  %1881 = vmatprep.mubr.msk.bf16.mxu0 %vm2071_vm1, %v2070_v6 }
 0x474   : > { %1879 = vmatprep.subr.bf16.mxu0 %v2070_v6 }
 0x477   : > { %1880 = vmatpush3.bf16.msra.mxu0 %v2005_v58 }
 0x478   : > { %1897 = vmatprep.subr.bf16.mxu0 %v2070_v6 }
 0x47a   : > { %1882 = vmatmul.mubr.msk.bf16.vlgmr.msra.gmra.mrb[8].mxu0 %vm656_vm0, %v816_v59 }
 0x47b   : > { %1899 = vmatprep.mubr.msk.bf16.mxu0 %vm2071_vm1, %v2070_v6 }
 0x545   : > { %v979_v61 = vpop.f32.mrb[4].mxu0 }
 0x546   : > { %v985_v63 = vpack.c.bf16 %v979_v61, %v979_v61  ;;  %v1867_v0 = vpop.f32.mrb[5].mxu0  ;;  %v2011_v61 = vld [vmem:[%s2405_s6 + $0x38] sm:$0xff]  }
 0x547   : > { %v982_v2 = vpop.f32.mrb[6].mxu0 }
 0x548   : > { %v1868_v3 = vpop.f32.mrb[7].mxu0  ;;  %1874 = vmatmul.mubr.msk.bf16.vlgmr.msra.gmra.mrb[8].mxu1 %vm656_vm0, %v985_v63 }
 0x549   : > { %1886 = vmatpush3.bf16.xpose.msra.mxu1 %v1108_v1  ;;  %1887 = vmatprep.mubr.msk.bf16.mxu1 %vm2071_vm1, %v2070_v6 }
 0x54a   : > { %1891 = vmatprep.subr.bf16.mxu1 %v2070_v6 }
 0x54d   : > { %v1094_v5 = vpop.f32.mrb[8].mxu0 }
 0x54e   : > { %v1883_v7 = vpop.f32.mrb[9].mxu0 }
 0x54f   : > { %v1097_v9 = vpop.f32.mrb[10].mxu0 }
 0x550   : > { %v1884_v10 = vpop.f32.mrb[11].mxu0  ;;  %1888 = vmatmul.mubr.msk.bf16.vlgmr.msra.gmra.mrb[12].mxu1 %vm656_vm0, %v1101_v62 }
 0x551   : > { %1892 = vmatpush3.bf16.xpose.msra.mxu1 %v1158_v8  ;;  %1893 = vmatprep.mubr.msk.bf16.mxu1 %vm2071_vm1, %v2070_v6  ;;  %v1792_v10 = vld [vmem:[%s2406_s7] ss:$0 sm:$0xff] }
 0x552   : > { %1911 = vmatprep.subr.bf16.mxu1 %v2070_v6 }
 0x55c   : > { %1894 = vmatmul.mubr.msk.bf16.vlgmr.msra.gmra.mrb[12].mxu1 %vm656_vm0, %v1151_v11 }
 0x55d   : > { %1912 = vmatpush3.bf16.xpose.msra.mxu1 %v1327_v13  ;;  %1913 = vmatprep.mubr.msk.bf16.mxu1 %vm2071_vm1, %v2070_v6 }
 0x55e   : > { %1917 = vmatprep.subr.bf16.mxu1 %v2070_v6 }
 0x564   : > { %1914 = vmatmul.mubr.msk.bf16.vlgmr.msra.gmra.mrb[16].mxu1 %vm656_vm0, %v1320_v15 }
 0x565   : > { %1918 = vmatpush3.bf16.xpose.msra.mxu1 %v1377_v16  ;;  %1919 = vmatprep.mubr.msk.bf16.mxu1 %vm2071_vm1, %v2070_v6 }
 0x570   : > { %1920 = vmatmul.mubr.msk.bf16.vlgmr.msra.gmra.mrb[16].mxu1 %vm656_vm0, %v1370_v17 }
 0x61b   : > { %v1039_v18 = vpop.f32.mrb[8].mxu1 }
 0x61c   : > { %v2329_v19 = vadd.f32 %v1094_v5, %v1039_v18  ;;  %v1875_v20 = vpop.f32.mrb[9].mxu1 }
 0x61d   : > { %v1042_v21 = vpop.f32.mrb[10].mxu1 }
 0x61e   : > { %v1876_v22 = vpop.f32.mrb[11].mxu1 }
 0x62f   : > { %v1194_v23 = vpop.f32.mrb[12].mxu1 }
 0x630   : > { %v1895_v24 = vpop.f32.mrb[13].mxu1  ;;  %v1200_v26 = vsel %vm754_vm2, %v1194_v23, -inf }
 0x631   : > { %1201 = vmax.xlane.f32.xlu0 %v1200_v26  ;;  %v1197_v27 = vpop.f32.mrb[14].mxu1 }
 0x632   : > { %v1896_v28 = vpop.f32.mrb[15].mxu1  ;;  %v1793_v27 = vld [vmem:[%s2407_s8] ss:$0 sm:$0xff] }
 0x643   : > { %v1413_v29 = vpop.f32.mrb[16].mxu1 }
 0x644   : > { %v1921_v30 = vpop.f32.mrb[17].mxu1  ;;  %v1419_v38 = vsel %vm754_vm2, %v1413_v29, -inf }
 0x645   : > { %v1416_v31 = vpop.f32.mrb[18].mxu1 }
 0x646   : > { %v1922_v32 = vpop.f32.mrb[19].mxu1 }
 0x647   : > { %1212 = vrot.lane.b32.xlu0 %v2247_v25, %s2073_s19 }
 0x6be   : > { %v1202_v33 = vpop.xlane.xlu0 %1201 }
 0x6bf   : > { %v1203_v34 = vsub.f32 %v1194_v23, %v1202_v33 }
 0x6c1   : > { %v1204_v35 = vmul.f32 1.442695, %v1203_v34 }
 0x6c2   : > { %v1213_v39 = vpop.permute.xlu0 %1212 }
 0x6c3   : > { %2020 = vpow2.f32 %v1204_v35  ;;  %1898 = vmatpush3.bf16.msra.mxu0 %v1213_v39 }
 0x6c4   : > { %1903 = vmatprep.subr.bf16.mxu0 %v2070_v6 }
 0x6cd   : > { %v2021_v36 = vpop.eup %2020 }
 0x6ce   : > { %v1206_v37 = vsel %vm754_vm2, %v2021_v36, 0.0 }
 0x6cf   : > { %1207 = vadd.xlane.f32.xlu1 %v1206_v37 }
 0x6d3   : > { %1420 = vmax.xlane.f32.xlu1 %v1419_v38 }
 0x75c   : > { %v1208_v40 = vpop.xlane.xlu1 %1207 }
 0x75d   : > { %2022 = vrcp.f32 %v1208_v40 }
 0x760   : > { %v1421_v41 = vpop.xlane.xlu1 %1420 }
 0x761   : > { %v1422_v42 = vsub.f32 %v1413_v29, %v1421_v41  ;;  %v1794_v29 = vld [vmem:[%s2408_s9] ss:$0 sm:$0xff] }
 0x763   : > { %v1423_v43 = vmul.f32 1.442695, %v1422_v42 }
 0x765   : > { %2024 = vpow2.f32 %v1423_v43 }
 0x767   : > { %v2023_v44 = vpop.eup %2022 }
 0x768   : > { %v1210_v45 = vmul.f32 %v2023_v44, %v2021_v36 }
 0x76a   : > { %v1211_v46 = vpack.c.bf16 %v1210_v45, %v1210_v45 }
 0x76c   : > { %1900 = vmatmul.mubr.msk.bf16.vlgmr.msra.gmra.mrb[12].mxu0 %vm754_vm2, %v1211_v46 }
 0x76d   : > { %1907 = vmatprep.mubr.msk.bf16.mxu0 %vm2071_vm1, %v2070_v6  ;;  %1904 = vmatpush3.bf16.msra.mxu0 %v2008_v49 }
 0x76e   : > { %1905 = vmatprep.subr.bf16.mxu0 %v2070_v6 }
 0x76f   : > { %v2025_v47 = vpop.eup %2024 }
 0x770   : > { %v1425_v48 = vsel %vm754_vm2, %v2025_v47, 0.0 }
 0x771   : > { %1426 = vadd.xlane.f32.xlu1 %v1425_v48  ;;  %1906 = vmatpush3.bf16.msra.mxu0 %v2009_v50 }
 0x772   : > { %1923 = vmatprep.subr.bf16.mxu0 %v2070_v6 }
 0x782   : > { %1431 = vrot.lane.b32.xlu1 %v2247_v25, %s2074_s15 }
 0x7fe   : > { %v1427_v51 = vpop.xlane.xlu1 %1426 }
 0x7ff   : > { %2026 = vrcp.f32 %v1427_v51 }
 0x802   : > { %v1432_v25 = vpop.permute.xlu1 %1431 }
 0x809   : > { %v2027_v55 = vpop.eup %2026 }
 0x80a   : > { %v1429_v58 = vmul.f32 %v2027_v55, %v2025_v47 }
 0x80c   : > { %v1430_v59 = vpack.c.bf16 %v1429_v58, %v1429_v58 }
 0x83f   : > { %v1252_v52 = vpop.f32.mrb[12].mxu0 }
 0x840   : > { %v1258_v53 = vpack.c.bf16 %v1252_v52, %v1252_v52  ;;  %v1901_v54 = vpop.f32.mrb[13].mxu0 }
 0x841   : > { %v1255_v56 = vpop.f32.mrb[14].mxu0 }
 0x842   : > { %v1902_v57 = vpop.f32.mrb[15].mxu0  ;;  %1908 = vmatmul.mubr.msk.bf16.vlgmr.msra.gmra.mrb[16].mxu0 %vm656_vm0, %v1258_v53 }
 0x843   : > { %1924 = vmatpush3.bf16.msra.mxu0 %v1432_v25  ;;  %1925 = vmatprep.mubr.msk.bf16.mxu0 %vm2071_vm1, %v2070_v6 }
 0x844   : > { %1929 = vmatprep.subr.bf16.mxu0 %v2070_v6 }
 0x84a   : > { %1926 = vmatmul.mubr.msk.bf16.vlgmr.msra.gmra.mrb[20].mxu0 %vm754_vm2, %v1430_v59 }
 0x84b   : > { %1933 = vmatprep.mubr.msk.bf16.mxu0 %vm2071_vm1, %v2070_v6  ;;  %1930 = vmatpush3.bf16.msra.mxu0 %v2010_v60 }
 0x84c   : > { %1931 = vmatprep.subr.bf16.mxu0 %v2070_v6  ;;  %v1546_v6 = vld [vmem:[%s634_s23] sm:$0xf] }
 0x84d   : > { %v1547_v13 = vunpack.c.l.bf16 %v1546_v6 }
 0x84f   : > { %1932 = vmatpush3.bf16.msra.mxu0 %v2011_v61 }
 0x915   : > { %v1312_v62 = vpop.f32.mrb[16].mxu0 }
 0x916   : > { %v1318_v63 = vadd.f32 %v1312_v62, %v2329_v19  ;;  %v1909_v0 = vpop.f32.mrb[17].mxu0 }
 0x917   : > { %v1315_v1 = vpop.f32.mrb[18].mxu0 }
 0x918   : > { %v1910_v2 = vpop.f32.mrb[19].mxu0 }
 0x91d   : > { %v1471_v3 = vpop.f32.mrb[20].mxu0 }
 0x91e   : > { %v1477_v4 = vpack.c.bf16 %v1471_v3, %v1471_v3  ;;  %v1927_v5 = vpop.f32.mrb[21].mxu0 }
 0x91f   : > { %v1474_v7 = vpop.f32.mrb[22].mxu0 }
 0x920   : > { %v1928_v8 = vpop.f32.mrb[23].mxu0  ;;  %1934 = vmatmul.mubr.msk.bf16.vlgmr.msra.gmra.mrb[24].mxu0 %vm656_vm0, %v1477_v4 }
 0x9f3   : > { %v1531_v9 = vpop.f32.mrb[24].mxu0 }
 0x9f4   : > { %v1537_v11 = vadd.f32 %v1531_v9, %v1318_v63  ;;  %v1935_v12 = vpop.f32.mrb[25].mxu0 }
 0x9f5   : > { %v1534_v14 = vpop.f32.mrb[26].mxu0 }
 0x9f6   : > { %v1545_v15 = vadd.f32 %v1792_v10, %v1537_v11  ;;  %v1936_v16 = vpop.f32.mrb[27].mxu0 }
 0x9f8   : > { %v1548_v17 = vadd.f32 %v1547_v13, %v1545_v15 }
 0x9fa   : > { %1549 = vadd.xlane.f32.xlu0 %v1548_v17 }
 0xa87   : > { %v1550_v18 = vpop.xlane.xlu0 %1549 }
 0xa88   : > { %v1552_v19 = vmul.f32 0.0078125, %v1550_v18 }
 0xa8a   : > { %v1553_v20 = vsub.f32 %v1548_v17, %v1552_v19 }
 0xa8c   : > { %v1554_v21 = vmul.f32 %v1553_v20, %v1553_v20 }
 0xa8e   : > { %1555 = vadd.xlane.f32.xlu1 %v1554_v21 }
 0xb1b   : > { %v1556_v22 = vpop.xlane.xlu1 %1555 }
 0xb1c   : > { %v1557_v23 = vmul.f32 0.0078125, %v1556_v22 }
 0xb1e   : > { %v1558_v24 = vadd.f32 1e-05, %v1557_v23 }
 0xb20   : > { %2028 = vrsqrt.f32 %v1558_v24 }
 0xb2a   : > { %v2029_v26 = vpop.eup %2028 }
 0xb2b   : > { %v1560_v28 = vmul.f32 %v2029_v26, %v1553_v20 }
 0xb2d   : > { %v1568_v30 = vmul.f32 %v1793_v27, %v1560_v28 }
 0xb2f   : > { %v1576_v31 = vadd.f32 %v1794_v29, %v1568_v30 }
 0xb31   : > { %v1577_v32 = vpack.c.bf16 %v1576_v31, %v1576_v31 }
 0xb33   : > { %1578 = vst [vmem:[%s641_s11] sm:$0xf] %v1577_v32 }
 0xb34 PF: > { %s20_s17 = sadd.s32 1, %s2068_s17   ;;  %s2411_s13 = smov %s2056_s14 }
 0xb35   : > { %p17_p10 = scmp.ge.s32.totalorder %s20_s17, 4   ;;  %s2412_s14 = smov %s2169_s22 }
 0xb36   : > { %s2413_s15 = smov %s2064_s16  ;;  %s2414_s16 = smov %s2416_s18 }
 0xb37   :  { %19 = sbr.rel (!%p17_p10) target bundleno = 3 (0x3), region = 243 }

</bundles_post_ra>
